<compile_context>
chip_gen: v6e
topology: v6e:2x2x1
jax: 0.10.0
libtpu: 0.0.40
codegen_flags: <defaults>
</compile_context>

<pallas_src>
import functools

import jax
import jax.numpy as jnp
from jax.experimental import pallas as pl
from jax.experimental.pallas import tpu as pltpu

_LANE = 128                            # pad hidden widths to the TPU lane width
_VMEM_LIMIT = 48 * 1024 * 1024         # explicit scoped-VMEM budget (fits v5e/v6e/v7x)
_VMEM_SPEC = pl.BlockSpec(memory_space=pltpu.MemorySpace.VMEM)


def _round_up(x, m):
    return ((x + m - 1) // m) * m


def _row_params():
    return pltpu.CompilerParams(dimension_semantics=("parallel",),
                                vmem_limit_bytes=_VMEM_LIMIT)


# ----------------------------------------------------------------------------
# Pallas kernels
# ----------------------------------------------------------------------------
def _pre_mp_kernel(x_ref, w_ref, b_ref, o_ref):
    """pre_mp: one row-tile of  x @ W + b."""
    o_ref[...] = (jnp.dot(x_ref[...], w_ref[...], preferred_element_type=jnp.float32)
                  + b_ref[...])


def _sage_message_kernel(slab_ref, gate_ref, wl_ref, bl_ref, h_ref):
    """SAGEConv.message over a src-row tile:  h = (all_emb * sigmoid(skip)) @ W_lin + b."""
    curr = slab_ref[...] * gate_ref[...]
    h_ref[...] = (jnp.dot(curr, wl_ref[...], preferred_element_type=jnp.float32)
                  + bl_ref[...])


def _sage_update_kernel(a_ref, h_ref, slab_ref, gate_ref,
                        wua_ref, wux_ref, bu_ref, o_ref):
    """Add-aggregation + SAGEConv.update + ReLU over a dst-row tile of A."""
    a = a_ref[...].astype(jnp.float32)          # bf16 edge counts upcast exactly
    agg = jnp.dot(a, h_ref[...], preferred_element_type=jnp.float32)
    curr = slab_ref[...] * gate_ref[...]
    out = (jnp.dot(agg, wua_ref[...], preferred_element_type=jnp.float32)
           + jnp.dot(curr, wux_ref[...], preferred_element_type=jnp.float32)
           + bu_ref[...])
    o_ref[...] = jnp.maximum(out, 0.0)          # ReLU; dropout = identity (eval mode)


def _pool_post_mp_kernel(oh_ref, emb_ref, w1, b1, w2, b2, w3, b3, w4, b4, o_ref):
    """global_add_pool (one-hot matmul) fused with post_mp:
       Linear -> (Dropout=id) -> LeakyReLU(0.1) -> Linear -> ReLU -> Linear -> ReLU -> Linear."""
    pooled = jnp.dot(oh_ref[...], emb_ref[...], preferred_element_type=jnp.float32)
    h = jnp.dot(pooled, w1[...], preferred_element_type=jnp.float32) + b1[...]
    h = jnp.where(h > 0.0, h, 0.1 * h)
    h = jnp.maximum(jnp.dot(h, w2[...], preferred_element_type=jnp.float32) + b2[...], 0.0)
    h = jnp.maximum(jnp.dot(h, w3[...], preferred_element_type=jnp.float32) + b3[...], 0.0)
    o_ref[...] = jnp.dot(h, w4[...], preferred_element_type=jnp.float32) + b4[...]


# ----------------------------------------------------------------------------
# pallas_call wrappers (tiled over node-row blocks)
# ----------------------------------------------------------------------------
def pallas_pre_mp(x, w, b, tile_m):
    n_pad, f_in = x.shape
    hp = w.shape[1]
    return pl.pallas_call(
        _pre_mp_kernel,
        out_shape=jax.ShapeDtypeStruct((n_pad, hp), jnp.float32),
        grid=(n_pad // tile_m,),
        in_specs=[
            pl.BlockSpec((tile_m, f_in), lambda m: (m, 0)),
            pl.BlockSpec((f_in, hp), lambda m: (0, 0)),
            pl.BlockSpec((1, hp), lambda m: (0, 0)),
        ],
        out_specs=pl.BlockSpec((tile_m, hp), lambda m: (m, 0)),
        compiler_params=_row_params(),
    )(x, w, b)


def pallas_sage_message(slab, gate, w_lin, b_lin, width, tile_m):
    n_pad = slab.shape[0]
    hp = w_lin.shape[1]
    return pl.pallas_call(
        _sage_message_kernel,
        out_shape=jax.ShapeDtypeStruct((n_pad, hp), jnp.float32),
        grid=(n_pad // tile_m,),
        in_specs=[
            pl.BlockSpec((tile_m, width), lambda m: (m, 0)),   # first (i+1) slab blocks
            pl.BlockSpec((1, width), lambda m: (0, 0)),        # precomputed sigmoid gates
            pl.BlockSpec((width, hp), lambda m: (0, 0)),
            pl.BlockSpec((1, hp), lambda m: (0, 0)),
        ],
        out_specs=pl.BlockSpec((tile_m, hp), lambda m: (m, 0)),
        compiler_params=_row_params(),
    )(slab, gate, w_lin, b_lin)


def pallas_sage_update(adj_bf16, h, slab, gate, w_up_a, w_up_x, b_up, width, tile_m):
    n_pad = adj_bf16.shape[0]
    hp = h.shape[1]
    # TODO(synk): for graphs where the full h [N, H_pad] no longer fits in VMEM, add a
    # src-axis reduction grid dimension with an accumulator scratch (pl.when init/finalize).
    return pl.pallas_call(
        _sage_update_kernel,
        out_shape=jax.ShapeDtypeStruct((n_pad, hp), jnp.float32),
        grid=(n_pad // tile_m,),
        in_specs=[
            pl.BlockSpec((tile_m, n_pad), lambda m: (m, 0)),   # dst-row strip of A (bf16)
            pl.BlockSpec((n_pad, hp), lambda m: (0, 0)),       # full h, stays resident
            pl.BlockSpec((tile_m, width), lambda m: (m, 0)),   # gated-skip source rows
            pl.BlockSpec((1, width), lambda m: (0, 0)),
            pl.BlockSpec((hp, hp), lambda m: (0, 0)),
            pl.BlockSpec((width, hp), lambda m: (0, 0)),
            pl.BlockSpec((1, hp), lambda m: (0, 0)),
        ],
        out_specs=pl.BlockSpec((tile_m, hp), lambda m: (m, 0)),
        compiler_params=_row_params(),
    )(adj_bf16, h, slab, gate, w_up_a, w_up_x, b_up)


def pallas_pool_post_mp(onehot, slab, post_params):
    # TODO(synk): tile the pooling reduction over node blocks (accumulator scratch) once
    # N*(L+1)*H_pad exceeds the VMEM budget; at these sizes the fully-fused kernel wins.
    bp = onehot.shape[0]
    (w1, b1, w2, b2, w3, b3, w4, b4) = post_params
    hp = w4.shape[1]
    return pl.pallas_call(
        _pool_post_mp_kernel,
        out_shape=jax.ShapeDtypeStruct((bp, hp), jnp.float32),
        in_specs=[_VMEM_SPEC] * 10,
        out_specs=_VMEM_SPEC,
        compiler_params=pltpu.CompilerParams(vmem_limit_bytes=_VMEM_LIMIT),
    )(onehot, slab, w1, b1, w2, b2, w3, b3, w4, b4)


# ----------------------------------------------------------------------------
# Parameters (logical, PyTorch-equivalent layout) + 128-lane padding helpers
# ----------------------------------------------------------------------------
def init_params(key, input_dim, hidden_dim, output_dim, n_layers):
    assert output_dim == hidden_dim, "post_mp only composes when output_dim == hidden_dim"
    ks = iter(jax.random.split(key, 64))
    p = {}
    p["pre_w"] = 0.1 * jax.random.normal(next(ks), (input_dim, hidden_dim), jnp.float32)
    p["pre_b"] = 0.1 * jax.random.normal(next(ks), (hidden_dim,), jnp.float32)
    p["learnable_skip"] = jnp.ones((n_layers, n_layers), jnp.float32)   # matches __init__
    p["convs"] = []
    for l in range(n_layers):
        hin = hidden_dim * (l + 1)
        p["convs"].append({
            "w_lin": 0.1 * jax.random.normal(next(ks), (hin, hidden_dim), jnp.float32),
            "b_lin": 0.1 * jax.random.normal(next(ks), (hidden_dim,), jnp.float32),
            # lin_update takes cat([aggr (H), x (hin)]); weight pre-split along the input dim
            "w_up_a": 0.1 * jax.random.normal(next(ks), (hidden_dim, hidden_dim), jnp.float32),
            "w_up_x": 0.1 * jax.random.normal(next(ks), (hin, hidden_dim), jnp.float32),
            "b_up": 0.1 * jax.random.normal(next(ks), (hidden_dim,), jnp.float32),
        })
    post_in = hidden_dim * (n_layers + 1)
    p["post"] = (
        0.1 * jax.random.normal(next(ks), (post_in, hidden_dim), jnp.float32),
        0.1 * jax.random.normal(next(ks), (hidden_dim,), jnp.float32),
        0.1 * jax.random.normal(next(ks), (hidden_dim, output_dim), jnp.float32),
        0.1 * jax.random.normal(next(ks), (output_dim,), jnp.float32),
        0.1 * jax.random.normal(next(ks), (hidden_dim, 256), jnp.float32),
        0.1 * jax.random.normal(next(ks), (256,), jnp.float32),
        0.1 * jax.random.normal(next(ks), (256, hidden_dim), jnp.float32),
        0.1 * jax.random.normal(next(ks), (hidden_dim,), jnp.float32),
    )
    return p


def _pad2d(w, rows, cols):
    return jnp.pad(w, ((0, rows - w.shape[0]), (0, cols - w.shape[1])))


def _pad_bias(b, cols):
    return jnp.pad(b, (0, cols - b.shape[0])).reshape(1, -1)


def _pad_rows_blockwise(w, h, hp, out_cols):
    """Pad a [k*h, out] weight to [k*hp, out_cols], keeping the k input blocks aligned with
    the 128-padded embedding-slab layout (each logical H-wide block becomes H_pad wide)."""
    k = w.shape[0] // h
    return jnp.concatenate(
        [_pad2d(w[j * h:(j + 1) * h, :], hp, out_cols) for j in range(k)], axis=0)


def prepare_padded_params(params, hidden_dim, n_layers):
    h, hp = hidden_dim, _round_up(hidden_dim, _LANE)
    pp = {"learnable_skip": params["learnable_skip"],
          "pre_w": _pad2d(params["pre_w"], params["pre_w"].shape[0], hp),
          "pre_b": _pad_bias(params["pre_b"], hp),
          "convs": []}
    for l in range(n_layers):
        c = params["convs"][l]
        pp["convs"].append({
            "w_lin": _pad_rows_blockwise(c["w_lin"], h, hp, hp),
            "b_lin": _pad_bias(c["b_lin"], hp),
            "w_up_a": _pad2d(c["w_up_a"], hp, hp),
            "w_up_x": _pad_rows_blockwise(c["w_up_x"], h, hp, hp),
            "b_up": _pad_bias(c["b_up"], hp),
        })
    (w1, b1, w2, b2, w3, b3, w4, b4) = params["post"]
    pp["post"] = (
        _pad_rows_blockwise(w1, h, hp, hp), _pad_bias(b1, hp),
        _pad2d(w2, hp, hp), _pad_bias(b2, hp),
        _pad2d(w3, hp, 256), _pad_bias(b3, 256),
        _pad2d(w4, 256, hp), _pad_bias(b4, hp),
    )
    return pp


def prepare_padded_inputs(node_feature, adj, batch_onehot, tile_m):
    n = node_feature.shape[0]
    n_pad = _round_up(max(n, tile_m), tile_m)
    x_p = jnp.pad(node_feature, ((0, n_pad - n), (0, 0)))
    # edge counts are small integers -> exact in bf16; halves HBM traffic for the [N,N] operand
    adj_p = jnp.pad(adj, ((0, n_pad - n), (0, n_pad - n))).astype(jnp.bfloat16)
    b = batch_onehot.shape[0]
    b_pad = _round_up(b, 8)
    oh_p = jnp.pad(batch_onehot, ((0, b_pad - b), (0, n_pad - n)))
    return x_p, adj_p, oh_p


# ----------------------------------------------------------------------------
# Forward pass (padded internals; jitted so slab updates are done in place)
# ----------------------------------------------------------------------------
def _forward_padded(pp, x_p, adj_p, onehot_p, *, tile_m):
    n_pad = x_p.shape[0]
    hp = pp["pre_w"].shape[1]
    n_layers = len(pp["convs"])

    x = pallas_pre_mp(x_p, pp["pre_w"], pp["pre_b"], tile_m)

    # Preallocated embedding slab: layer j occupies columns [j*hp, (j+1)*hp).
    slab = jnp.zeros((n_pad, (n_layers + 1) * hp), jnp.float32)
    slab = slab.at[:, :hp].set(x)

    for i in range(n_layers):
        width = (i + 1) * hp
        # sigmoid(learnable_skip) computed once here, broadcast to the padded layout
        gate = jnp.repeat(jax.nn.sigmoid(pp["learnable_skip"][i, :i + 1]), hp).reshape(1, -1)
        c = pp["convs"][i]
        h = pallas_sage_message(slab, gate, c["w_lin"], c["b_lin"], width, tile_m)
        x = pallas_sage_update(adj_p, h, slab, gate,
                               c["w_up_a"], c["w_up_x"], c["b_up"], width, tile_m)
        slab = slab.at[:, width:width + hp].set(x)

    return pallas_pool_post_mp(onehot_p, slab, pp["post"])


def skip_last_gnn_forward(params, node_feature, adj, batch_onehot,
                          hidden_dim, n_layers, tile_m=256):
    assert tile_m % 16 == 0, "tile_m must be a multiple of 16 (bf16 sublane tiling)"
    pp = prepare_padded_params(params, hidden_dim, n_layers)
    x_p, adj_p, oh_p = prepare_padded_inputs(node_feature, adj, batch_onehot, tile_m)
    fwd = jax.jit(functools.partial(_forward_padded, tile_m=tile_m))
    out_p = fwd(pp, x_p, adj_p, oh_p)
    return out_p[:batch_onehot.shape[0], :hidden_dim]


# ----------------------------------------------------------------------------
# Pure-JAX reference (unpadded, f32) for the numerical check
# ----------------------------------------------------------------------------
def reference_forward(params, node_feature, adj, batch_onehot, hidden_dim, n_layers):
    x = node_feature @ params["pre_w"] + params["pre_b"]
    all_emb = [x]
    for i in range(n_layers):
        all_flat = jnp.concatenate(all_emb, axis=1)
        gate = jnp.repeat(jax.nn.sigmoid(params["learnable_skip"][i, :i + 1]), hidden_dim)
        curr = all_flat * gate[None, :]
        c = params["convs"][i]
        h = curr @ c["w_lin"] + c["b_lin"]
        agg = adj @ h
        x = jax.nn.relu(agg @ c["w_up_a"] + curr @ c["w_up_x"] + c["b_up"])
        all_emb.append(x)
    emb = jnp.concatenate(all_emb, axis=1)
    pooled = batch_onehot @ emb
    (w1, b1, w2, b2, w3, b3, w4, b4) = params["post"]
    h = pooled @ w1 + b1
    h = jnp.where(h > 0, h, 0.1 * h)
    h = jax.nn.relu(h @ w2 + b2)
    h = jax.nn.relu(h @ w3 + b3)
    return h @ w4 + b4


# ----------------------------------------------------------------------------
if __name__ == "__main__":
    INPUT_DIM = 16
    HIDDEN_DIM = 32
    OUTPUT_DIM = 32    # must equal HIDDEN_DIM for the module's post_mp to compose
    N_LAYERS = 3
    N_NODES = 24
    N_GRAPHS = 2
    TILE_M = 16        # demo: 2 dst-row tiles after padding N=24 -> 32; use 128-256 for real graphs

    key = jax.random.PRNGKey(0)
    k_feat, k_adj, k_params = jax.random.split(key, 3)

    node_feature = jax.random.normal(k_feat, (N_NODES, INPUT_DIM), jnp.float32)

    # random graph: A[dst, src] = 1 for an edge src->dst, self-loops removed
    adj = (jax.random.uniform(k_adj, (N_NODES, N_NODES)) < 0.3).astype(jnp.float32)
    adj = adj * (1.0 - jnp.eye(N_NODES, dtype=jnp.float32))

    # batch assignment: first half of nodes -> graph 0, second half -> graph 1
    batch = jnp.concatenate([jnp.zeros(N_NODES // 2, jnp.int32),
                             jnp.ones(N_NODES - N_NODES // 2, jnp.int32)])
    batch_onehot = (batch[None, :] == jnp.arange(N_GRAPHS)[:, None]).astype(jnp.float32)

    params = init_params(k_params, INPUT_DIM, HIDDEN_DIM, OUTPUT_DIM, N_LAYERS)

    out = skip_last_gnn_forward(params, node_feature, adj, batch_onehot,
                                HIDDEN_DIM, N_LAYERS, tile_m=TILE_M)
    out = jax.block_until_ready(out)

    ref = reference_forward(params, node_feature, adj, batch_onehot,
                            HIDDEN_DIM, N_LAYERS)
    assert out.shape == (N_GRAPHS, HIDDEN_DIM)
    assert jnp.allclose(out, ref, atol=2e-4, rtol=2e-4), "mismatch vs reference"

    print("KERNEL_OK")
</pallas_src>

<mosaic_0001>
module attributes {stable_mosaic.version = 11 : i64} {
  func.func @_pre_mp_kernel(%arg0: i32, %arg1: memref<16x16xf32, #tpu.memory_space<vmem>>, %arg2: memref<16x128xf32, #tpu.memory_space<vmem>>, %arg3: memref<1x128xf32, #tpu.memory_space<vmem>>, %arg4: memref<16x128xf32, #tpu.memory_space<vmem>>) attributes {dimension_semantics = [#tpu.dimension_semantics<parallel>], iteration_bounds = array<i64: 2>, scalar_prefetch = 0 : i64, scratch_operands = 0 : i64, tpu.core_type = #tpu.core_type<tc>, window_params = [{transform_indices = @transform_0, window_bounds = array<i64: 16, 16>}, {pipeline_mode = #tpu.pipeline_mode<synchronous>, transform_indices = @transform_1, window_bounds = array<i64: 16, 128>}, {pipeline_mode = #tpu.pipeline_mode<synchronous>, transform_indices = @transform_2, window_bounds = array<i64: 1, 128>}, {transform_indices = @transform_3, window_bounds = array<i64: 16, 128>}]} {
    %c0 = arith.constant 0 : index
    %c0_0 = arith.constant 0 : index
    %0 = vector.load %arg1[%c0, %c0_0] : memref<16x16xf32, #tpu.memory_space<vmem>>, vector<16x16xf32>
    %c0_1 = arith.constant 0 : index
    %c0_2 = arith.constant 0 : index
    %1 = vector.load %arg2[%c0_1, %c0_2] : memref<16x128xf32, #tpu.memory_space<vmem>>, vector<16x128xf32>
    %cst = arith.constant dense<0.000000e+00> : vector<16x128xf32>
    %2 = tpu.matmul %0, %1, %cst {dimension_numbers = #tpu.dot_dimension_numbers<[1], [0], [0], [1], [0, 0, 1, 1], [], []>} : vector<16x16xf32>, vector<16x128xf32>, vector<16x128xf32> -> vector<16x128xf32>
    %c0_3 = arith.constant 0 : index
    %c0_4 = arith.constant 0 : index
    %3 = vector.load %arg3[%c0_3, %c0_4] : memref<1x128xf32, #tpu.memory_space<vmem>>, vector<1x128xf32>
    %4 = vector.broadcast %3 : vector<1x128xf32> to vector<16x128xf32>
    %5 = arith.addf %2, %4 : vector<16x128xf32>
    %c0_5 = arith.constant 0 : index
    %c0_6 = arith.constant 0 : index
    %6 = vector.load %arg4[%c0_5, %c0_6] : memref<16x128xf32, #tpu.memory_space<vmem>>, vector<16x128xf32>
    tpu.vector_store %arg4[%c0_5, %c0_6], %5 {strides = array<i32>} : memref<16x128xf32, #tpu.memory_space<vmem>>, vector<16x128xf32>,
    return
  }
  func.func @transform_0(%arg0: i32) -> (i32, i32) {
    %c0_i32 = arith.constant 0 : i32
    %c0_i32_0 = arith.constant 0 : i32
    return %arg0, %c0_i32 : i32, i32
  }
  func.func @transform_1(%arg0: i32) -> (i32, i32) {
    %c0_i32 = arith.constant 0 : i32
    %c0_i32_0 = arith.constant 0 : i32
    %c0_i32_1 = arith.constant 0 : i32
    return %c0_i32, %c0_i32_0 : i32, i32
  }
  func.func @transform_2(%arg0: i32) -> (i32, i32) {
    %c0_i32 = arith.constant 0 : i32
    %c0_i32_0 = arith.constant 0 : i32
    %c0_i32_1 = arith.constant 0 : i32
    return %c0_i32, %c0_i32_0 : i32, i32
  }
  func.func @transform_3(%arg0: i32) -> (i32, i32) {
    %c0_i32 = arith.constant 0 : i32
    %c0_i32_0 = arith.constant 0 : i32
    return %arg0, %c0_i32 : i32, i32
  }
}

module attributes {stable_mosaic.version = 11 : i64} {
  func.func @_sage_message_kernel(%arg0: i32, %arg1: memref<16x128xf32, #tpu.memory_space<vmem>>, %arg2: memref<1x128xf32, #tpu.memory_space<vmem>>, %arg3: memref<128x128xf32, #tpu.memory_space<vmem>>, %arg4: memref<1x128xf32, #tpu.memory_space<vmem>>, %arg5: memref<16x128xf32, #tpu.memory_space<vmem>>) attributes {dimension_semantics = [#tpu.dimension_semantics<parallel>], iteration_bounds = array<i64: 2>, scalar_prefetch = 0 : i64, scratch_operands = 0 : i64, tpu.core_type = #tpu.core_type<tc>, window_params = [{transform_indices = @transform_0, window_bounds = array<i64: 16, 128>}, {pipeline_mode = #tpu.pipeline_mode<synchronous>, transform_indices = @transform_1, window_bounds = array<i64: 1, 128>}, {pipeline_mode = #tpu.pipeline_mode<synchronous>, transform_indices = @transform_2, window_bounds = array<i64: 128, 128>}, {pipeline_mode = #tpu.pipeline_mode<synchronous>, transform_indices = @transform_3, window_bounds = array<i64: 1, 128>}, {transform_indices = @transform_4, window_bounds = array<i64: 16, 128>}]} {
    %c0 = arith.constant 0 : index
    %c0_0 = arith.constant 0 : index
    %0 = vector.load %arg1[%c0, %c0_0] : memref<16x128xf32, #tpu.memory_space<vmem>>, vector<16x128xf32>
    %c0_1 = arith.constant 0 : index
    %c0_2 = arith.constant 0 : index
    %1 = vector.load %arg2[%c0_1, %c0_2] : memref<1x128xf32, #tpu.memory_space<vmem>>, vector<1x128xf32>
    %2 = vector.broadcast %1 : vector<1x128xf32> to vector<16x128xf32>
    %3 = arith.mulf %0, %2 : vector<16x128xf32>
    %c0_3 = arith.constant 0 : index
    %c0_4 = arith.constant 0 : index
    %4 = vector.load %arg3[%c0_3, %c0_4] : memref<128x128xf32, #tpu.memory_space<vmem>>, vector<128x128xf32>
    %cst = arith.constant dense<0.000000e+00> : vector<16x128xf32>
    %5 = tpu.matmul %3, %4, %cst {dimension_numbers = #tpu.dot_dimension_numbers<[1], [0], [0], [1], [0, 0, 1, 1], [], []>} : vector<16x128xf32>, vector<128x128xf32>, vector<16x128xf32> -> vector<16x128xf32>
    %c0_5 = arith.constant 0 : index
    %c0_6 = arith.constant 0 : index
    %6 = vector.load %arg4[%c0_5, %c0_6] : memref<1x128xf32, #tpu.memory_space<vmem>>, vector<1x128xf32>
    %7 = vector.broadcast %6 : vector<1x128xf32> to vector<16x128xf32>
    %8 = arith.addf %5, %7 : vector<16x128xf32>
    %c0_7 = arith.constant 0 : index
    %c0_8 = arith.constant 0 : index
    %9 = vector.load %arg5[%c0_7, %c0_8] : memref<16x128xf32, #tpu.memory_space<vmem>>, vector<16x128xf32>
    tpu.vector_store %arg5[%c0_7, %c0_8], %8 {strides = array<i32>} : memref<16x128xf32, #tpu.memory_space<vmem>>, vector<16x128xf32>,
    return
  }
  func.func @transform_0(%arg0: i32) -> (i32, i32) {
    %c0_i32 = arith.constant 0 : i32
    %c0_i32_0 = arith.constant 0 : i32
    return %arg0, %c0_i32 : i32, i32
  }
  func.func @transform_1(%arg0: i32) -> (i32, i32) {
    %c0_i32 = arith.constant 0 : i32
    %c0_i32_0 = arith.constant 0 : i32
    %c0_i32_1 = arith.constant 0 : i32
    return %c0_i32, %c0_i32_0 : i32, i32
  }
  func.func @transform_2(%arg0: i32) -> (i32, i32) {
    %c0_i32 = arith.constant 0 : i32
    %c0_i32_0 = arith.constant 0 : i32
    %c0_i32_1 = arith.constant 0 : i32
    return %c0_i32, %c0_i32_0 : i32, i32
  }
  func.func @transform_3(%arg0: i32) -> (i32, i32) {
    %c0_i32 = arith.constant 0 : i32
    %c0_i32_0 = arith.constant 0 : i32
    %c0_i32_1 = arith.constant 0 : i32
    return %c0_i32, %c0_i32_0 : i32, i32
  }
  func.func @transform_4(%arg0: i32) -> (i32, i32) {
    %c0_i32 = arith.constant 0 : i32
    %c0_i32_0 = arith.constant 0 : i32
    return %arg0, %c0_i32 : i32, i32
  }
}

module attributes {stable_mosaic.version = 11 : i64} {
  func.func @_sage_update_kernel(%arg0: i32, %arg1: memref<16x32xbf16, #tpu.memory_space<vmem>>, %arg2: memref<32x128xf32, #tpu.memory_space<vmem>>, %arg3: memref<16x128xf32, #tpu.memory_space<vmem>>, %arg4: memref<1x128xf32, #tpu.memory_space<vmem>>, %arg5: memref<128x128xf32, #tpu.memory_space<vmem>>, %arg6: memref<128x128xf32, #tpu.memory_space<vmem>>, %arg7: memref<1x128xf32, #tpu.memory_space<vmem>>, %arg8: memref<16x128xf32, #tpu.memory_space<vmem>>) attributes {dimension_semantics = [#tpu.dimension_semantics<parallel>], iteration_bounds = array<i64: 2>, scalar_prefetch = 0 : i64, scratch_operands = 0 : i64, tpu.core_type = #tpu.core_type<tc>, window_params = [{transform_indices = @transform_0, window_bounds = array<i64: 16, 32>}, {pipeline_mode = #tpu.pipeline_mode<synchronous>, transform_indices = @transform_1, window_bounds = array<i64: 32, 128>}, {transform_indices = @transform_2, window_bounds = array<i64: 16, 128>}, {pipeline_mode = #tpu.pipeline_mode<synchronous>, transform_indices = @transform_3, window_bounds = array<i64: 1, 128>}, {pipeline_mode = #tpu.pipeline_mode<synchronous>, transform_indices = @transform_4, window_bounds = array<i64: 128, 128>}, {pipeline_mode = #tpu.pipeline_mode<synchronous>, transform_indices = @transform_5, window_bounds = array<i64: 128, 128>}, {pipeline_mode = #tpu.pipeline_mode<synchronous>, transform_indices = @transform_6, window_bounds = array<i64: 1, 128>}, {transform_indices = @transform_7, window_bounds = array<i64: 16, 128>}]} {
    %c0 = arith.constant 0 : index
    %c0_0 = arith.constant 0 : index
    %0 = vector.load %arg1[%c0, %c0_0] : memref<16x32xbf16, #tpu.memory_space<vmem>>, vector<16x32xbf16>
    %1 = arith.extf %0 : vector<16x32xbf16> to vector<16x32xf32>
    %c0_1 = arith.constant 0 : index
    %c0_2 = arith.constant 0 : index
    %2 = vector.load %arg2[%c0_1, %c0_2] : memref<32x128xf32, #tpu.memory_space<vmem>>, vector<32x128xf32>
    %cst = arith.constant dense<0.000000e+00> : vector<16x128xf32>
    %3 = tpu.matmul %1, %2, %cst {dimension_numbers = #tpu.dot_dimension_numbers<[1], [0], [0], [1], [0, 0, 1, 1], [], []>} : vector<16x32xf32>, vector<32x128xf32>, vector<16x128xf32> -> vector<16x128xf32>
    %c0_3 = arith.constant 0 : index
    %c0_4 = arith.constant 0 : index
    %4 = vector.load %arg3[%c0_3, %c0_4] : memref<16x128xf32, #tpu.memory_space<vmem>>, vector<16x128xf32>
    %c0_5 = arith.constant 0 : index
    %c0_6 = arith.constant 0 : index
    %5 = vector.load %arg4[%c0_5, %c0_6] : memref<1x128xf32, #tpu.memory_space<vmem>>, vector<1x128xf32>
    %6 = vector.broadcast %5 : vector<1x128xf32> to vector<16x128xf32>
    %7 = arith.mulf %4, %6 : vector<16x128xf32>
    %c0_7 = arith.constant 0 : index
    %c0_8 = arith.constant 0 : index
    %8 = vector.load %arg5[%c0_7, %c0_8] : memref<128x128xf32, #tpu.memory_space<vmem>>, vector<128x128xf32>
    %cst_9 = arith.constant dense<0.000000e+00> : vector<16x128xf32>
    %9 = tpu.matmul %3, %8, %cst_9 {dimension_numbers = #tpu.dot_dimension_numbers<[1], [0], [0], [1], [0, 0, 1, 1], [], []>} : vector<16x128xf32>, vector<128x128xf32>, vector<16x128xf32> -> vector<16x128xf32>
    %c0_10 = arith.constant 0 : index
    %c0_11 = arith.constant 0 : index
    %10 = vector.load %arg6[%c0_10, %c0_11] : memref<128x128xf32, #tpu.memory_space<vmem>>, vector<128x128xf32>
    %cst_12 = arith.constant dense<0.000000e+00> : vector<16x128xf32>
    %11 = tpu.matmul %7, %10, %cst_12 {dimension_numbers = #tpu.dot_dimension_numbers<[1], [0], [0], [1], [0, 0, 1, 1], [], []>} : vector<16x128xf32>, vector<128x128xf32>, vector<16x128xf32> -> vector<16x128xf32>
    %12 = arith.addf %9, %11 : vector<16x128xf32>
    %c0_13 = arith.constant 0 : index
    %c0_14 = arith.constant 0 : index
    %13 = vector.load %arg7[%c0_13, %c0_14] : memref<1x128xf32, #tpu.memory_space<vmem>>, vector<1x128xf32>
    %14 = vector.broadcast %13 : vector<1x128xf32> to vector<16x128xf32>
    %15 = arith.addf %12, %14 : vector<16x128xf32>
    %cst_15 = arith.constant 0.000000e+00 : f32
    %16 = vector.broadcast %cst_15 : f32 to vector<16x128xf32>
    %17 = arith.maximumf %15, %16 : vector<16x128xf32>
    %c0_16 = arith.constant 0 : index
    %c0_17 = arith.constant 0 : index
    %18 = vector.load %arg8[%c0_16, %c0_17] : memref<16x128xf32, #tpu.memory_space<vmem>>, vector<16x128xf32>
    tpu.vector_store %arg8[%c0_16, %c0_17], %17 {strides = array<i32>} : memref<16x128xf32, #tpu.memory_space<vmem>>, vector<16x128xf32>,
    return
  }
  func.func @transform_0(%arg0: i32) -> (i32, i32) {
    %c0_i32 = arith.constant 0 : i32
    %c0_i32_0 = arith.constant 0 : i32
    return %arg0, %c0_i32 : i32, i32
  }
  func.func @transform_1(%arg0: i32) -> (i32, i32) {
    %c0_i32 = arith.constant 0 : i32
    %c0_i32_0 = arith.constant 0 : i32
    %c0_i32_1 = arith.constant 0 : i32
    return %c0_i32, %c0_i32_0 : i32, i32
  }
  func.func @transform_2(%arg0: i32) -> (i32, i32) {
    %c0_i32 = arith.constant 0 : i32
    %c0_i32_0 = arith.constant 0 : i32
    return %arg0, %c0_i32 : i32, i32
  }
  func.func @transform_3(%arg0: i32) -> (i32, i32) {
    %c0_i32 = arith.constant 0 : i32
    %c0_i32_0 = arith.constant 0 : i32
    %c0_i32_1 = arith.constant 0 : i32
    return %c0_i32, %c0_i32_0 : i32, i32
  }
  func.func @transform_4(%arg0: i32) -> (i32, i32) {
    %c0_i32 = arith.constant 0 : i32
    %c0_i32_0 = arith.constant 0 : i32
    %c0_i32_1 = arith.constant 0 : i32
    return %c0_i32, %c0_i32_0 : i32, i32
  }
  func.func @transform_5(%arg0: i32) -> (i32, i32) {
    %c0_i32 = arith.constant 0 : i32
    %c0_i32_0 = arith.constant 0 : i32
    %c0_i32_1 = arith.constant 0 : i32
    return %c0_i32, %c0_i32_0 : i32, i32
  }
  func.func @transform_6(%arg0: i32) -> (i32, i32) {
    %c0_i32 = arith.constant 0 : i32
    %c0_i32_0 = arith.constant 0 : i32
    %c0_i32_1 = arith.constant 0 : i32
    return %c0_i32, %c0_i32_0 : i32, i32
  }
  func.func @transform_7(%arg0: i32) -> (i32, i32) {
    %c0_i32 = arith.constant 0 : i32
    %c0_i32_0 = arith.constant 0 : i32
    return %arg0, %c0_i32 : i32, i32
  }
}

module attributes {stable_mosaic.version = 11 : i64} {
  func.func @_sage_message_kernel(%arg0: i32, %arg1: memref<16x256xf32, #tpu.memory_space<vmem>>, %arg2: memref<1x256xf32, #tpu.memory_space<vmem>>, %arg3: memref<256x128xf32, #tpu.memory_space<vmem>>, %arg4: memref<1x128xf32, #tpu.memory_space<vmem>>, %arg5: memref<16x128xf32, #tpu.memory_space<vmem>>) attributes {dimension_semantics = [#tpu.dimension_semantics<parallel>], iteration_bounds = array<i64: 2>, scalar_prefetch = 0 : i64, scratch_operands = 0 : i64, tpu.core_type = #tpu.core_type<tc>, window_params = [{transform_indices = @transform_0, window_bounds = array<i64: 16, 256>}, {pipeline_mode = #tpu.pipeline_mode<synchronous>, transform_indices = @transform_1, window_bounds = array<i64: 1, 256>}, {pipeline_mode = #tpu.pipeline_mode<synchronous>, transform_indices = @transform_2, window_bounds = array<i64: 256, 128>}, {pipeline_mode = #tpu.pipeline_mode<synchronous>, transform_indices = @transform_3, window_bounds = array<i64: 1, 128>}, {transform_indices = @transform_4, window_bounds = array<i64: 16, 128>}]} {
    %c0 = arith.constant 0 : index
    %c0_0 = arith.constant 0 : index
    %0 = vector.load %arg1[%c0, %c0_0] : memref<16x256xf32, #tpu.memory_space<vmem>>, vector<16x256xf32>
    %c0_1 = arith.constant 0 : index
    %c0_2 = arith.constant 0 : index
    %1 = vector.load %arg2[%c0_1, %c0_2] : memref<1x256xf32, #tpu.memory_space<vmem>>, vector<1x256xf32>
    %2 = vector.broadcast %1 : vector<1x256xf32> to vector<16x256xf32>
    %3 = arith.mulf %0, %2 : vector<16x256xf32>
    %c0_3 = arith.constant 0 : index
    %c0_4 = arith.constant 0 : index
    %4 = vector.load %arg3[%c0_3, %c0_4] : memref<256x128xf32, #tpu.memory_space<vmem>>, vector<256x128xf32>
    %cst = arith.constant dense<0.000000e+00> : vector<16x128xf32>
    %5 = tpu.matmul %3, %4, %cst {dimension_numbers = #tpu.dot_dimension_numbers<[1], [0], [0], [1], [0, 0, 1, 1], [], []>} : vector<16x256xf32>, vector<256x128xf32>, vector<16x128xf32> -> vector<16x128xf32>
    %c0_5 = arith.constant 0 : index
    %c0_6 = arith.constant 0 : index
    %6 = vector.load %arg4[%c0_5, %c0_6] : memref<1x128xf32, #tpu.memory_space<vmem>>, vector<1x128xf32>
    %7 = vector.broadcast %6 : vector<1x128xf32> to vector<16x128xf32>
    %8 = arith.addf %5, %7 : vector<16x128xf32>
    %c0_7 = arith.constant 0 : index
    %c0_8 = arith.constant 0 : index
    %9 = vector.load %arg5[%c0_7, %c0_8] : memref<16x128xf32, #tpu.memory_space<vmem>>, vector<16x128xf32>
    tpu.vector_store %arg5[%c0_7, %c0_8], %8 {strides = array<i32>} : memref<16x128xf32, #tpu.memory_space<vmem>>, vector<16x128xf32>,
    return
  }
  func.func @transform_0(%arg0: i32) -> (i32, i32) {
    %c0_i32 = arith.constant 0 : i32
    %c0_i32_0 = arith.constant 0 : i32
    return %arg0, %c0_i32 : i32, i32
  }
  func.func @transform_1(%arg0: i32) -> (i32, i32) {
    %c0_i32 = arith.constant 0 : i32
    %c0_i32_0 = arith.constant 0 : i32
    %c0_i32_1 = arith.constant 0 : i32
    return %c0_i32, %c0_i32_0 : i32, i32
  }
  func.func @transform_2(%arg0: i32) -> (i32, i32) {
    %c0_i32 = arith.constant 0 : i32
    %c0_i32_0 = arith.constant 0 : i32
    %c0_i32_1 = arith.constant 0 : i32
    return %c0_i32, %c0_i32_0 : i32, i32
  }
  func.func @transform_3(%arg0: i32) -> (i32, i32) {
    %c0_i32 = arith.constant 0 : i32
    %c0_i32_0 = arith.constant 0 : i32
    %c0_i32_1 = arith.constant 0 : i32
    return %c0_i32, %c0_i32_0 : i32, i32
  }
  func.func @transform_4(%arg0: i32) -> (i32, i32) {
    %c0_i32 = arith.constant 0 : i32
    %c0_i32_0 = arith.constant 0 : i32
    return %arg0, %c0_i32 : i32, i32
  }
}

module attributes {stable_mosaic.version = 11 : i64} {
  func.func @_sage_update_kernel(%arg0: i32, %arg1: memref<16x32xbf16, #tpu.memory_space<vmem>>, %arg2: memref<32x128xf32, #tpu.memory_space<vmem>>, %arg3: memref<16x256xf32, #tpu.memory_space<vmem>>, %arg4: memref<1x256xf32, #tpu.memory_space<vmem>>, %arg5: memref<128x128xf32, #tpu.memory_space<vmem>>, %arg6: memref<256x128xf32, #tpu.memory_space<vmem>>, %arg7: memref<1x128xf32, #tpu.memory_space<vmem>>, %arg8: memref<16x128xf32, #tpu.memory_space<vmem>>) attributes {dimension_semantics = [#tpu.dimension_semantics<parallel>], iteration_bounds = array<i64: 2>, scalar_prefetch = 0 : i64, scratch_operands = 0 : i64, tpu.core_type = #tpu.core_type<tc>, window_params = [{transform_indices = @transform_0, window_bounds = array<i64: 16, 32>}, {pipeline_mode = #tpu.pipeline_mode<synchronous>, transform_indices = @transform_1, window_bounds = array<i64: 32, 128>}, {transform_indices = @transform_2, window_bounds = array<i64: 16, 256>}, {pipeline_mode = #tpu.pipeline_mode<synchronous>, transform_indices = @transform_3, window_bounds = array<i64: 1, 256>}, {pipeline_mode = #tpu.pipeline_mode<synchronous>, transform_indices = @transform_4, window_bounds = array<i64: 128, 128>}, {pipeline_mode = #tpu.pipeline_mode<synchronous>, transform_indices = @transform_5, window_bounds = array<i64: 256, 128>}, {pipeline_mode = #tpu.pipeline_mode<synchronous>, transform_indices = @transform_6, window_bounds = array<i64: 1, 128>}, {transform_indices = @transform_7, window_bounds = array<i64: 16, 128>}]} {
    %c0 = arith.constant 0 : index
    %c0_0 = arith.constant 0 : index
    %0 = vector.load %arg1[%c0, %c0_0] : memref<16x32xbf16, #tpu.memory_space<vmem>>, vector<16x32xbf16>
    %1 = arith.extf %0 : vector<16x32xbf16> to vector<16x32xf32>
    %c0_1 = arith.constant 0 : index
    %c0_2 = arith.constant 0 : index
    %2 = vector.load %arg2[%c0_1, %c0_2] : memref<32x128xf32, #tpu.memory_space<vmem>>, vector<32x128xf32>
    %cst = arith.constant dense<0.000000e+00> : vector<16x128xf32>
    %3 = tpu.matmul %1, %2, %cst {dimension_numbers = #tpu.dot_dimension_numbers<[1], [0], [0], [1], [0, 0, 1, 1], [], []>} : vector<16x32xf32>, vector<32x128xf32>, vector<16x128xf32> -> vector<16x128xf32>
    %c0_3 = arith.constant 0 : index
    %c0_4 = arith.constant 0 : index
    %4 = vector.load %arg3[%c0_3, %c0_4] : memref<16x256xf32, #tpu.memory_space<vmem>>, vector<16x256xf32>
    %c0_5 = arith.constant 0 : index
    %c0_6 = arith.constant 0 : index
    %5 = vector.load %arg4[%c0_5, %c0_6] : memref<1x256xf32, #tpu.memory_space<vmem>>, vector<1x256xf32>
    %6 = vector.broadcast %5 : vector<1x256xf32> to vector<16x256xf32>
    %7 = arith.mulf %4, %6 : vector<16x256xf32>
    %c0_7 = arith.constant 0 : index
    %c0_8 = arith.constant 0 : index
    %8 = vector.load %arg5[%c0_7, %c0_8] : memref<128x128xf32, #tpu.memory_space<vmem>>, vector<128x128xf32>
    %cst_9 = arith.constant dense<0.000000e+00> : vector<16x128xf32>
    %9 = tpu.matmul %3, %8, %cst_9 {dimension_numbers = #tpu.dot_dimension_numbers<[1], [0], [0], [1], [0, 0, 1, 1], [], []>} : vector<16x128xf32>, vector<128x128xf32>, vector<16x128xf32> -> vector<16x128xf32>
    %c0_10 = arith.constant 0 : index
    %c0_11 = arith.constant 0 : index
    %10 = vector.load %arg6[%c0_10, %c0_11] : memref<256x128xf32, #tpu.memory_space<vmem>>, vector<256x128xf32>
    %cst_12 = arith.constant dense<0.000000e+00> : vector<16x128xf32>
    %11 = tpu.matmul %7, %10, %cst_12 {dimension_numbers = #tpu.dot_dimension_numbers<[1], [0], [0], [1], [0, 0, 1, 1], [], []>} : vector<16x256xf32>, vector<256x128xf32>, vector<16x128xf32> -> vector<16x128xf32>
    %12 = arith.addf %9, %11 : vector<16x128xf32>
    %c0_13 = arith.constant 0 : index
    %c0_14 = arith.constant 0 : index
    %13 = vector.load %arg7[%c0_13, %c0_14] : memref<1x128xf32, #tpu.memory_space<vmem>>, vector<1x128xf32>
    %14 = vector.broadcast %13 : vector<1x128xf32> to vector<16x128xf32>
    %15 = arith.addf %12, %14 : vector<16x128xf32>
    %cst_15 = arith.constant 0.000000e+00 : f32
    %16 = vector.broadcast %cst_15 : f32 to vector<16x128xf32>
    %17 = arith.maximumf %15, %16 : vector<16x128xf32>
    %c0_16 = arith.constant 0 : index
    %c0_17 = arith.constant 0 : index
    %18 = vector.load %arg8[%c0_16, %c0_17] : memref<16x128xf32, #tpu.memory_space<vmem>>, vector<16x128xf32>
    tpu.vector_store %arg8[%c0_16, %c0_17], %17 {strides = array<i32>} : memref<16x128xf32, #tpu.memory_space<vmem>>, vector<16x128xf32>,
    return
  }
  func.func @transform_0(%arg0: i32) -> (i32, i32) {
    %c0_i32 = arith.constant 0 : i32
    %c0_i32_0 = arith.constant 0 : i32
    return %arg0, %c0_i32 : i32, i32
  }
  func.func @transform_1(%arg0: i32) -> (i32, i32) {
    %c0_i32 = arith.constant 0 : i32
    %c0_i32_0 = arith.constant 0 : i32
    %c0_i32_1 = arith.constant 0 : i32
    return %c0_i32, %c0_i32_0 : i32, i32
  }
  func.func @transform_2(%arg0: i32) -> (i32, i32) {
    %c0_i32 = arith.constant 0 : i32
    %c0_i32_0 = arith.constant 0 : i32
    return %arg0, %c0_i32 : i32, i32
  }
  func.func @transform_3(%arg0: i32) -> (i32, i32) {
    %c0_i32 = arith.constant 0 : i32
    %c0_i32_0 = arith.constant 0 : i32
    %c0_i32_1 = arith.constant 0 : i32
    return %c0_i32, %c0_i32_0 : i32, i32
  }
  func.func @transform_4(%arg0: i32) -> (i32, i32) {
    %c0_i32 = arith.constant 0 : i32
    %c0_i32_0 = arith.constant 0 : i32
    %c0_i32_1 = arith.constant 0 : i32
    return %c0_i32, %c0_i32_0 : i32, i32
  }
  func.func @transform_5(%arg0: i32) -> (i32, i32) {
    %c0_i32 = arith.constant 0 : i32
    %c0_i32_0 = arith.constant 0 : i32
    %c0_i32_1 = arith.constant 0 : i32
    return %c0_i32, %c0_i32_0 : i32, i32
  }
  func.func @transform_6(%arg0: i32) -> (i32, i32) {
    %c0_i32 = arith.constant 0 : i32
    %c0_i32_0 = arith.constant 0 : i32
    %c0_i32_1 = arith.constant 0 : i32
    return %c0_i32, %c0_i32_0 : i32, i32
  }
  func.func @transform_7(%arg0: i32) -> (i32, i32) {
    %c0_i32 = arith.constant 0 : i32
    %c0_i32_0 = arith.constant 0 : i32
    return %arg0, %c0_i32 : i32, i32
  }
}

module attributes {stable_mosaic.version = 11 : i64} {
  func.func @_sage_update_kernel(%arg0: i32, %arg1: memref<16x32xbf16, #tpu.memory_space<vmem>>, %arg2: memref<32x128xf32, #tpu.memory_space<vmem>>, %arg3: memref<16x384xf32, #tpu.memory_space<vmem>>, %arg4: memref<1x384xf32, #tpu.memory_space<vmem>>, %arg5: memref<128x128xf32, #tpu.memory_space<vmem>>, %arg6: memref<384x128xf32, #tpu.memory_space<vmem>>, %arg7: memref<1x128xf32, #tpu.memory_space<vmem>>, %arg8: memref<16x128xf32, #tpu.memory_space<vmem>>) attributes {dimension_semantics = [#tpu.dimension_semantics<parallel>], iteration_bounds = array<i64: 2>, scalar_prefetch = 0 : i64, scratch_operands = 0 : i64, tpu.core_type = #tpu.core_type<tc>, window_params = [{transform_indices = @transform_0, window_bounds = array<i64: 16, 32>}, {pipeline_mode = #tpu.pipeline_mode<synchronous>, transform_indices = @transform_1, window_bounds = array<i64: 32, 128>}, {transform_indices = @transform_2, window_bounds = array<i64: 16, 384>}, {pipeline_mode = #tpu.pipeline_mode<synchronous>, transform_indices = @transform_3, window_bounds = array<i64: 1, 384>}, {pipeline_mode = #tpu.pipeline_mode<synchronous>, transform_indices = @transform_4, window_bounds = array<i64: 128, 128>}, {pipeline_mode = #tpu.pipeline_mode<synchronous>, transform_indices = @transform_5, window_bounds = array<i64: 384, 128>}, {pipeline_mode = #tpu.pipeline_mode<synchronous>, transform_indices = @transform_6, window_bounds = array<i64: 1, 128>}, {transform_indices = @transform_7, window_bounds = array<i64: 16, 128>}]} {
    %c0 = arith.constant 0 : index
    %c0_0 = arith.constant 0 : index
    %0 = vector.load %arg1[%c0, %c0_0] : memref<16x32xbf16, #tpu.memory_space<vmem>>, vector<16x32xbf16>
    %1 = arith.extf %0 : vector<16x32xbf16> to vector<16x32xf32>
    %c0_1 = arith.constant 0 : index
    %c0_2 = arith.constant 0 : index
    %2 = vector.load %arg2[%c0_1, %c0_2] : memref<32x128xf32, #tpu.memory_space<vmem>>, vector<32x128xf32>
    %cst = arith.constant dense<0.000000e+00> : vector<16x128xf32>
    %3 = tpu.matmul %1, %2, %cst {dimension_numbers = #tpu.dot_dimension_numbers<[1], [0], [0], [1], [0, 0, 1, 1], [], []>} : vector<16x32xf32>, vector<32x128xf32>, vector<16x128xf32> -> vector<16x128xf32>
    %c0_3 = arith.constant 0 : index
    %c0_4 = arith.constant 0 : index
    %4 = vector.load %arg3[%c0_3, %c0_4] : memref<16x384xf32, #tpu.memory_space<vmem>>, vector<16x384xf32>
    %c0_5 = arith.constant 0 : index
    %c0_6 = arith.constant 0 : index
    %5 = vector.load %arg4[%c0_5, %c0_6] : memref<1x384xf32, #tpu.memory_space<vmem>>, vector<1x384xf32>
    %6 = vector.broadcast %5 : vector<1x384xf32> to vector<16x384xf32>
    %7 = arith.mulf %4, %6 : vector<16x384xf32>
    %c0_7 = arith.constant 0 : index
    %c0_8 = arith.constant 0 : index
    %8 = vector.load %arg5[%c0_7, %c0_8] : memref<128x128xf32, #tpu.memory_space<vmem>>, vector<128x128xf32>
    %cst_9 = arith.constant dense<0.000000e+00> : vector<16x128xf32>
    %9 = tpu.matmul %3, %8, %cst_9 {dimension_numbers = #tpu.dot_dimension_numbers<[1], [0], [0], [1], [0, 0, 1, 1], [], []>} : vector<16x128xf32>, vector<128x128xf32>, vector<16x128xf32> -> vector<16x128xf32>
    %c0_10 = arith.constant 0 : index
    %c0_11 = arith.constant 0 : index
    %10 = vector.load %arg6[%c0_10, %c0_11] : memref<384x128xf32, #tpu.memory_space<vmem>>, vector<384x128xf32>
    %cst_12 = arith.constant dense<0.000000e+00> : vector<16x128xf32>
    %11 = tpu.matmul %7, %10, %cst_12 {dimension_numbers = #tpu.dot_dimension_numbers<[1], [0], [0], [1], [0, 0, 1, 1], [], []>} : vector<16x384xf32>, vector<384x128xf32>, vector<16x128xf32> -> vector<16x128xf32>
    %12 = arith.addf %9, %11 : vector<16x128xf32>
    %c0_13 = arith.constant 0 : index
    %c0_14 = arith.constant 0 : index
    %13 = vector.load %arg7[%c0_13, %c0_14] : memref<1x128xf32, #tpu.memory_space<vmem>>, vector<1x128xf32>
    %14 = vector.broadcast %13 : vector<1x128xf32> to vector<16x128xf32>
    %15 = arith.addf %12, %14 : vector<16x128xf32>
    %cst_15 = arith.constant 0.000000e+00 : f32
    %16 = vector.broadcast %cst_15 : f32 to vector<16x128xf32>
    %17 = arith.maximumf %15, %16 : vector<16x128xf32>
    %c0_16 = arith.constant 0 : index
    %c0_17 = arith.constant 0 : index
    %18 = vector.load %arg8[%c0_16, %c0_17] : memref<16x128xf32, #tpu.memory_space<vmem>>, vector<16x128xf32>
    tpu.vector_store %arg8[%c0_16, %c0_17], %17 {strides = array<i32>} : memref<16x128xf32, #tpu.memory_space<vmem>>, vector<16x128xf32>,
    return
  }
  func.func @transform_0(%arg0: i32) -> (i32, i32) {
    %c0_i32 = arith.constant 0 : i32
    %c0_i32_0 = arith.constant 0 : i32
    return %arg0, %c0_i32 : i32, i32
  }
  func.func @transform_1(%arg0: i32) -> (i32, i32) {
    %c0_i32 = arith.constant 0 : i32
    %c0_i32_0 = arith.constant 0 : i32
    %c0_i32_1 = arith.constant 0 : i32
    return %c0_i32, %c0_i32_0 : i32, i32
  }
  func.func @transform_2(%arg0: i32) -> (i32, i32) {
    %c0_i32 = arith.constant 0 : i32
    %c0_i32_0 = arith.constant 0 : i32
    return %arg0, %c0_i32 : i32, i32
  }
  func.func @transform_3(%arg0: i32) -> (i32, i32) {
    %c0_i32 = arith.constant 0 : i32
    %c0_i32_0 = arith.constant 0 : i32
    %c0_i32_1 = arith.constant 0 : i32
    return %c0_i32, %c0_i32_0 : i32, i32
  }
  func.func @transform_4(%arg0: i32) -> (i32, i32) {
    %c0_i32 = arith.constant 0 : i32
    %c0_i32_0 = arith.constant 0 : i32
    %c0_i32_1 = arith.constant 0 : i32
    return %c0_i32, %c0_i32_0 : i32, i32
  }
  func.func @transform_5(%arg0: i32) -> (i32, i32) {
    %c0_i32 = arith.constant 0 : i32
    %c0_i32_0 = arith.constant 0 : i32
    %c0_i32_1 = arith.constant 0 : i32
    return %c0_i32, %c0_i32_0 : i32, i32
  }
  func.func @transform_6(%arg0: i32) -> (i32, i32) {
    %c0_i32 = arith.constant 0 : i32
    %c0_i32_0 = arith.constant 0 : i32
    %c0_i32_1 = arith.constant 0 : i32
    return %c0_i32, %c0_i32_0 : i32, i32
  }
  func.func @transform_7(%arg0: i32) -> (i32, i32) {
    %c0_i32 = arith.constant 0 : i32
    %c0_i32_0 = arith.constant 0 : i32
    return %arg0, %c0_i32 : i32, i32
  }
}

module attributes {stable_mosaic.version = 11 : i64} {
  func.func @_pool_post_mp_kernel(%arg0: memref<8x32xf32, #tpu.memory_space<vmem>>, %arg1: memref<32x512xf32, #tpu.memory_space<vmem>>, %arg2: memref<512x128xf32, #tpu.memory_space<vmem>>, %arg3: memref<1x128xf32, #tpu.memory_space<vmem>>, %arg4: memref<128x128xf32, #tpu.memory_space<vmem>>, %arg5: memref<1x128xf32, #tpu.memory_space<vmem>>, %arg6: memref<128x256xf32, #tpu.memory_space<vmem>>, %arg7: memref<1x256xf32, #tpu.memory_space<vmem>>, %arg8: memref<256x128xf32, #tpu.memory_space<vmem>>, %arg9: memref<1x128xf32, #tpu.memory_space<vmem>>, %arg10: memref<8x128xf32, #tpu.memory_space<vmem>>) attributes {dimension_semantics = [], scalar_prefetch = 0 : i64, scratch_operands = 0 : i64, tpu.core_type = #tpu.core_type<tc>} {
    %c0 = arith.constant 0 : index
    %c0_0 = arith.constant 0 : index
    %0 = vector.load %arg0[%c0, %c0_0] : memref<8x32xf32, #tpu.memory_space<vmem>>, vector<8x32xf32>
    %c0_1 = arith.constant 0 : index
    %c0_2 = arith.constant 0 : index
    %1 = vector.load %arg1[%c0_1, %c0_2] : memref<32x512xf32, #tpu.memory_space<vmem>>, vector<32x512xf32>
    %cst = arith.constant dense<0.000000e+00> : vector<8x512xf32>
    %2 = tpu.matmul %0, %1, %cst {dimension_numbers = #tpu.dot_dimension_numbers<[1], [0], [0], [1], [0, 0, 1, 1], [], []>} : vector<8x32xf32>, vector<32x512xf32>, vector<8x512xf32> -> vector<8x512xf32>
    %c0_3 = arith.constant 0 : index
    %c0_4 = arith.constant 0 : index
    %3 = vector.load %arg2[%c0_3, %c0_4] : memref<512x128xf32, #tpu.memory_space<vmem>>, vector<512x128xf32>
    %cst_5 = arith.constant dense<0.000000e+00> : vector<8x128xf32>
    %4 = tpu.matmul %2, %3, %cst_5 {dimension_numbers = #tpu.dot_dimension_numbers<[1], [0], [0], [1], [0, 0, 1, 1], [], []>} : vector<8x512xf32>, vector<512x128xf32>, vector<8x128xf32> -> vector<8x128xf32>
    %c0_6 = arith.constant 0 : index
    %c0_7 = arith.constant 0 : index
    %5 = vector.load %arg3[%c0_6, %c0_7] : memref<1x128xf32, #tpu.memory_space<vmem>>, vector<1x128xf32>
    %6 = vector.broadcast %5 : vector<1x128xf32> to vector<8x128xf32>
    %7 = arith.addf %4, %6 : vector<8x128xf32>
    %cst_8 = arith.constant 0.000000e+00 : f32
    %8 = vector.broadcast %cst_8 : f32 to vector<8x128xf32>
    %9 = arith.cmpf ogt, %7, %8 : vector<8x128xf32>
    %cst_9 = arith.constant 1.000000e-01 : f32
    %10 = vector.broadcast %cst_9 : f32 to vector<8x128xf32>
    %11 = arith.mulf %10, %7 : vector<8x128xf32>
    %12 = arith.select %9, %7, %11 : vector<8x128xi1>, vector<8x128xf32>
    %c0_10 = arith.constant 0 : index
    %c0_11 = arith.constant 0 : index
    %13 = vector.load %arg4[%c0_10, %c0_11] : memref<128x128xf32, #tpu.memory_space<vmem>>, vector<128x128xf32>
    %cst_12 = arith.constant dense<0.000000e+00> : vector<8x128xf32>
    %14 = tpu.matmul %12, %13, %cst_12 {dimension_numbers = #tpu.dot_dimension_numbers<[1], [0], [0], [1], [0, 0, 1, 1], [], []>} : vector<8x128xf32>, vector<128x128xf32>, vector<8x128xf32> -> vector<8x128xf32>
    %c0_13 = arith.constant 0 : index
    %c0_14 = arith.constant 0 : index
    %15 = vector.load %arg5[%c0_13, %c0_14] : memref<1x128xf32, #tpu.memory_space<vmem>>, vector<1x128xf32>
    %16 = vector.broadcast %15 : vector<1x128xf32> to vector<8x128xf32>
    %17 = arith.addf %14, %16 : vector<8x128xf32>
    %cst_15 = arith.constant 0.000000e+00 : f32
    %18 = vector.broadcast %cst_15 : f32 to vector<8x128xf32>
    %19 = arith.maximumf %17, %18 : vector<8x128xf32>
    %c0_16 = arith.constant 0 : index
    %c0_17 = arith.constant 0 : index
    %20 = vector.load %arg6[%c0_16, %c0_17] : memref<128x256xf32, #tpu.memory_space<vmem>>, vector<128x256xf32>
    %cst_18 = arith.constant dense<0.000000e+00> : vector<8x256xf32>
    %21 = tpu.matmul %19, %20, %cst_18 {dimension_numbers = #tpu.dot_dimension_numbers<[1], [0], [0], [1], [0, 0, 1, 1], [], []>} : vector<8x128xf32>, vector<128x256xf32>, vector<8x256xf32> -> vector<8x256xf32>
    %c0_19 = arith.constant 0 : index
    %c0_20 = arith.constant 0 : index
    %22 = vector.load %arg7[%c0_19, %c0_20] : memref<1x256xf32, #tpu.memory_space<vmem>>, vector<1x256xf32>
    %23 = vector.broadcast %22 : vector<1x256xf32> to vector<8x256xf32>
    %24 = arith.addf %21, %23 : vector<8x256xf32>
    %cst_21 = arith.constant 0.000000e+00 : f32
    %25 = vector.broadcast %cst_21 : f32 to vector<8x256xf32>
    %26 = arith.maximumf %24, %25 : vector<8x256xf32>
    %c0_22 = arith.constant 0 : index
    %c0_23 = arith.constant 0 : index
    %27 = vector.load %arg8[%c0_22, %c0_23] : memref<256x128xf32, #tpu.memory_space<vmem>>, vector<256x128xf32>
    %cst_24 = arith.constant dense<0.000000e+00> : vector<8x128xf32>
    %28 = tpu.matmul %26, %27, %cst_24 {dimension_numbers = #tpu.dot_dimension_numbers<[1], [0], [0], [1], [0, 0, 1, 1], [], []>} : vector<8x256xf32>, vector<256x128xf32>, vector<8x128xf32> -> vector<8x128xf32>
    %c0_25 = arith.constant 0 : index
    %c0_26 = arith.constant 0 : index
    %29 = vector.load %arg9[%c0_25, %c0_26] : memref<1x128xf32, #tpu.memory_space<vmem>>, vector<1x128xf32>
    %30 = vector.broadcast %29 : vector<1x128xf32> to vector<8x128xf32>
    %31 = arith.addf %28, %30 : vector<8x128xf32>
    %c0_27 = arith.constant 0 : index
    %c0_28 = arith.constant 0 : index
    %32 = vector.load %arg10[%c0_27, %c0_28] : memref<8x128xf32, #tpu.memory_space<vmem>>, vector<8x128xf32>
    tpu.vector_store %arg10[%c0_27, %c0_28], %31 {strides = array<i32>} : memref<8x128xf32, #tpu.memory_space<vmem>>, vector<8x128xf32>,
    return
  }
}

module attributes {stable_mosaic.version = 11 : i64} {
  func.func @_sage_message_kernel(%arg0: i32, %arg1: memref<16x384xf32, #tpu.memory_space<vmem>>, %arg2: memref<1x384xf32, #tpu.memory_space<vmem>>, %arg3: memref<384x128xf32, #tpu.memory_space<vmem>>, %arg4: memref<1x128xf32, #tpu.memory_space<vmem>>, %arg5: memref<16x128xf32, #tpu.memory_space<vmem>>) attributes {dimension_semantics = [#tpu.dimension_semantics<parallel>], iteration_bounds = array<i64: 2>, scalar_prefetch = 0 : i64, scratch_operands = 0 : i64, tpu.core_type = #tpu.core_type<tc>, window_params = [{transform_indices = @transform_0, window_bounds = array<i64: 16, 384>}, {pipeline_mode = #tpu.pipeline_mode<synchronous>, transform_indices = @transform_1, window_bounds = array<i64: 1, 384>}, {pipeline_mode = #tpu.pipeline_mode<synchronous>, transform_indices = @transform_2, window_bounds = array<i64: 384, 128>}, {pipeline_mode = #tpu.pipeline_mode<synchronous>, transform_indices = @transform_3, window_bounds = array<i64: 1, 128>}, {transform_indices = @transform_4, window_bounds = array<i64: 16, 128>}]} {
    %c0 = arith.constant 0 : index
    %c0_0 = arith.constant 0 : index
    %0 = vector.load %arg1[%c0, %c0_0] : memref<16x384xf32, #tpu.memory_space<vmem>>, vector<16x384xf32>
    %c0_1 = arith.constant 0 : index
    %c0_2 = arith.constant 0 : index
    %1 = vector.load %arg2[%c0_1, %c0_2] : memref<1x384xf32, #tpu.memory_space<vmem>>, vector<1x384xf32>
    %2 = vector.broadcast %1 : vector<1x384xf32> to vector<16x384xf32>
    %3 = arith.mulf %0, %2 : vector<16x384xf32>
    %c0_3 = arith.constant 0 : index
    %c0_4 = arith.constant 0 : index
    %4 = vector.load %arg3[%c0_3, %c0_4] : memref<384x128xf32, #tpu.memory_space<vmem>>, vector<384x128xf32>
    %cst = arith.constant dense<0.000000e+00> : vector<16x128xf32>
    %5 = tpu.matmul %3, %4, %cst {dimension_numbers = #tpu.dot_dimension_numbers<[1], [0], [0], [1], [0, 0, 1, 1], [], []>} : vector<16x384xf32>, vector<384x128xf32>, vector<16x128xf32> -> vector<16x128xf32>
    %c0_5 = arith.constant 0 : index
    %c0_6 = arith.constant 0 : index
    %6 = vector.load %arg4[%c0_5, %c0_6] : memref<1x128xf32, #tpu.memory_space<vmem>>, vector<1x128xf32>
    %7 = vector.broadcast %6 : vector<1x128xf32> to vector<16x128xf32>
    %8 = arith.addf %5, %7 : vector<16x128xf32>
    %c0_7 = arith.constant 0 : index
    %c0_8 = arith.constant 0 : index
    %9 = vector.load %arg5[%c0_7, %c0_8] : memref<16x128xf32, #tpu.memory_space<vmem>>, vector<16x128xf32>
    tpu.vector_store %arg5[%c0_7, %c0_8], %8 {strides = array<i32>} : memref<16x128xf32, #tpu.memory_space<vmem>>, vector<16x128xf32>,
    return
  }
  func.func @transform_0(%arg0: i32) -> (i32, i32) {
    %c0_i32 = arith.constant 0 : i32
    %c0_i32_0 = arith.constant 0 : i32
    return %arg0, %c0_i32 : i32, i32
  }
  func.func @transform_1(%arg0: i32) -> (i32, i32) {
    %c0_i32 = arith.constant 0 : i32
    %c0_i32_0 = arith.constant 0 : i32
    %c0_i32_1 = arith.constant 0 : i32
    return %c0_i32, %c0_i32_0 : i32, i32
  }
  func.func @transform_2(%arg0: i32) -> (i32, i32) {
    %c0_i32 = arith.constant 0 : i32
    %c0_i32_0 = arith.constant 0 : i32
    %c0_i32_1 = arith.constant 0 : i32
    return %c0_i32, %c0_i32_0 : i32, i32
  }
  func.func @transform_3(%arg0: i32) -> (i32, i32) {
    %c0_i32 = arith.constant 0 : i32
    %c0_i32_0 = arith.constant 0 : i32
    %c0_i32_1 = arith.constant 0 : i32
    return %c0_i32, %c0_i32_0 : i32, i32
  }
  func.func @transform_4(%arg0: i32) -> (i32, i32) {
    %c0_i32 = arith.constant 0 : i32
    %c0_i32_0 = arith.constant 0 : i32
    return %arg0, %c0_i32 : i32, i32
  }
}

</mosaic_0001>

<bundles_post_ra>
// kernel: _forward_padded.8
= control target key start
LH: loop header
LB: loop body
LE: loop exit
PB: predicated region body
PF: predicated region fallthrough
CT: control target
= control target key end

     0   :  { %s386_s12 = smov 0   ;;  %s412_s0 = inlined_call_operand.vmem [shape: f32[32,16], index: 0, kind: input, shape index: {}]   ;;  %s413_s1 = inlined_call_operand.vmem [shape: f32[16,128], index: 1, kind: input, shape index: {}]   ;;  %s414_s2 = inlined_call_operand.vmem [shape: f32[1,128], index: 2, kind: input, shape index: {}]   ;;  %s415_s3 = inlined_call_operand.vmem [shape: f32[32,128], index: 3, kind: output, shape index: {}]  }
   0x1 LB: > { %s325_s13 = sadd.s32 4294967295, %s364_s12   ;;  %p329_p0 = scmp.ge.s32.totalorder %s364_s12, 1  ;;  %s364_s12 = sphi %s386_s12, %s13_s12  }
   0x2   : > { %p138_p1 = scmp.lt.s32.totalorder %s364_s12, 3 }
   0x4   : > { %p139_p2 = pnand %p329_p0, %p138_p1 }
   0x5   : > { %s330_s18 = sshll.u32 (!%p139_p2), %s325_s13, 1 }
   0x6   : > { %142 = sbr.rel (%p139_p2) target bundleno = 214 (0xd6), region = 32  ;;  %p163_p3 = scmp.lt.s32.totalorder (!%p139_p2), %s330_s18, 3 }
   0xb   : > { %v177_v0 = vld [vmem:[%s413_s1 + $0x8] sm:$0xff]  ;;  %v176_v1 = vld [vmem:[%s413_s1] sm:$0xff]  ;;  %s417_s18 = smov (!%p163_p3, %s330_s18), 3  ;;  %vm185_vm0 = vcmask 130048  }
   0xc   : > { %343 = vmatprep.subr.mxu0 %v177_v0  ;;  %s331_s19 = sshll.u32 %s417_s18, 3  ;;  %v334_v5 = vld [vmem:[%s414_s2] ss:$0 sm:$0xff] }
   0xd   : > { %344 = vmatpush3.msra.mxu0 %v177_v0  ;;  %s166_s22 = scalar_lea.vmem %s412_s0, %s331_s19  ;;  %s172_s27 = scalar_lea.vmem %s415_s3, %s331_s19 }
   0xe   : > { %345 = vmatprep.subr.mxu0 %v176_v1  ;;  %v174_v2 = vld [vmem:[%s166_s22] sm:$0xff]  ;;  %v175_v3 = vld [vmem:[%s166_s22 + $0x8] sm:$0xff] }
   0xf   : > { %346 = vmatpush3.msra.mxu0 %v176_v1  ;;  %347 = vmatprep.mubr.msk.f32.mxu0 %vm185_vm0, %v174_v2 }
  0x10   : > { %348 = vmatmul.mubr.msk.f32.vlgmr.msra.gmra.mxu0 %vm185_vm0, %v175_v3 }
  0xd0   : > { %v349_v4 = vpop.f32.mrf.mxu0 }
  0xd1   : > { %v264_v8 = vadd.f32 %v349_v4, %v334_v5 }
  0xd2   : > { %v258_v6 = vpop.f32.mrf.mxu0 }
  0xd3   : > { %v259_v7 = vadd.f32 %v334_v5, %v258_v6  ;;  %268 = vst [vmem:[%s172_s27 + $0x8] sm:$0xff] %v264_v8 }
  0xd5   : > { %267 = vst [vmem:[%s172_s27] sm:$0xff] %v259_v7 }
  0xd6 PF: > { %s13_s12 = sadd.s32 1, %s364_s12  }
  0xd7   : > { %p10_p4 = scmp.ge.s32.totalorder %s13_s12, 4  }
  0xd9   :  { %12 = sbr.rel (!%p10_p4) target bundleno = 1 (0x1), region = 62 }

// kernel: _forward_padded.9
= control target key start
LH: loop header
LB: loop body
LE: loop exit
PB: predicated region body
PF: predicated region fallthrough
CT: control target
= control target key end

     0   :  { %s558_s15 = smov 0   ;;  %s560_s16 = smov 0   ;;  %s671_s0 = inlined_call_operand.vmem [shape: f32[32,512], index: 0, kind: input, shape index: {}]   ;;  %s672_s1 = inlined_call_operand.vmem [shape: f32[1,128], index: 1, kind: input, shape index: {}]   ;;  %s673_s2 = inlined_call_operand.vmem [shape: f32[128,128], index: 2, kind: input, shape index: {}]   ;;  %s674_s3 = inlined_call_operand.vmem [shape: f32[1,128], index: 3, kind: input, shape index: {}]   ;;  %s675_s4 = inlined_call_operand.vmem [shape: f32[32,128], index: 4, kind: output, shape index: {}]  }
   0x1   :  { %s562_s17 = smov 0  }
   0x2 LB: > { %s414_s18 = sadd.s32 4294967295, %s531_s17   ;;  %s575_s19 = sadd.s32 1, %s531_s17   ;;  %s531_s17 = sphi %s562_s17, %s678_s17   ;;  %s527_s16 = sphi %s560_s16, %s677_s16   ;;  %s523_s15 = sphi %s558_s15, %s676_s15  }
   0x3   : > { %s18_s20 = ssub.s32 %s531_s17, %s575_s19  ;;  %s21_s21 = sadd.s32 1, %s527_s16 }
   0x4   : > { %p19_p0 = scmp.eq.s32.totalorder %s18_s20, 0  ;;  %p28_p1 = scmp.ne.s32.totalorder %s527_s16, %s523_s15 }
   0x5   : > { %p29_p2 = scmp.eq.s32.totalorder %s531_s17, 0  ;;  %p417_p4 = scmp.ge.s32.totalorder %s531_s17, 2 }
   0x6   : > { %s584_s22 = scalar_select %p19_p0, %s527_s16, %s21_s21  }
   0x7   : > { %p30_p3 = por %p29_p2, %p28_p1  ;;  %152 = sbr.rel (%p417_p4) target bundleno = 18 (0x12), region = 28 }
   0xc   : > { %155 = sbr.rel (!%p30_p3) target bundleno = 18 (0x12), region = 32  ;;  %s157_s23 = sand.u32 (%p30_p3), 1, %s527_s16  }
   0xd   : > { %s431_s24 = sshll.u32 (%p30_p3), %s531_s17, 6  ;;  %s418_s25 = sshll.u32 (%p30_p3), %s157_s23, 4 }
   0xe   : > { %s163_s28 = scalar_lea.vmem (%p30_p3), %s671_s0, %s431_s24  ;;  %s159_s29 = scalar_lea.vmem (%p30_p3), [#allocation2], %s418_s25 }
   0xf   : > { %v194_v0 = vld [vmem:[%s163_s28] sm:$0xff] (%p30_p3) }
  0x10   : > { %v196_v1 = vld [vmem:[%s163_s28 + $0x20] sm:$0xff] (%p30_p3)  ;;  %195 = vst [vmem:[%s159_s29] sm:$0xff] (%p30_p3), %v194_v0 }
  0x11   : > { %197 = vst [vmem:[%s159_s29 + $0x8] sm:$0xff] %v196_v1 }
  0x12 PF: > { %p422_p5 = scmp.ge.s32.totalorder %s531_s17, 1  ;;  %p202_p6 = scmp.lt.s32.totalorder %s531_s17, 3 }
  0x14   : > { %p203_p7 = pnand %p422_p5, %p202_p6 }
  0x15   : > { %s209_s8 = sand.u32 (!%p203_p7), 1, %s523_s15   ;;  %s424_s27 = sshll.u32 (!%p203_p7), %s414_s18, 1 }
  0x16   : > { %206 = sbr.rel (%p203_p7) target bundleno = 258 (0x102), region = 70  ;;  %s601_s9 = sshll.u32 (!%p203_p7), %s209_s8, 4 }
  0x17   : > { %s211_s14 = scalar_lea.vmem (!%p203_p7), [#allocation2], %s601_s9  ;;  %p236_p8 = scmp.lt.s32.totalorder (!%p203_p7), %s424_s27, 3 }
  0x1b   : > { %v267_v2 = vld [vmem:[%s673_s2 + $0x78] sm:$0xff]  ;;  %v266_v3 = vld [vmem:[%s673_s2 + $0x70] sm:$0xff]  ;;  %v265_v4 = vld [vmem:[%s673_s2 + $0x68] sm:$0xff]  ;;  %s680_s27 = smov (!%p236_p8, %s424_s27), 3 }
  0x1c   : > { %450 = vmatprep.subr.mxu0 %v267_v2  ;;  %v264_v5 = vld [vmem:[%s673_s2 + $0x60] sm:$0xff]  ;;  %v263_v7 = vld [vmem:[%s673_s2 + $0x58] sm:$0xff]  ;;  %v262_v10 = vld [vmem:[%s673_s2 + $0x50] sm:$0xff]  ;;  %s425_s28 = sshll.u32 %s680_s27, 3 }
  0x1d   : > { %451 = vmatpush3.msra.mxu0 %v267_v2  ;;  %v241_v6 = vld [vmem:[%s211_s14] sm:$0xff]  ;;  %v261_v11 = vld [vmem:[%s673_s2 + $0x48] sm:$0xff]  ;;  %v259_v13 = vld [vmem:[%s673_s2 + $0x38] sm:$0xff]  ;;  %s239_s5 = scalar_lea.vmem %s675_s4, %s425_s28 }
  0x1e   : > { %452 = vmatprep.subr.mxu0 %v266_v3  ;;  %v426_v8 = vld [vmem:[%s672_s1] ss:$0 sm:$0xff]  ;;  %v258_v14 = vld [vmem:[%s673_s2 + $0x30] sm:$0xff]  ;;  %v257_v15 = vld [vmem:[%s673_s2 + $0x28] sm:$0xff] }
  0x1f   : > { %453 = vmatpush3.msra.mxu0 %v266_v3  ;;  %v250_v9 = vmul.f32 %v426_v8, %v241_v6  ;;  %v260_v12 = vld [vmem:[%s673_s2 + $0x40] sm:$0xff]  ;;  %v255_v17 = vld [vmem:[%s673_s2 + $0x18] sm:$0xff]  ;;  %v254_v18 = vld [vmem:[%s673_s2 + $0x10] sm:$0xff] }
  0x20   : > { %454 = vmatprep.subr.mxu0 %v265_v4  ;;  %v256_v16 = vld [vmem:[%s673_s2 + $0x20] sm:$0xff]  ;;  %v253_v19 = vld [vmem:[%s673_s2 + $0x8] sm:$0xff] }
  0x21   : > { %455 = vmatpush3.msra.mxu0 %v265_v4  ;;  %482 = vmatprep.mubr.f32.mxu0 %v250_v9  ;;  %v242_v20 = vld [vmem:[%s211_s14 + $0x8] sm:$0xff]  ;;  %v252_v21 = vld [vmem:[%s673_s2] sm:$0xff] }
  0x22   : > { %456 = vmatprep.subr.mxu0 %v264_v5  ;;  %v251_v22 = vmul.f32 %v426_v8, %v242_v20  ;;  %v427_v24 = vld [vmem:[%s674_s3] ss:$0 sm:$0xff] }
  0x23   : > { %457 = vmatpush3.msra.mxu0 %v264_v5 }
  0x24   : > { %458 = vmatprep.subr.mxu0 %v263_v7 }
  0x25   : > { %459 = vmatpush3.msra.mxu0 %v263_v7 }
  0x26   : > { %460 = vmatprep.subr.mxu0 %v262_v10 }
  0x27   : > { %461 = vmatpush3.msra.mxu0 %v262_v10 }
  0x28   : > { %462 = vmatprep.subr.mxu0 %v261_v11 }
  0x29   : > { %463 = vmatpush3.msra.mxu0 %v261_v11 }
  0x2a   : > { %464 = vmatprep.subr.mxu0 %v260_v12 }
  0x2b   : > { %465 = vmatpush3.msra.mxu0 %v260_v12 }
  0x2c   : > { %466 = vmatprep.subr.mxu0 %v259_v13 }
  0x2d   : > { %467 = vmatpush3.msra.mxu0 %v259_v13 }
  0x2e   : > { %468 = vmatprep.subr.mxu0 %v258_v14 }
  0x2f   : > { %469 = vmatpush3.msra.mxu0 %v258_v14 }
  0x30   : > { %470 = vmatprep.subr.mxu0 %v257_v15 }
  0x31   : > { %471 = vmatpush3.msra.mxu0 %v257_v15 }
  0x32   : > { %472 = vmatprep.subr.mxu0 %v256_v16 }
  0x33   : > { %473 = vmatpush3.msra.mxu0 %v256_v16 }
  0x34   : > { %474 = vmatprep.subr.mxu0 %v255_v17 }
  0x35   : > { %475 = vmatpush3.msra.mxu0 %v255_v17 }
  0x36   : > { %476 = vmatprep.subr.mxu0 %v254_v18 }
  0x37   : > { %477 = vmatpush3.msra.mxu0 %v254_v18 }
  0x38   : > { %478 = vmatprep.subr.mxu0 %v253_v19 }
  0x39   : > { %479 = vmatpush3.msra.mxu0 %v253_v19 }
  0x3a   : > { %480 = vmatprep.subr.mxu0 %v252_v21 }
  0x3b   : > { %481 = vmatpush3.msra.mxu0 %v252_v21 }
  0x3c   : > { %483 = vmatmul.mubr.f32.vlgmr.msra.gmra.mxu0 %v251_v22 }
  0xfc   : > { %v484_v23 = vpop.f32.mrf.mxu0 }
  0xfd   : > { %v347_v27 = vadd.f32 %v484_v23, %v427_v24 }
  0xfe   : > { %v341_v25 = vpop.f32.mrf.mxu0 }
  0xff   : > { %v342_v26 = vadd.f32 %v427_v24, %v341_v25  ;;  %351 = vst [vmem:[%s239_s5 + $0x8] sm:$0xff] %v347_v27 }
 0x101   : > { %350 = vst [vmem:[%s239_s5] sm:$0xff] %v342_v26 }
 0x102 PF: > { %p11_p9 = scmp.ge.s32.totalorder %s575_s19, 4   ;;  %s676_s15 = smov %s527_s16 }
 0x103   : > { %s677_s16 = smov %s584_s22  ;;  %s678_s17 = smov %s575_s19 }
 0x104   :  { %13 = sbr.rel (!%p11_p9) target bundleno = 2 (0x2), region = 109 }

// kernel: _forward_padded.10
= control target key start
LH: loop header
LB: loop body
LE: loop exit
PB: predicated region body
PF: predicated region fallthrough
CT: control target
= control target key end

     0   :  { %s951_s24 = smov 0   ;;  %s953_s25 = smov 0   ;;  %s1122_s0 = inlined_call_operand.vmem [shape: bf16[32,32], index: 0, kind: input, shape index: {}]   ;;  %s1123_s1 = inlined_call_operand.vmem [shape: f32[32,128], index: 1, kind: input, shape index: {}]   ;;  %s1124_s2 = inlined_call_operand.vmem [shape: f32[32,512], index: 2, kind: input, shape index: {}]   ;;  %s1125_s3 = inlined_call_operand.vmem [shape: f32[1,128], index: 3, kind: input, shape index: {}]   ;;  %s1126_s4 = inlined_call_operand.vmem [shape: f32[128,128], index: 4, kind: input, shape index: {}]   ;;  %s1127_s5 = inlined_call_operand.vmem [shape: f32[128,128], index: 5, kind: input, shape index: {}]   ;;  %s1128_s6 = inlined_call_operand.vmem [shape: f32[1,128], index: 6, kind: input, shape index: {}]   ;;  %s1129_s7 = inlined_call_operand.vmem [shape: f32[32,128], index: 7, kind: output, shape index: {}]  }
   0x1   :  { %s955_s26 = smov 0  }
   0x2 LB: > { %s714_s27 = sadd.s32 4294967295, %s909_s26   ;;  %s968_s28 = sadd.s32 1, %s909_s26   ;;  %s909_s26 = sphi %s955_s26, %s1132_s26   ;;  %s905_s25 = sphi %s953_s25, %s1131_s25   ;;  %s901_s24 = sphi %s951_s24, %s1130_s24  }
   0x3   : > { %s68_s29 = ssub.s32 %s909_s26, %s968_s28  ;;  %s71_s30 = sadd.s32 1, %s905_s25 }
   0x4   : > { %p69_p0 = scmp.eq.s32.totalorder %s68_s29, 0  ;;  %p78_p1 = scmp.ne.s32.totalorder %s905_s25, %s901_s24 }
   0x5   : > { %p79_p2 = scmp.eq.s32.totalorder %s909_s26, 0  ;;  %p717_p4 = scmp.ge.s32.totalorder %s909_s26, 2 }
   0x6   : > { %s977_s8 = scalar_select %p69_p0, %s905_s25, %s71_s30  }
   0x7   : > { %p80_p3 = por %p79_p2, %p78_p1  ;;  %229 = sbr.rel (%p717_p4) target bundleno = 18 (0x12), region = 36 }
   0xc   : > { %241 = sbr.rel (!%p80_p3) target bundleno = 18 (0x12), region = 44  ;;  %s243_s9 = sand.u32 (%p80_p3), 1, %s905_s25  }
   0xd   : > { %s735_s10 = sshll.u32 (%p80_p3), %s909_s26, 6  ;;  %s718_s11 = sshll.u32 (%p80_p3), %s243_s9, 4 }
   0xe   : > { %s249_s14 = scalar_lea.vmem (%p80_p3), %s1124_s2, %s735_s10  ;;  %s245_s15 = scalar_lea.vmem (%p80_p3), [#allocation2], %s718_s11 }
   0xf   : > { %v280_v0 = vld [vmem:[%s249_s14] sm:$0xff] (%p80_p3) }
  0x10   : > { %v282_v1 = vld [vmem:[%s249_s14 + $0x20] sm:$0xff] (%p80_p3)  ;;  %281 = vst [vmem:[%s245_s15] sm:$0xff] (%p80_p3), %v280_v0 }
  0x11   : > { %283 = vst [vmem:[%s245_s15 + $0x8] sm:$0xff] %v282_v1 }
  0x12 PF: > { %p722_p5 = scmp.ge.s32.totalorder %s909_s26, 1  ;;  %p288_p6 = scmp.lt.s32.totalorder %s909_s26, 3 }
  0x14   : > { %p289_p7 = pnand %p722_p5, %p288_p6 }
  0x15   : > { %s724_s20 = sshll.u32 (!%p289_p7), %s714_s27, 1  ;;  %s295_s14 = sand.u32 (!%p289_p7), 1, %s901_s24  }
  0x16   : > { %292 = sbr.rel (%p289_p7) target bundleno = 436 (0x1b4), region = 82  ;;  %p332_p8 = scmp.lt.s32.totalorder (!%p289_p7), %s724_s20, 3 }
  0x17   : > { %s723_s15 = sshll.u32 (!%p289_p7), %s295_s14, 4 }
  0x18   : > { %s297_s16 = scalar_lea.vmem (!%p289_p7), [#allocation2], %s723_s15 }
  0x1b   : > { %v351_v2 = vld [vmem:[%s1123_s1 + $0x18] sm:$0xff]  ;;  %v350_v3 = vld [vmem:[%s1123_s1 + $0x10] sm:$0xff]  ;;  %v349_v6 = vld [vmem:[%s1123_s1 + $0x8] sm:$0xff]  ;;  %s1134_s20 = smov (!%p332_p8, %s724_s20), 3  ;;  %vm352_vm0 = vcmask 261120  }
  0x1c   : > { %782 = vmatprep.subr.mxu0 %v351_v2  ;;  %v476_v4 = vld [vmem:[%s1127_s5 + $0x78] sm:$0xff]  ;;  %v475_v5 = vld [vmem:[%s1127_s5 + $0x70] sm:$0xff]  ;;  %v474_v7 = vld [vmem:[%s1127_s5 + $0x68] sm:$0xff]  ;;  %s725_s12 = sshll.u32 %s1134_s20, 2  ;;  %s727_s27 = sshll.u32 %s1134_s20, 3 }
  0x1d   : > { %783 = vmatpush3.msra.mxu0 %v351_v2  ;;  %793 = vmatprep.subr.mxu1 %v476_v4  ;;  %v348_v8 = vld [vmem:[%s1123_s1] sm:$0xff]  ;;  %s335_s17 = scalar_lea.vmem %s1122_s0, %s725_s12  ;;  %v460_v10 = vld [vmem:[%s1126_s4 + $0x78] sm:$0xff]  ;;  %v471_v15 = vld [vmem:[%s1127_s5 + $0x50] sm:$0xff]  ;;  %s342_s11 = scalar_lea.vmem %s1129_s7, %s727_s27 }
  0x1e   : > { %784 = vmatprep.subr.mxu0 %v350_v3  ;;  %794 = vmatpush3.msra.mxu1 %v476_v4  ;;  %v473_v9 = vld [vmem:[%s1127_s5 + $0x60] sm:$0xff]  ;;  %v472_v12 = vld [vmem:[%s1127_s5 + $0x58] sm:$0xff]  ;;  %v459_v16 = vld [vmem:[%s1126_s4 + $0x70] sm:$0xff] }
  0x1f   : > { %785 = vmatpush3.msra.mxu0 %v350_v3  ;;  %795 = vmatprep.subr.mxu1 %v475_v5  ;;  %v737_v11 = vld [vmem:[%s335_s17] sm:$0xff]   ;;  %v470_v17 = vld [vmem:[%s1127_s5 + $0x48] sm:$0xff]  ;;  %v468_v21 = vld [vmem:[%s1127_s5 + $0x38] sm:$0xff] }
  0x20   : > { %786 = vmatprep.subr.mxu0 %v349_v6  ;;  %796 = vmatpush3.msra.mxu1 %v475_v5  ;;  %v738_v13 = vunpack.c.l.bf16 %v737_v11  ;;  %v739_v14 = vunpack.c.h.bf16 %v737_v11  ;;  %v458_v18 = vld [vmem:[%s1126_s4 + $0x68] sm:$0xff]  ;;  %v469_v19 = vld [vmem:[%s1127_s5 + $0x40] sm:$0xff]  ;;  %v456_v22 = vld [vmem:[%s1126_s4 + $0x58] sm:$0xff] }
  0x21   : > { %787 = vmatpush3.msra.mxu0 %v349_v6  ;;  %797 = vmatprep.subr.mxu1 %v474_v7  ;;  %v457_v20 = vld [vmem:[%s1126_s4 + $0x60] sm:$0xff]  ;;  %v467_v23 = vld [vmem:[%s1127_s5 + $0x30] sm:$0xff]  ;;  %v466_v25 = vld [vmem:[%s1127_s5 + $0x28] sm:$0xff] }
  0x22   : > { %788 = vmatprep.subr.mxu0 %v348_v8  ;;  %798 = vmatpush3.msra.mxu1 %v474_v7  ;;  %v455_v24 = vld [vmem:[%s1126_s4 + $0x50] sm:$0xff]  ;;  %v454_v26 = vld [vmem:[%s1126_s4 + $0x48] sm:$0xff]  ;;  %v465_v27 = vld [vmem:[%s1127_s5 + $0x20] sm:$0xff] }
  0x23   : > { %789 = vmatpush3.msra.mxu0 %v348_v8  ;;  %799 = vmatprep.subr.mxu1 %v473_v9  ;;  %v453_v28 = vld [vmem:[%s1126_s4 + $0x40] sm:$0xff]  ;;  %v464_v29 = vld [vmem:[%s1127_s5 + $0x18] sm:$0xff]  ;;  %v463_v31 = vld [vmem:[%s1127_s5 + $0x10] sm:$0xff] }
  0x24   : > { %828 = vmatprep.subr.mxu0 %v460_v10  ;;  %800 = vmatpush3.msra.mxu1 %v473_v9  ;;  %v452_v30 = vld [vmem:[%s1126_s4 + $0x38] sm:$0xff]  ;;  %v451_v32 = vld [vmem:[%s1126_s4 + $0x30] sm:$0xff]  ;;  %v462_v33 = vld [vmem:[%s1127_s5 + $0x8] sm:$0xff] }
  0x25   : > { %790 = vmatprep.mubr.msk.f32.mxu0 %vm352_vm0, %v738_v13  ;;  %801 = vmatprep.subr.mxu1 %v472_v12  ;;  %v450_v34 = vld [vmem:[%s1126_s4 + $0x28] sm:$0xff]  ;;  %v449_v35 = vld [vmem:[%s1126_s4 + $0x20] sm:$0xff]  ;;  %v448_v36 = vld [vmem:[%s1126_s4 + $0x18] sm:$0xff] }
  0x26   : > { %791 = vmatmul.mubr.msk.f32.vlgmr.msra.gmra.mxu0 %vm352_vm0, %v739_v14  ;;  %802 = vmatpush3.msra.mxu1 %v472_v12  ;;  %v447_v37 = vld [vmem:[%s1126_s4 + $0x10] sm:$0xff]  ;;  %v730_v39 = vld [vmem:[%s1125_s3] ss:$0 sm:$0xff]  ;;  %v446_v41 = vld [vmem:[%s1126_s4 + $0x8] sm:$0xff] }
  0x27   : > { %829 = vmatpush3.msra.mxu0 %v460_v10  ;;  %803 = vmatprep.subr.mxu1 %v471_v15  ;;  %v434_v38 = vld [vmem:[%s297_s16] sm:$0xff]  ;;  %v435_v42 = vld [vmem:[%s297_s16 + $0x8] sm:$0xff] }
  0x28   : > { %830 = vmatprep.subr.mxu0 %v459_v16  ;;  %804 = vmatpush3.msra.mxu1 %v471_v15  ;;  %v461_v40 = vld [vmem:[%s1127_s5] sm:$0xff]  ;;  %v443_v43 = vmul.f32 %v730_v39, %v434_v38  ;;  %v444_v44 = vmul.f32 %v730_v39, %v435_v42 }
  0x29   : > { %831 = vmatpush3.msra.mxu0 %v459_v16  ;;  %805 = vmatprep.subr.mxu1 %v470_v17  ;;  %v445_v45 = vld [vmem:[%s1126_s4] sm:$0xff] }
  0x2a   : > { %832 = vmatprep.subr.mxu0 %v458_v18  ;;  %806 = vmatpush3.msra.mxu1 %v470_v17  ;;  %v731_v51 = vld [vmem:[%s1128_s6] ss:$0 sm:$0xff] }
  0x2b   : > { %833 = vmatpush3.msra.mxu0 %v458_v18  ;;  %807 = vmatprep.subr.mxu1 %v469_v19 }
  0x2c   : > { %834 = vmatprep.subr.mxu0 %v457_v20  ;;  %808 = vmatpush3.msra.mxu1 %v469_v19 }
  0x2d   : > { %835 = vmatpush3.msra.mxu0 %v457_v20  ;;  %809 = vmatprep.subr.mxu1 %v468_v21 }
  0x2e   : > { %836 = vmatprep.subr.mxu0 %v456_v22  ;;  %810 = vmatpush3.msra.mxu1 %v468_v21 }
  0x2f   : > { %837 = vmatpush3.msra.mxu0 %v456_v22  ;;  %811 = vmatprep.subr.mxu1 %v467_v23 }
  0x30   : > { %838 = vmatprep.subr.mxu0 %v455_v24  ;;  %812 = vmatpush3.msra.mxu1 %v467_v23 }
  0x31   : > { %839 = vmatpush3.msra.mxu0 %v455_v24  ;;  %813 = vmatprep.subr.mxu1 %v466_v25 }
  0x32   : > { %840 = vmatprep.subr.mxu0 %v454_v26  ;;  %814 = vmatpush3.msra.mxu1 %v466_v25 }
  0x33   : > { %841 = vmatpush3.msra.mxu0 %v454_v26  ;;  %815 = vmatprep.subr.mxu1 %v465_v27 }
  0x34   : > { %842 = vmatprep.subr.mxu0 %v453_v28  ;;  %816 = vmatpush3.msra.mxu1 %v465_v27 }
  0x35   : > { %843 = vmatpush3.msra.mxu0 %v453_v28  ;;  %817 = vmatprep.subr.mxu1 %v464_v29 }
  0x36   : > { %844 = vmatprep.subr.mxu0 %v452_v30  ;;  %818 = vmatpush3.msra.mxu1 %v464_v29 }
  0x37   : > { %845 = vmatpush3.msra.mxu0 %v452_v30  ;;  %819 = vmatprep.subr.mxu1 %v463_v31 }
  0x38   : > { %846 = vmatprep.subr.mxu0 %v451_v32  ;;  %820 = vmatpush3.msra.mxu1 %v463_v31 }
  0x39   : > { %847 = vmatpush3.msra.mxu0 %v451_v32  ;;  %821 = vmatprep.subr.mxu1 %v462_v33 }
  0x3a   : > { %848 = vmatprep.subr.mxu0 %v450_v34  ;;  %822 = vmatpush3.msra.mxu1 %v462_v33 }
  0x3b   : > { %849 = vmatpush3.msra.mxu0 %v450_v34  ;;  %823 = vmatprep.subr.mxu1 %v461_v40 }
  0x3c   : > { %850 = vmatprep.subr.mxu0 %v449_v35  ;;  %824 = vmatpush3.msra.mxu1 %v461_v40 }
  0x3d   : > { %851 = vmatpush3.msra.mxu0 %v449_v35  ;;  %825 = vmatprep.mubr.f32.mxu1 %v443_v43 }
  0x3e   : > { %852 = vmatprep.subr.mxu0 %v448_v36  ;;  %826 = vmatmul.mubr.f32.vlgmr.msra.gmra.mxu1 %v444_v44 }
  0x3f   : > { %853 = vmatpush3.msra.mxu0 %v448_v36 }
  0x40   : > { %854 = vmatprep.subr.mxu0 %v447_v37 }
  0x41   : > { %855 = vmatpush3.msra.mxu0 %v447_v37 }
  0x42   : > { %856 = vmatprep.subr.mxu0 %v446_v41 }
  0x43   : > { %857 = vmatpush3.msra.mxu0 %v446_v41 }
  0x44   : > { %858 = vmatprep.subr.mxu0 %v445_v45 }
  0x45   : > { %859 = vmatpush3.msra.mxu0 %v445_v45 }
  0xe6   : > { %v792_v46 = vpop.f32.mrf.mxu0 }
  0xe8   : > { %v425_v47 = vpop.f32.mrf.mxu0 }
  0xe9   : > { %860 = vmatprep.mubr.f32.mxu0 %v425_v47 }
  0xea   : > { %861 = vmatmul.mubr.f32.vlgmr.msra.gmra.mxu0 %v792_v46 }
  0xfe   : > { %v827_v48 = vpop.f32.mrf.mxu1 }
 0x100   : > { %v543_v52 = vpop.f32.mrf.mxu1 }
 0x1aa   : > { %v862_v49 = vpop.f32.mrf.mxu0 }
 0x1ab   : > { %v624_v50 = vadd.f32 %v862_v49, %v827_v48 }
 0x1ac   : > { %v618_v53 = vpop.f32.mrf.mxu0 }
 0x1ad   : > { %v619_v54 = vadd.f32 %v618_v53, %v543_v52  ;;  %v635_v55 = vadd.f32 %v731_v51, %v624_v50 }
 0x1af   : > { %v634_v56 = vadd.f32 %v731_v51, %v619_v54  ;;  %v637_v58 = vmax.f32 %v635_v55, 0.0 }
 0x1b1   : > { %v636_v57 = vmax.f32 %v634_v56, 0.0  ;;  %639 = vst [vmem:[%s342_s11 + $0x8] sm:$0xff] %v637_v58 }
 0x1b3   : > { %638 = vst [vmem:[%s342_s11] sm:$0xff] %v636_v57 }
 0x1b4 PF: > { %p14_p9 = scmp.ge.s32.totalorder %s968_s28, 4   ;;  %s1130_s24 = smov %s905_s25 }
 0x1b5   : > { %s1131_s25 = smov %s977_s8  ;;  %s1132_s26 = smov %s968_s28 }
 0x1b6   :  { %16 = sbr.rel (!%p14_p9) target bundleno = 2 (0x2), region = 124 }

// kernel: _forward_padded.11
= control target key start
LH: loop header
LB: loop body
LE: loop exit
PB: predicated region body
PF: predicated region fallthrough
CT: control target
= control target key end

     0   :  { %s585_s15 = smov 0   ;;  %s587_s16 = smov 0   ;;  %s739_s0 = inlined_call_operand.vmem [shape: f32[32,512], index: 0, kind: input, shape index: {}]   ;;  %s740_s1 = inlined_call_operand.vmem [shape: f32[1,256], index: 1, kind: input, shape index: {}]   ;;  %s741_s2 = inlined_call_operand.vmem [shape: f32[256,128], index: 2, kind: input, shape index: {}]   ;;  %s742_s3 = inlined_call_operand.vmem [shape: f32[1,128], index: 3, kind: input, shape index: {}]   ;;  %s743_s4 = inlined_call_operand.vmem [shape: f32[32,128], index: 4, kind: output, shape index: {}]  }
   0x1   :  { %s589_s17 = smov 0  }
   0x2 LB: > { %s425_s18 = sadd.s32 4294967295, %s558_s17   ;;  %s602_s19 = sadd.s32 1, %s558_s17   ;;  %s558_s17 = sphi %s589_s17, %s746_s17   ;;  %s554_s16 = sphi %s587_s16, %s745_s16   ;;  %s550_s15 = sphi %s585_s15, %s744_s15  }
   0x3   : > { %s18_s20 = ssub.s32 %s558_s17, %s602_s19  ;;  %s21_s21 = sadd.s32 1, %s554_s16 }
   0x4   : > { %p19_p0 = scmp.eq.s32.totalorder %s18_s20, 0  ;;  %p28_p1 = scmp.ne.s32.totalorder %s554_s16, %s550_s15 }
   0x5   : > { %p29_p2 = scmp.eq.s32.totalorder %s558_s17, 0  ;;  %p428_p4 = scmp.ge.s32.totalorder %s558_s17, 2 }
   0x6   : > { %s611_s22 = scalar_select %p19_p0, %s554_s16, %s21_s21  }
   0x7   : > { %p30_p3 = por %p29_p2, %p28_p1  ;;  %152 = sbr.rel (%p428_p4) target bundleno = 18 (0x12), region = 28 }
   0xc   : > { %155 = sbr.rel (!%p30_p3) target bundleno = 18 (0x12), region = 32  ;;  %s157_s23 = sand.u32 (%p30_p3), 1, %s554_s16  }
   0xd   : > { %s441_s24 = sshll.u32 (%p30_p3), %s558_s17, 6  ;;  %s429_s25 = sshll.u32 (%p30_p3), %s157_s23, 5 }
   0xe   : > { %s163_s28 = scalar_lea.vmem (%p30_p3), %s739_s0, %s441_s24  ;;  %s159_s29 = scalar_lea.vmem (%p30_p3), [#allocation2], %s429_s25 }
   0xf   : > { %v176_v0 = vld [vmem:[%s163_s28] sm:$0xff] (%p30_p3)  ;;  %v178_v1 = vld [vmem:[%s163_s28 + $0x8] sm:$0xff] (%p30_p3) }
  0x10   : > { %v180_v2 = vld [vmem:[%s163_s28 + $0x20] sm:$0xff] (%p30_p3)  ;;  %177 = vst [vmem:[%s159_s29] sm:$0xff] (%p30_p3), %v176_v0  ;;  %179 = vst [vmem:[%s159_s29 + $0x8] sm:$0xff] (%p30_p3), %v178_v1  ;;  %v182_v3 = vld [vmem:[%s163_s28 + $0x28] sm:$0xff] (%p30_p3) }
  0x11   : > { %181 = vst [vmem:[%s159_s29 + $0x10] sm:$0xff] %v180_v2  ;;  %183 = vst [vmem:[%s159_s29 + $0x18] sm:$0xff] %v182_v3 }
  0x12 PF: > { %p433_p5 = scmp.ge.s32.totalorder %s558_s17, 1  ;;  %p188_p6 = scmp.lt.s32.totalorder %s558_s17, 3 }
  0x14   : > { %p189_p7 = pnand %p433_p5, %p188_p6 }
  0x15   : > { %s195_s30 = sand.u32 (!%p189_p7), 1, %s550_s15   ;;  %s435_s11 = sshll.u32 (!%p189_p7), %s425_s18, 1 }
  0x16   : > { %192 = sbr.rel (%p189_p7) target bundleno = 261 (0x105), region = 55  ;;  %s434_s15 = sshll.u32 (!%p189_p7), %s195_s30, 5 }
  0x17   : > { %s197_s5 = scalar_lea.vmem (!%p189_p7), [#allocation2], %s434_s15  ;;  %p222_p8 = scmp.lt.s32.totalorder (!%p189_p7), %s435_s11, 3 }
  0x1b   : > { %v278_v4 = vld [vmem:[%s741_s2 + $0xf8] sm:$0xff]  ;;  %v277_v6 = vld [vmem:[%s741_s2 + $0xf0] sm:$0xff]  ;;  %v276_v8 = vld [vmem:[%s741_s2 + $0xe8] sm:$0xff]  ;;  %v233_v20 = vlaneseq  ;;  %s748_s11 = smov (!%p222_p8, %s435_s11), 3 }
  0x1c   : > { %v262_v5 = vld [vmem:[%s741_s2 + $0x78] sm:$0xff]  ;;  %442 = vmatprep.subr.mxu0 %v278_v4  ;;  %480 = vmatprep.subr.mxu1 %v278_v4  ;;  %v261_v7 = vld [vmem:[%s741_s2 + $0x70] sm:$0xff]  ;;  %v260_v9 = vld [vmem:[%s741_s2 + $0x68] sm:$0xff]  ;;  %s436_s12 = sshll.u32 %s748_s11, 3 }
  0x1d   : > { %443 = vmatpush3.msra.mxu0 %v262_v5  ;;  %496 = vmatpush3.msra.mxu1 %v262_v5  ;;  %v275_v10 = vld [vmem:[%s741_s2 + $0xe0] sm:$0xff]  ;;  %v274_v12 = vld [vmem:[%s741_s2 + $0xd8] sm:$0xff]  ;;  %v273_v14 = vld [vmem:[%s741_s2 + $0xd0] sm:$0xff]  ;;  %v234_v25 = vshrl.u32 %v233_v20, 7  ;;  %s225_s23 = scalar_lea.vmem %s743_s4, %s436_s12 }
  0x1e   : > { %444 = vmatprep.subr.mxu0 %v277_v6  ;;  %481 = vmatprep.subr.mxu1 %v277_v6  ;;  %v259_v11 = vld [vmem:[%s741_s2 + $0x60] sm:$0xff]  ;;  %v258_v13 = vld [vmem:[%s741_s2 + $0x58] sm:$0xff]  ;;  %v257_v15 = vld [vmem:[%s741_s2 + $0x50] sm:$0xff] }
  0x1f   : > { %445 = vmatpush3.msra.mxu0 %v261_v7  ;;  %497 = vmatpush3.msra.mxu1 %v261_v7  ;;  %v272_v16 = vld [vmem:[%s741_s2 + $0xc8] sm:$0xff]  ;;  %v271_v18 = vld [vmem:[%s741_s2 + $0xc0] sm:$0xff]  ;;  %v270_v21 = vld [vmem:[%s741_s2 + $0xb8] sm:$0xff]  ;;  %v239_v30 = vsub.s32 1, %v234_v25  ;;  %v235_v33 = vsub.s32 0, %v234_v25 }
  0x20   : > { %446 = vmatprep.subr.mxu0 %v276_v8  ;;  %482 = vmatprep.subr.mxu1 %v276_v8  ;;  %v256_v17 = vld [vmem:[%s741_s2 + $0x48] sm:$0xff]  ;;  %v255_v19 = vld [vmem:[%s741_s2 + $0x40] sm:$0xff]  ;;  %v254_v22 = vld [vmem:[%s741_s2 + $0x38] sm:$0xff] }
  0x21   : > { %447 = vmatpush3.msra.mxu0 %v260_v9  ;;  %498 = vmatpush3.msra.mxu1 %v260_v9  ;;  %v269_v23 = vld [vmem:[%s741_s2 + $0xb0] sm:$0xff]  ;;  %v268_v26 = vld [vmem:[%s741_s2 + $0xa8] sm:$0xff]  ;;  %v267_v28 = vld [vmem:[%s741_s2 + $0xa0] sm:$0xff] }
  0x22   : > { %448 = vmatprep.subr.mxu0 %v275_v10  ;;  %483 = vmatprep.subr.mxu1 %v275_v10  ;;  %v253_v24 = vld [vmem:[%s741_s2 + $0x30] sm:$0xff]  ;;  %v252_v27 = vld [vmem:[%s741_s2 + $0x28] sm:$0xff]  ;;  %v251_v29 = vld [vmem:[%s741_s2 + $0x20] sm:$0xff] }
  0x23   : > { %449 = vmatpush3.msra.mxu0 %v259_v11  ;;  %499 = vmatpush3.msra.mxu1 %v259_v11  ;;  %v266_v31 = vld [vmem:[%s741_s2 + $0x98] sm:$0xff]  ;;  %v231_v32 = vld [vmem:[%s740_s1] sm:$0x3]  ;;  %v265_v35 = vld [vmem:[%s741_s2 + $0x90] sm:$0xff] }
  0x24   : > { %450 = vmatprep.subr.mxu0 %v274_v12  ;;  %484 = vmatprep.subr.mxu1 %v274_v12  ;;  %v250_v34 = vld [vmem:[%s741_s2 + $0x18] sm:$0xff]  ;;  %v249_v36 = vld [vmem:[%s741_s2 + $0x10] sm:$0xff]  ;;  %v240_v37 = vrot.slane %v231_v32, %v239_v30  ;;  %v264_v38 = vld [vmem:[%s741_s2 + $0x88] sm:$0xff]  ;;  %v236_v40 = vrot.slane %v231_v32, %v235_v33 }
  0x25   : > { %451 = vmatpush3.msra.mxu0 %v258_v13  ;;  %500 = vmatpush3.msra.mxu1 %v258_v13  ;;  %v228_v39 = vld [vmem:[%s197_s5 + $0x8] sm:$0xff]  ;;  %v230_v41 = vld [vmem:[%s197_s5 + $0x18] sm:$0xff]  ;;  %v227_v43 = vld [vmem:[%s197_s5] sm:$0xff] }
  0x26   : > { %452 = vmatprep.subr.mxu0 %v273_v14  ;;  %485 = vmatprep.subr.mxu1 %v273_v14  ;;  %v248_v42 = vld [vmem:[%s741_s2 + $0x8] sm:$0xff]  ;;  %v229_v44 = vld [vmem:[%s197_s5 + $0x10] sm:$0xff]  ;;  %v263_v45 = vld [vmem:[%s741_s2 + $0x80] sm:$0xff]  ;;  %v244_v47 = vmul.f32 %v240_v37, %v228_v39  ;;  %v246_v48 = vmul.f32 %v240_v37, %v230_v41  ;;  %v243_v49 = vmul.f32 %v236_v40, %v227_v43 }
  0x27   : > { %453 = vmatpush3.msra.mxu0 %v257_v15  ;;  %501 = vmatpush3.msra.mxu1 %v257_v15  ;;  %v247_v46 = vld [vmem:[%s741_s2] sm:$0xff]  ;;  %v245_v50 = vmul.f32 %v236_v40, %v229_v44 }
  0x28   : > { %454 = vmatprep.subr.mxu0 %v272_v16  ;;  %486 = vmatprep.subr.mxu1 %v272_v16  ;;  %v437_v53 = vld [vmem:[%s742_s3] ss:$0 sm:$0xff] }
  0x29   : > { %455 = vmatpush3.msra.mxu0 %v256_v17  ;;  %502 = vmatpush3.msra.mxu1 %v256_v17 }
  0x2a   : > { %456 = vmatprep.subr.mxu0 %v271_v18  ;;  %487 = vmatprep.subr.mxu1 %v271_v18 }
  0x2b   : > { %457 = vmatpush3.msra.mxu0 %v255_v19  ;;  %503 = vmatpush3.msra.mxu1 %v255_v19 }
  0x2c   : > { %458 = vmatprep.subr.mxu0 %v270_v21  ;;  %488 = vmatprep.subr.mxu1 %v270_v21 }
  0x2d   : > { %459 = vmatpush3.msra.mxu0 %v254_v22  ;;  %504 = vmatpush3.msra.mxu1 %v254_v22 }
  0x2e   : > { %460 = vmatprep.subr.mxu0 %v269_v23  ;;  %489 = vmatprep.subr.mxu1 %v269_v23 }
  0x2f   : > { %461 = vmatpush3.msra.mxu0 %v253_v24  ;;  %505 = vmatpush3.msra.mxu1 %v253_v24 }
  0x30   : > { %462 = vmatprep.subr.mxu0 %v268_v26  ;;  %490 = vmatprep.subr.mxu1 %v268_v26 }
  0x31   : > { %463 = vmatpush3.msra.mxu0 %v252_v27  ;;  %506 = vmatpush3.msra.mxu1 %v252_v27 }
  0x32   : > { %464 = vmatprep.subr.mxu0 %v267_v28  ;;  %491 = vmatprep.subr.mxu1 %v267_v28 }
  0x33   : > { %465 = vmatpush3.msra.mxu0 %v251_v29  ;;  %507 = vmatpush3.msra.mxu1 %v251_v29 }
  0x34   : > { %466 = vmatprep.subr.mxu0 %v266_v31  ;;  %492 = vmatprep.subr.mxu1 %v266_v31 }
  0x35   : > { %467 = vmatpush3.msra.mxu0 %v250_v34  ;;  %508 = vmatpush3.msra.mxu1 %v250_v34 }
  0x36   : > { %468 = vmatprep.subr.mxu0 %v265_v35  ;;  %493 = vmatprep.subr.mxu1 %v265_v35 }
  0x37   : > { %469 = vmatpush3.msra.mxu0 %v249_v36  ;;  %509 = vmatpush3.msra.mxu1 %v249_v36 }
  0x38   : > { %470 = vmatprep.subr.mxu0 %v264_v38  ;;  %494 = vmatprep.subr.mxu1 %v264_v38 }
  0x39   : > { %471 = vmatpush3.msra.mxu0 %v248_v42  ;;  %510 = vmatpush3.msra.mxu1 %v248_v42 }
  0x3a   : > { %472 = vmatprep.subr.mxu0 %v263_v45  ;;  %495 = vmatprep.subr.mxu1 %v263_v45 }
  0x3b   : > { %473 = vmatpush3.msra.mxu0 %v247_v46  ;;  %511 = vmatpush3.msra.mxu1 %v247_v46 }
  0x3c   : > { %350 = vmatprep.mubr.f32.mxu0 %v244_v47  ;;  %355 = vmatprep.mubr.f32.mxu1 %v246_v48 }
  0x3d   : > { %351 = vmatmul.mubr.f32.vlgmr.msra.gmra.mxu0 %v243_v49  ;;  %356 = vmatmul.mubr.f32.vlgmr.msra.gmra.mxu1 %v245_v50 }
  0xfd   : > { %v474_v51 = vpop.f32.mrf.mxu0  ;;  %v477_v52 = vpop.f32.mrf.mxu1 }
  0xff   : > { %v475_v54 = vpop.f32.mrf.mxu0  ;;  %v478_v55 = vpop.f32.mrf.mxu1 }
 0x100   : > { %v476_v56 = vadd.f32 %v475_v54, %v474_v51  ;;  %v479_v57 = vadd.f32 %v478_v55, %v477_v52 }
 0x102   : > { %v353_v58 = vadd.f32 %v476_v56, %v437_v53  ;;  %v358_v59 = vadd.f32 %v479_v57, %v437_v53 }
 0x104   : > { %361 = vst [vmem:[%s225_s23] sm:$0xff] %v353_v58  ;;  %362 = vst [vmem:[%s225_s23 + $0x8] sm:$0xff] %v358_v59 }
 0x105 PF: > { %p11_p9 = scmp.ge.s32.totalorder %s602_s19, 4   ;;  %s744_s15 = smov %s554_s16 }
 0x106   : > { %s745_s16 = smov %s611_s22  ;;  %s746_s17 = smov %s602_s19 }
 0x107   :  { %13 = sbr.rel (!%p11_p9) target bundleno = 2 (0x2), region = 94 }

// kernel: _forward_padded.12
= control target key start
LH: loop header
LB: loop body
LE: loop exit
PB: predicated region body
PF: predicated region fallthrough
CT: control target
= control target key end

     0   :  { %s946_s24 = smov 0   ;;  %s948_s25 = smov 0   ;;  %s1173_s0 = inlined_call_operand.vmem [shape: bf16[32,32], index: 0, kind: input, shape index: {}]   ;;  %s1174_s1 = inlined_call_operand.vmem [shape: f32[32,128], index: 1, kind: input, shape index: {}]   ;;  %s1175_s2 = inlined_call_operand.vmem [shape: f32[32,512], index: 2, kind: input, shape index: {}]   ;;  %s1176_s3 = inlined_call_operand.vmem [shape: f32[1,256], index: 3, kind: input, shape index: {}]   ;;  %s1177_s4 = inlined_call_operand.vmem [shape: f32[128,128], index: 4, kind: input, shape index: {}]   ;;  %s1178_s5 = inlined_call_operand.vmem [shape: f32[256,128], index: 5, kind: input, shape index: {}]   ;;  %s1179_s6 = inlined_call_operand.vmem [shape: f32[1,128], index: 6, kind: input, shape index: {}]   ;;  %s1180_s7 = inlined_call_operand.vmem [shape: f32[32,128], index: 7, kind: output, shape index: {}]  }
   0x1   :  { %s950_s26 = smov 0  }
   0x2 LB: > { %s725_s27 = sadd.s32 4294967295, %s904_s26   ;;  %s963_s28 = sadd.s32 1, %s904_s26   ;;  %s904_s26 = sphi %s950_s26, %s1183_s26   ;;  %s900_s25 = sphi %s948_s25, %s1182_s25   ;;  %s896_s24 = sphi %s946_s24, %s1181_s24  }
   0x3   : > { %s68_s29 = ssub.s32 %s904_s26, %s963_s28  ;;  %s71_s30 = sadd.s32 1, %s900_s25 }
   0x4   : > { %p69_p0 = scmp.eq.s32.totalorder %s68_s29, 0  ;;  %p78_p1 = scmp.ne.s32.totalorder %s900_s25, %s896_s24 }
   0x5   : > { %p79_p2 = scmp.eq.s32.totalorder %s904_s26, 0  ;;  %p728_p4 = scmp.ge.s32.totalorder %s904_s26, 2 }
   0x6   : > { %s972_s8 = scalar_select %p69_p0, %s900_s25, %s71_s30  }
   0x7   : > { %p80_p3 = por %p79_p2, %p78_p1  ;;  %229 = sbr.rel (%p728_p4) target bundleno = 18 (0x12), region = 36 }
   0xc   : > { %241 = sbr.rel (!%p80_p3) target bundleno = 18 (0x12), region = 44  ;;  %s243_s9 = sand.u32 (%p80_p3), 1, %s900_s25  }
   0xd   : > { %s745_s10 = sshll.u32 (%p80_p3), %s904_s26, 6  ;;  %s729_s11 = sshll.u32 (%p80_p3), %s243_s9, 5 }
   0xe   : > { %s249_s14 = scalar_lea.vmem (%p80_p3), %s1175_s2, %s745_s10  ;;  %s245_s15 = scalar_lea.vmem (%p80_p3), [#allocation2], %s729_s11 }
   0xf   : > { %v262_v0 = vld [vmem:[%s249_s14] sm:$0xff] (%p80_p3)  ;;  %v264_v1 = vld [vmem:[%s249_s14 + $0x8] sm:$0xff] (%p80_p3) }
  0x10   : > { %v266_v2 = vld [vmem:[%s249_s14 + $0x20] sm:$0xff] (%p80_p3)  ;;  %263 = vst [vmem:[%s245_s15] sm:$0xff] (%p80_p3), %v262_v0  ;;  %265 = vst [vmem:[%s245_s15 + $0x8] sm:$0xff] (%p80_p3), %v264_v1  ;;  %v268_v3 = vld [vmem:[%s249_s14 + $0x28] sm:$0xff] (%p80_p3) }
  0x11   : > { %267 = vst [vmem:[%s245_s15 + $0x10] sm:$0xff] %v266_v2  ;;  %269 = vst [vmem:[%s245_s15 + $0x18] sm:$0xff] %v268_v3 }
  0x12 PF: > { %p733_p5 = scmp.ge.s32.totalorder %s904_s26, 1  ;;  %p274_p6 = scmp.lt.s32.totalorder %s904_s26, 3 }
  0x14   : > { %p275_p7 = pnand %p733_p5, %p274_p6 }
  0x15   : > { %s735_s20 = sshll.u32 (!%p275_p7), %s725_s27, 1  ;;  %s281_s10 = sand.u32 (!%p275_p7), 1, %s896_s24  }
  0x16   : > { %278 = sbr.rel (%p275_p7) target bundleno = 436 (0x1b4), region = 67  ;;  %p318_p8 = scmp.lt.s32.totalorder (!%p275_p7), %s735_s20, 3 }
  0x17   : > { %s734_s16 = sshll.u32 (!%p275_p7), %s281_s10, 5 }
  0x18   : > { %s1123_s19 = scalar_lea.vmem (!%p275_p7), [#allocation2], %s734_s16 }
  0x1b   : > { %v337_v4 = vld [vmem:[%s1174_s1 + $0x18] sm:$0xff]  ;;  %v336_v5 = vld [vmem:[%s1174_s1 + $0x10] sm:$0xff]  ;;  %v335_v8 = vld [vmem:[%s1174_s1 + $0x8] sm:$0xff]  ;;  %s1185_s20 = smov (!%p318_p8, %s735_s20), 3  ;;  %vm338_vm0 = vcmask 261120   ;;  %v426_v31 = vlaneseq }
  0x1c   : > { %812 = vmatprep.subr.mxu0 %v337_v4  ;;  %v487_v6 = vld [vmem:[%s1178_s5 + $0xf8] sm:$0xff]  ;;  %v486_v9 = vld [vmem:[%s1178_s5 + $0xf0] sm:$0xff]  ;;  %v485_v11 = vld [vmem:[%s1178_s5 + $0xe8] sm:$0xff]  ;;  %s736_s18 = sshll.u32 %s1185_s20, 2  ;;  %s738_s22 = sshll.u32 %s1185_s20, 3 }
  0x1d   : > { %v471_v7 = vld [vmem:[%s1178_s5 + $0x78] sm:$0xff]  ;;  %813 = vmatpush3.msra.mxu0 %v337_v4  ;;  %756 = vmatprep.subr.mxu1 %v487_v6  ;;  %v470_v10 = vld [vmem:[%s1178_s5 + $0x70] sm:$0xff]  ;;  %v334_v12 = vld [vmem:[%s1174_s1] sm:$0xff]  ;;  %s321_s29 = scalar_lea.vmem %s1173_s0, %s736_s18  ;;  %v427_v38 = vshrl.u32 %v426_v31, 7  ;;  %s328_s16 = scalar_lea.vmem %s1180_s7, %s738_s22 }
  0x1e   : > { %814 = vmatprep.subr.mxu0 %v336_v5  ;;  %757 = vmatpush3.msra.mxu1 %v471_v7  ;;  %v469_v13 = vld [vmem:[%s1178_s5 + $0x68] sm:$0xff]  ;;  %v484_v14 = vld [vmem:[%s1178_s5 + $0xe0] sm:$0xff]  ;;  %v455_v16 = vld [vmem:[%s1177_s4 + $0x78] sm:$0xff] }
  0x1f   : > { %815 = vmatpush3.msra.mxu0 %v336_v5  ;;  %758 = vmatprep.subr.mxu1 %v486_v9  ;;  %v468_v15 = vld [vmem:[%s1178_s5 + $0x60] sm:$0xff]  ;;  %v483_v18 = vld [vmem:[%s1178_s5 + $0xd8] sm:$0xff]  ;;  %v482_v22 = vld [vmem:[%s1178_s5 + $0xd0] sm:$0xff]  ;;  %v432_v45 = vsub.s32 1, %v427_v38  ;;  %v428_v48 = vsub.s32 0, %v427_v38 }
  0x20   : > { %816 = vmatprep.subr.mxu0 %v335_v8  ;;  %759 = vmatpush3.msra.mxu1 %v470_v10  ;;  %v747_v17 = vld [vmem:[%s321_s29] sm:$0xff]   ;;  %v467_v21 = vld [vmem:[%s1178_s5 + $0x58] sm:$0xff]  ;;  %v454_v23 = vld [vmem:[%s1177_s4 + $0x70] sm:$0xff] }
  0x21   : > { %817 = vmatpush3.msra.mxu0 %v335_v8  ;;  %760 = vmatprep.subr.mxu1 %v485_v11  ;;  %v748_v19 = vunpack.c.l.bf16 %v747_v17  ;;  %v749_v20 = vunpack.c.h.bf16 %v747_v17  ;;  %v466_v24 = vld [vmem:[%s1178_s5 + $0x50] sm:$0xff]  ;;  %v481_v25 = vld [vmem:[%s1178_s5 + $0xc8] sm:$0xff]  ;;  %v480_v28 = vld [vmem:[%s1178_s5 + $0xc0] sm:$0xff] }
  0x22   : > { %818 = vmatprep.subr.mxu0 %v334_v12  ;;  %761 = vmatpush3.msra.mxu1 %v469_v13  ;;  %v453_v26 = vld [vmem:[%s1177_s4 + $0x68] sm:$0xff]  ;;  %v452_v29 = vld [vmem:[%s1177_s4 + $0x60] sm:$0xff]  ;;  %v479_v32 = vld [vmem:[%s1178_s5 + $0xb8] sm:$0xff] }
  0x23   : > { %819 = vmatpush3.msra.mxu0 %v334_v12  ;;  %762 = vmatprep.subr.mxu1 %v484_v14  ;;  %v465_v27 = vld [vmem:[%s1178_s5 + $0x48] sm:$0xff]  ;;  %v464_v30 = vld [vmem:[%s1178_s5 + $0x40] sm:$0xff]  ;;  %v451_v33 = vld [vmem:[%s1177_s4 + $0x58] sm:$0xff] }
  0x24   : > { %763 = vmatpush3.msra.mxu1 %v468_v15  ;;  %823 = vmatprep.subr.mxu0 %v455_v16  ;;  %v463_v34 = vld [vmem:[%s1178_s5 + $0x38] sm:$0xff]  ;;  %v478_v35 = vld [vmem:[%s1178_s5 + $0xb0] sm:$0xff]  ;;  %v477_v39 = vld [vmem:[%s1178_s5 + $0xa8] sm:$0xff] }
  0x25   : > { %820 = vmatprep.mubr.msk.f32.mxu0 %vm338_vm0, %v748_v19  ;;  %764 = vmatprep.subr.mxu1 %v483_v18  ;;  %v450_v36 = vld [vmem:[%s1177_s4 + $0x50] sm:$0xff]  ;;  %v449_v40 = vld [vmem:[%s1177_s4 + $0x48] sm:$0xff]  ;;  %v476_v42 = vld [vmem:[%s1178_s5 + $0xa0] sm:$0xff] }
  0x26   : > { %821 = vmatmul.mubr.msk.f32.vlgmr.msra.gmra.mxu0 %vm338_vm0, %v749_v20  ;;  %765 = vmatpush3.msra.mxu1 %v467_v21  ;;  %v462_v37 = vld [vmem:[%s1178_s5 + $0x30] sm:$0xff]  ;;  %v461_v41 = vld [vmem:[%s1178_s5 + $0x28] sm:$0xff]  ;;  %v448_v43 = vld [vmem:[%s1177_s4 + $0x40] sm:$0xff] }
  0x27   : > { %824 = vmatpush3.msra.mxu0 %v455_v16  ;;  %766 = vmatprep.subr.mxu1 %v482_v22  ;;  %v460_v44 = vld [vmem:[%s1178_s5 + $0x20] sm:$0xff]  ;;  %v475_v46 = vld [vmem:[%s1178_s5 + $0x98] sm:$0xff]  ;;  %v474_v51 = vld [vmem:[%s1178_s5 + $0x90] sm:$0xff] }
  0x28   : > { %825 = vmatprep.subr.mxu0 %v454_v23  ;;  %767 = vmatpush3.msra.mxu1 %v466_v24  ;;  %v424_v47 = vld [vmem:[%s1176_s3] sm:$0x3]  ;;  %v447_v49 = vld [vmem:[%s1177_s4 + $0x38] sm:$0xff]  ;;  %v446_v52 = vld [vmem:[%s1177_s4 + $0x30] sm:$0xff] }
  0x29   : > { %826 = vmatpush3.msra.mxu0 %v454_v23  ;;  %768 = vmatprep.subr.mxu1 %v481_v25  ;;  %v459_v50 = vld [vmem:[%s1178_s5 + $0x18] sm:$0xff]  ;;  %v458_v53 = vld [vmem:[%s1178_s5 + $0x10] sm:$0xff]  ;;  %v433_v54 = vrot.slane %v424_v47, %v432_v45  ;;  %v473_v55 = vld [vmem:[%s1178_s5 + $0x88] sm:$0xff]  ;;  %v429_v57 = vrot.slane %v424_v47, %v428_v48 }
  0x2a   : > { %827 = vmatprep.subr.mxu0 %v453_v26  ;;  %769 = vmatpush3.msra.mxu1 %v465_v27  ;;  %v421_v56 = vld [vmem:[%s1123_s19 + $0x8] sm:$0xff]  ;;  %v420_v60 = vld [vmem:[%s1123_s19] sm:$0xff]  ;;  %v423_v62 = vld [vmem:[%s1123_s19 + $0x18] sm:$0xff] }
  0x2b   : > { %828 = vmatpush3.msra.mxu0 %v453_v26  ;;  %770 = vmatprep.subr.mxu1 %v480_v28  ;;  %v445_v58 = vld [vmem:[%s1177_s4 + $0x28] sm:$0xff]  ;;  %v472_v61 = vld [vmem:[%s1178_s5 + $0x80] sm:$0xff]  ;;  %v437_v1 = vmul.f32 %v433_v54, %v421_v56  ;;  %v436_v2 = vmul.f32 %v429_v57, %v420_v60  ;;  %v443_v3 = vld [vmem:[%s1177_s4 + $0x18] sm:$0xff]  ;;  %v439_v4 = vmul.f32 %v433_v54, %v423_v62 }
  0x2c   : > { %829 = vmatprep.subr.mxu0 %v452_v29  ;;  %771 = vmatpush3.msra.mxu1 %v464_v30  ;;  %v457_v59 = vld [vmem:[%s1178_s5 + $0x8] sm:$0xff]  ;;  %v444_v63 = vld [vmem:[%s1177_s4 + $0x20] sm:$0xff]  ;;  %v442_v5 = vld [vmem:[%s1177_s4 + $0x10] sm:$0xff] }
  0x2d   : > { %830 = vmatpush3.msra.mxu0 %v452_v29  ;;  %772 = vmatprep.subr.mxu1 %v479_v32  ;;  %v456_v0 = vld [vmem:[%s1178_s5] sm:$0xff]  ;;  %v422_v6 = vld [vmem:[%s1123_s19 + $0x10] sm:$0xff]  ;;  %v441_v8 = vld [vmem:[%s1177_s4 + $0x8] sm:$0xff] }
  0x2e   : > { %831 = vmatprep.subr.mxu0 %v451_v33  ;;  %773 = vmatpush3.msra.mxu1 %v463_v34  ;;  %v438_v7 = vmul.f32 %v429_v57, %v422_v6  ;;  %v440_v9 = vld [vmem:[%s1177_s4] sm:$0xff] }
  0x2f   : > { %832 = vmatpush3.msra.mxu0 %v451_v33  ;;  %774 = vmatprep.subr.mxu1 %v478_v35  ;;  %v741_v20 = vld [vmem:[%s1179_s6] ss:$0 sm:$0xff] }
  0x30   : > { %833 = vmatprep.subr.mxu0 %v450_v36  ;;  %775 = vmatpush3.msra.mxu1 %v462_v37 }
  0x31   : > { %834 = vmatpush3.msra.mxu0 %v450_v36  ;;  %776 = vmatprep.subr.mxu1 %v477_v39 }
  0x32   : > { %835 = vmatprep.subr.mxu0 %v449_v40  ;;  %777 = vmatpush3.msra.mxu1 %v461_v41 }
  0x33   : > { %836 = vmatpush3.msra.mxu0 %v449_v40  ;;  %778 = vmatprep.subr.mxu1 %v476_v42 }
  0x34   : > { %837 = vmatprep.subr.mxu0 %v448_v43  ;;  %779 = vmatpush3.msra.mxu1 %v460_v44 }
  0x35   : > { %838 = vmatpush3.msra.mxu0 %v448_v43  ;;  %780 = vmatprep.subr.mxu1 %v475_v46 }
  0x36   : > { %839 = vmatprep.subr.mxu0 %v447_v49  ;;  %781 = vmatpush3.msra.mxu1 %v459_v50 }
  0x37   : > { %840 = vmatpush3.msra.mxu0 %v447_v49  ;;  %782 = vmatprep.subr.mxu1 %v474_v51 }
  0x38   : > { %841 = vmatprep.subr.mxu0 %v446_v52  ;;  %783 = vmatpush3.msra.mxu1 %v458_v53 }
  0x39   : > { %842 = vmatpush3.msra.mxu0 %v446_v52  ;;  %784 = vmatprep.subr.mxu1 %v473_v55 }
  0x3a   : > { %843 = vmatprep.subr.mxu0 %v445_v58  ;;  %785 = vmatpush3.msra.mxu1 %v457_v59 }
  0x3b   : > { %844 = vmatpush3.msra.mxu0 %v445_v58  ;;  %786 = vmatprep.subr.mxu1 %v472_v61 }
  0x3c   : > { %845 = vmatprep.subr.mxu0 %v444_v63  ;;  %787 = vmatpush3.msra.mxu1 %v456_v0 }
  0x3d   : > { %552 = vmatprep.mubr.f32.mxu1 %v437_v1  ;;  %846 = vmatpush3.msra.mxu0 %v444_v63 }
  0x3e   : > { %553 = vmatmul.mubr.f32.vlgmr.msra.gmra.mxu1 %v436_v2  ;;  %847 = vmatprep.subr.mxu0 %v443_v3 }
  0x3f   : > { %848 = vmatpush3.msra.mxu0 %v443_v3  ;;  %557 = vmatprep.mubr.f32.mxu1 %v439_v4 }
  0x40   : > { %849 = vmatprep.subr.mxu0 %v442_v5 }
  0x41   : > { %850 = vmatpush3.msra.mxu0 %v442_v5 }
  0x42   : > { %558 = vmatmul.mubr.f32.gmra.mxu1 %v438_v7  ;;  %851 = vmatprep.subr.mxu0 %v441_v8 }
  0x43   : > { %852 = vmatpush3.msra.mxu0 %v441_v8 }
  0x44   : > { %853 = vmatprep.subr.mxu0 %v440_v9 }
  0x45   : > { %854 = vmatpush3.msra.mxu0 %v440_v9 }
  0xe6   : > { %v822_v10 = vpop.f32.mrf.mxu0 }
  0xe8   : > { %v411_v11 = vpop.f32.mrf.mxu0 }
  0xe9   : > { %855 = vmatprep.mubr.f32.mxu0 %v411_v11 }
  0xea   : > { %856 = vmatmul.mubr.f32.vlgmr.msra.gmra.mxu0 %v822_v10 }
  0xfe   : > { %v788_v12 = vpop.f32.mrf.mxu1 }
 0x100   : > { %v789_v13 = vpop.f32.mrf.mxu1 }
 0x101   : > { %v790_v18 = vadd.f32 %v789_v13, %v788_v12 }
 0x102   : > { %v791_v14 = vpop.f32.mrf.mxu1 }
 0x104   : > { %v792_v15 = vpop.f32.mrf.mxu1 }
 0x105   : > { %v793_v16 = vadd.f32 %v792_v15, %v791_v14 }
 0x1aa   : > { %v857_v17 = vpop.f32.mrf.mxu0 }
 0x1ab   : > { %v635_v19 = vadd.f32 %v857_v17, %v793_v16 }
 0x1ac   : > { %v629_v21 = vpop.f32.mrf.mxu0 }
 0x1ad   : > { %v630_v22 = vadd.f32 %v790_v18, %v629_v21  ;;  %v646_v23 = vadd.f32 %v741_v20, %v635_v19 }
 0x1af   : > { %v645_v24 = vadd.f32 %v741_v20, %v630_v22  ;;  %v648_v26 = vmax.f32 %v646_v23, 0.0 }
 0x1b1   : > { %v647_v25 = vmax.f32 %v645_v24, 0.0  ;;  %650 = vst [vmem:[%s328_s16 + $0x8] sm:$0xff] %v648_v26 }
 0x1b3   : > { %649 = vst [vmem:[%s328_s16] sm:$0xff] %v647_v25 }
 0x1b4 PF: > { %p14_p9 = scmp.ge.s32.totalorder %s963_s28, 4   ;;  %s1181_s24 = smov %s900_s25 }
 0x1b5   : > { %s1182_s25 = smov %s972_s8  ;;  %s1183_s26 = smov %s963_s28 }
 0x1b6   :  { %16 = sbr.rel (!%p14_p9) target bundleno = 2 (0x2), region = 109 }

// kernel: _forward_padded.14
= control target key start
LH: loop header
LB: loop body
LE: loop exit
PB: predicated region body
PF: predicated region fallthrough
CT: control target
= control target key end

     0   :  { %s1103_s24 = smov 0   ;;  %s1105_s25 = smov 0   ;;  %s1383_s0 = inlined_call_operand.vmem [shape: bf16[32,32], index: 0, kind: input, shape index: {}]   ;;  %s1384_s1 = inlined_call_operand.vmem [shape: f32[32,128], index: 1, kind: input, shape index: {}]   ;;  %s1385_s2 = inlined_call_operand.vmem [shape: f32[32,512], index: 2, kind: input, shape index: {}]   ;;  %s1386_s3 = inlined_call_operand.vmem [shape: f32[1,384], index: 3, kind: input, shape index: {}]   ;;  %s1387_s4 = inlined_call_operand.vmem [shape: f32[128,128], index: 4, kind: input, shape index: {}]   ;;  %s1388_s5 = inlined_call_operand.vmem [shape: f32[384,128], index: 5, kind: input, shape index: {}]   ;;  %s1389_s6 = inlined_call_operand.vmem [shape: f32[1,128], index: 6, kind: input, shape index: {}]   ;;  %s1390_s7 = inlined_call_operand.vmem [shape: f32[32,128], index: 7, kind: output, shape index: {}]  }
   0x1   :  { %s1107_s26 = smov 0  }
   0x2 LB: > { %s829_s27 = sadd.s32 4294967295, %s1061_s26   ;;  %s1120_s28 = sadd.s32 1, %s1061_s26   ;;  %s1061_s26 = sphi %s1107_s26, %s1393_s26   ;;  %s1057_s25 = sphi %s1105_s25, %s1392_s25   ;;  %s1053_s24 = sphi %s1103_s24, %s1391_s24  }
   0x3   : > { %s68_s29 = ssub.s32 %s1061_s26, %s1120_s28  ;;  %s71_s30 = sadd.s32 1, %s1057_s25 }
   0x4   : > { %p69_p0 = scmp.eq.s32.totalorder %s68_s29, 0  ;;  %p78_p1 = scmp.ne.s32.totalorder %s1057_s25, %s1053_s24 }
   0x5   : > { %p79_p2 = scmp.eq.s32.totalorder %s1061_s26, 0  ;;  %p832_p4 = scmp.ge.s32.totalorder %s1061_s26, 2 }
   0x6   : > { %s1129_s8 = scalar_select %p69_p0, %s1057_s25, %s71_s30  }
   0x7   : > { %p80_p3 = por %p79_p2, %p78_p1  ;;  %229 = sbr.rel (%p832_p4) target bundleno = 20 (0x14), region = 36 }
   0xc   : > { %241 = sbr.rel (!%p80_p3) target bundleno = 20 (0x14), region = 44  ;;  %s243_s9 = sand.u32 (%p80_p3), 1, %s1057_s25  }
   0xd   : > { %s847_s10 = sshll.u32 (%p80_p3), %s1061_s26, 6  ;;  %s1013_s11 = smul.u32 (%p80_p3), 48, %s243_s9 }
   0xe   : > { %s249_s14 = scalar_lea.vmem (%p80_p3), %s1385_s2, %s847_s10 }
   0xf   : > { %v262_v0 = vld [vmem:[%s249_s14] sm:$0xff] (%p80_p3)  ;;  %v264_v1 = vld [vmem:[%s249_s14 + $0x8] sm:$0xff] (%p80_p3)  ;;  %v266_v2 = vld [vmem:[%s249_s14 + $0x10] sm:$0xff] (%p80_p3)  ;;  %s245_s15 = scalar_lea.vmem (%p80_p3), [#allocation2], %s1013_s11 }
  0x10   : > { %v268_v3 = vld [vmem:[%s249_s14 + $0x20] sm:$0xff] (%p80_p3)  ;;  %v270_v4 = vld [vmem:[%s249_s14 + $0x28] sm:$0xff] (%p80_p3)  ;;  %v272_v5 = vld [vmem:[%s249_s14 + $0x30] sm:$0xff] (%p80_p3)  ;;  %263 = vst [vmem:[%s245_s15] sm:$0xff] (%p80_p3), %v262_v0 }
  0x11   : > { %265 = vst [vmem:[%s245_s15 + $0x8] sm:$0xff] %v264_v1  ;;  %267 = vst [vmem:[%s245_s15 + $0x10] sm:$0xff] %v266_v2 }
  0x12   : > { %269 = vst [vmem:[%s245_s15 + $0x18] sm:$0xff] %v268_v3  ;;  %271 = vst [vmem:[%s245_s15 + $0x20] sm:$0xff] %v270_v4 }
  0x13   : > { %273 = vst [vmem:[%s245_s15 + $0x28] sm:$0xff] %v272_v5 }
  0x14 PF: > { %p836_p5 = scmp.ge.s32.totalorder %s1061_s26, 1  ;;  %p278_p6 = scmp.lt.s32.totalorder %s1061_s26, 3 }
  0x16   : > { %p279_p7 = pnand %p836_p5, %p278_p6 }
  0x17   : > { %s837_s20 = sshll.u32 (!%p279_p7), %s829_s27, 1  ;;  %s285_s23 = sand.u32 (!%p279_p7), 1, %s1053_s24  }
  0x18   : > { %282 = sbr.rel (%p279_p7) target bundleno = 438 (0x1b6), region = 67  ;;  %p322_p8 = scmp.lt.s32.totalorder (!%p279_p7), %s837_s20, 3 }
  0x19   : > { %s1247_s14 = smul.u32 (!%p279_p7), 48, %s285_s23 }
  0x1b   : > { %s1283_s19 = scalar_lea.vmem (!%p279_p7), [#allocation2], %s1247_s14 }
  0x1d   : > { %v341_v6 = vld [vmem:[%s1384_s1 + $0x18] sm:$0xff]  ;;  %v340_v7 = vld [vmem:[%s1384_s1 + $0x10] sm:$0xff]  ;;  %v339_v10 = vld [vmem:[%s1384_s1 + $0x8] sm:$0xff]  ;;  %s1395_s20 = smov (!%p322_p8, %s837_s20), 3  ;;  %vm342_vm0 = vcmask 261120   ;;  %v432_v33 = vlaneseq }
  0x1e   : > { %932 = vmatprep.subr.mxu0 %v341_v6  ;;  %v500_v8 = vld [vmem:[%s1388_s5 + $0xf8] sm:$0xff]  ;;  %v499_v11 = vld [vmem:[%s1388_s5 + $0xf0] sm:$0xff]  ;;  %v498_v13 = vld [vmem:[%s1388_s5 + $0xe8] sm:$0xff]  ;;  %s838_s18 = sshll.u32 %s1395_s20, 2  ;;  %s840_s15 = sshll.u32 %s1395_s20, 3 }
  0x1f   : > { %v484_v9 = vld [vmem:[%s1388_s5 + $0x78] sm:$0xff]  ;;  %933 = vmatpush3.msra.mxu0 %v341_v6  ;;  %858 = vmatprep.subr.mxu1 %v500_v8  ;;  %v483_v12 = vld [vmem:[%s1388_s5 + $0x70] sm:$0xff]  ;;  %v338_v14 = vld [vmem:[%s1384_s1] sm:$0xff]  ;;  %s325_s29 = scalar_lea.vmem %s1383_s0, %s838_s18  ;;  %v433_v40 = vshrl.u32 %v432_v33, 7  ;;  %s332_s18 = scalar_lea.vmem %s1390_s7, %s840_s15 }
  0x20   : > { %934 = vmatprep.subr.mxu0 %v340_v7  ;;  %859 = vmatpush3.msra.mxu1 %v484_v9  ;;  %v482_v15 = vld [vmem:[%s1388_s5 + $0x68] sm:$0xff]  ;;  %v497_v16 = vld [vmem:[%s1388_s5 + $0xe0] sm:$0xff]  ;;  %v516_v17 = vld [vmem:[%s1388_s5 + $0x178] sm:$0xff] }
  0x21   : > { %935 = vmatpush3.msra.mxu0 %v340_v7  ;;  %860 = vmatprep.subr.mxu1 %v499_v11  ;;  %v481_v18 = vld [vmem:[%s1388_s5 + $0x60] sm:$0xff]  ;;  %v496_v20 = vld [vmem:[%s1388_s5 + $0xd8] sm:$0xff]  ;;  %v495_v24 = vld [vmem:[%s1388_s5 + $0xd0] sm:$0xff]  ;;  %v438_v47 = vsub.s32 1, %v433_v40  ;;  %v434_v50 = vsub.s32 0, %v433_v40  ;;  %v442_v53 = vsub.s32 2, %v433_v40 }
  0x22   : > { %936 = vmatprep.subr.mxu0 %v339_v10  ;;  %861 = vmatpush3.msra.mxu1 %v483_v12  ;;  %v849_v19 = vld [vmem:[%s325_s29] sm:$0xff]   ;;  %v480_v23 = vld [vmem:[%s1388_s5 + $0x58] sm:$0xff]  ;;  %v515_v25 = vld [vmem:[%s1388_s5 + $0x170] sm:$0xff] }
  0x23   : > { %937 = vmatpush3.msra.mxu0 %v339_v10  ;;  %862 = vmatprep.subr.mxu1 %v498_v13  ;;  %v850_v21 = vunpack.c.l.bf16 %v849_v19  ;;  %v851_v22 = vunpack.c.h.bf16 %v849_v19  ;;  %v479_v26 = vld [vmem:[%s1388_s5 + $0x50] sm:$0xff]  ;;  %v494_v27 = vld [vmem:[%s1388_s5 + $0xc8] sm:$0xff]  ;;  %v493_v30 = vld [vmem:[%s1388_s5 + $0xc0] sm:$0xff] }
  0x24   : > { %938 = vmatprep.subr.mxu0 %v338_v14  ;;  %863 = vmatpush3.msra.mxu1 %v482_v15  ;;  %v514_v28 = vld [vmem:[%s1388_s5 + $0x168] sm:$0xff]  ;;  %v513_v31 = vld [vmem:[%s1388_s5 + $0x160] sm:$0xff]  ;;  %v492_v34 = vld [vmem:[%s1388_s5 + $0xb8] sm:$0xff] }
  0x25   : > { %939 = vmatpush3.msra.mxu0 %v338_v14  ;;  %864 = vmatprep.subr.mxu1 %v497_v16  ;;  %v478_v29 = vld [vmem:[%s1388_s5 + $0x48] sm:$0xff]  ;;  %v477_v32 = vld [vmem:[%s1388_s5 + $0x40] sm:$0xff]  ;;  %v512_v35 = vld [vmem:[%s1388_s5 + $0x158] sm:$0xff] }
  0x26   : > { %943 = vmatprep.subr.mxu0 %v516_v17  ;;  %865 = vmatpush3.msra.mxu1 %v481_v18  ;;  %v476_v36 = vld [vmem:[%s1388_s5 + $0x38] sm:$0xff]  ;;  %v491_v37 = vld [vmem:[%s1388_s5 + $0xb0] sm:$0xff]  ;;  %v490_v41 = vld [vmem:[%s1388_s5 + $0xa8] sm:$0xff] }
  0x27   : > { %940 = vmatprep.mubr.msk.f32.mxu0 %vm342_vm0, %v850_v21  ;;  %866 = vmatprep.subr.mxu1 %v496_v20  ;;  %v511_v38 = vld [vmem:[%s1388_s5 + $0x150] sm:$0xff]  ;;  %v510_v42 = vld [vmem:[%s1388_s5 + $0x148] sm:$0xff]  ;;  %v489_v44 = vld [vmem:[%s1388_s5 + $0xa0] sm:$0xff] }
  0x28   : > { %941 = vmatmul.mubr.msk.f32.vlgmr.msra.gmra.mxu0 %vm342_vm0, %v851_v22  ;;  %867 = vmatpush3.msra.mxu1 %v480_v23  ;;  %v475_v39 = vld [vmem:[%s1388_s5 + $0x30] sm:$0xff]  ;;  %v474_v43 = vld [vmem:[%s1388_s5 + $0x28] sm:$0xff]  ;;  %v509_v45 = vld [vmem:[%s1388_s5 + $0x140] sm:$0xff] }
  0x29   : > { %944 = vmatpush3.msra.mxu0 %v516_v17  ;;  %868 = vmatprep.subr.mxu1 %v495_v24  ;;  %v473_v46 = vld [vmem:[%s1388_s5 + $0x20] sm:$0xff]  ;;  %v488_v48 = vld [vmem:[%s1388_s5 + $0x98] sm:$0xff]  ;;  %v487_v54 = vld [vmem:[%s1388_s5 + $0x90] sm:$0xff] }
  0x2a   : > { %945 = vmatprep.subr.mxu0 %v515_v25  ;;  %869 = vmatpush3.msra.mxu1 %v479_v26  ;;  %v430_v49 = vld [vmem:[%s1386_s3] sm:$0x7]  ;;  %v508_v51 = vld [vmem:[%s1388_s5 + $0x138] sm:$0xff]  ;;  %v507_v55 = vld [vmem:[%s1388_s5 + $0x130] sm:$0xff] }
  0x2b   : > { %946 = vmatpush3.msra.mxu0 %v515_v25  ;;  %870 = vmatprep.subr.mxu1 %v494_v27  ;;  %v472_v52 = vld [vmem:[%s1388_s5 + $0x18] sm:$0xff]  ;;  %v471_v56 = vld [vmem:[%s1388_s5 + $0x10] sm:$0xff]  ;;  %v439_v57 = vrot.slane %v430_v49, %v438_v47  ;;  %v486_v58 = vld [vmem:[%s1388_s5 + $0x88] sm:$0xff]  ;;  %v435_v60 = vrot.slane %v430_v49, %v434_v50  ;;  %v443_v0 = vrot.slane %v430_v49, %v442_v53 }
  0x2c   : > { %947 = vmatprep.subr.mxu0 %v514_v28  ;;  %871 = vmatpush3.msra.mxu1 %v478_v29  ;;  %v425_v59 = vld [vmem:[%s1283_s19 + $0x8] sm:$0xff]  ;;  %v424_v63 = vld [vmem:[%s1283_s19] sm:$0xff]  ;;  %v426_v2 = vld [vmem:[%s1283_s19 + $0x10] sm:$0xff] }
  0x2d   : > { %948 = vmatpush3.msra.mxu0 %v514_v28  ;;  %872 = vmatprep.subr.mxu1 %v493_v30  ;;  %v506_v61 = vld [vmem:[%s1388_s5 + $0x128] sm:$0xff]  ;;  %v485_v1 = vld [vmem:[%s1388_s5 + $0x80] sm:$0xff]  ;;  %v448_v5 = vmul.f32 %v439_v57, %v425_v59  ;;  %v447_v6 = vmul.f32 %v435_v60, %v424_v63  ;;  %v504_v7 = vld [vmem:[%s1388_s5 + $0x118] sm:$0xff]  ;;  %v449_v8 = vmul.f32 %v443_v0, %v426_v2 }
  0x2e   : > { %949 = vmatprep.subr.mxu0 %v513_v31  ;;  %873 = vmatpush3.msra.mxu1 %v477_v32  ;;  %v470_v62 = vld [vmem:[%s1388_s5 + $0x8] sm:$0xff]  ;;  %v505_v3 = vld [vmem:[%s1388_s5 + $0x120] sm:$0xff]  ;;  %v503_v9 = vld [vmem:[%s1388_s5 + $0x110] sm:$0xff] }
  0x2f   : > { %950 = vmatpush3.msra.mxu0 %v513_v31  ;;  %874 = vmatprep.subr.mxu1 %v492_v34  ;;  %v469_v4 = vld [vmem:[%s1388_s5] sm:$0xff]  ;;  %v468_v10 = vld [vmem:[%s1387_s4 + $0x78] sm:$0xff]  ;;  %v502_v11 = vld [vmem:[%s1388_s5 + $0x108] sm:$0xff] }
  0x30   : > { %951 = vmatprep.subr.mxu0 %v512_v35  ;;  %875 = vmatpush3.msra.mxu1 %v476_v36  ;;  %v429_v12 = vld [vmem:[%s1283_s19 + $0x28] sm:$0xff]  ;;  %v467_v13 = vld [vmem:[%s1387_s4 + $0x70] sm:$0xff]  ;;  %v501_v15 = vld [vmem:[%s1388_s5 + $0x100] sm:$0xff] }
  0x31   : > { %952 = vmatpush3.msra.mxu0 %v512_v35  ;;  %876 = vmatprep.subr.mxu1 %v491_v37  ;;  %v428_v14 = vld [vmem:[%s1283_s19 + $0x20] sm:$0xff]  ;;  %v466_v16 = vld [vmem:[%s1387_s4 + $0x68] sm:$0xff]  ;;  %v452_v18 = vmul.f32 %v443_v0, %v429_v12  ;;  %v464_v22 = vld [vmem:[%s1387_s4 + $0x58] sm:$0xff] }
  0x32   : > { %953 = vmatprep.subr.mxu0 %v511_v38  ;;  %877 = vmatpush3.msra.mxu1 %v475_v39  ;;  %v427_v17 = vld [vmem:[%s1283_s19 + $0x18] sm:$0xff]  ;;  %v465_v19 = vld [vmem:[%s1387_s4 + $0x60] sm:$0xff]  ;;  %v451_v20 = vmul.f32 %v439_v57, %v428_v14  ;;  %v463_v23 = vld [vmem:[%s1387_s4 + $0x50] sm:$0xff] }
  0x33   : > { %954 = vmatpush3.msra.mxu0 %v511_v38  ;;  %878 = vmatprep.subr.mxu1 %v490_v41  ;;  %v450_v21 = vmul.f32 %v435_v60, %v427_v17  ;;  %v462_v24 = vld [vmem:[%s1387_s4 + $0x48] sm:$0xff]  ;;  %v461_v25 = vld [vmem:[%s1387_s4 + $0x40] sm:$0xff]  ;;  %v460_v26 = vld [vmem:[%s1387_s4 + $0x38] sm:$0xff] }
  0x34   : > { %955 = vmatprep.subr.mxu0 %v510_v42  ;;  %879 = vmatpush3.msra.mxu1 %v474_v43  ;;  %v459_v27 = vld [vmem:[%s1387_s4 + $0x30] sm:$0xff]  ;;  %v458_v28 = vld [vmem:[%s1387_s4 + $0x28] sm:$0xff]  ;;  %v457_v29 = vld [vmem:[%s1387_s4 + $0x20] sm:$0xff] }
  0x35   : > { %956 = vmatpush3.msra.mxu0 %v510_v42  ;;  %880 = vmatprep.subr.mxu1 %v489_v44  ;;  %v456_v30 = vld [vmem:[%s1387_s4 + $0x18] sm:$0xff]  ;;  %v455_v31 = vld [vmem:[%s1387_s4 + $0x10] sm:$0xff]  ;;  %v454_v32 = vld [vmem:[%s1387_s4 + $0x8] sm:$0xff] }
  0x36   : > { %957 = vmatprep.subr.mxu0 %v509_v45  ;;  %881 = vmatpush3.msra.mxu1 %v473_v46  ;;  %v453_v33 = vld [vmem:[%s1387_s4] sm:$0xff] }
  0x37   : > { %958 = vmatpush3.msra.mxu0 %v509_v45  ;;  %882 = vmatprep.subr.mxu1 %v488_v48  ;;  %v843_v48 = vld [vmem:[%s1389_s6] ss:$0 sm:$0xff] }
  0x38   : > { %959 = vmatprep.subr.mxu0 %v508_v51  ;;  %883 = vmatpush3.msra.mxu1 %v472_v52 }
  0x39   : > { %960 = vmatpush3.msra.mxu0 %v508_v51  ;;  %884 = vmatprep.subr.mxu1 %v487_v54 }
  0x3a   : > { %961 = vmatprep.subr.mxu0 %v507_v55  ;;  %885 = vmatpush3.msra.mxu1 %v471_v56 }
  0x3b   : > { %962 = vmatpush3.msra.mxu0 %v507_v55  ;;  %886 = vmatprep.subr.mxu1 %v486_v58 }
  0x3c   : > { %963 = vmatprep.subr.mxu0 %v506_v61  ;;  %887 = vmatpush3.msra.mxu1 %v470_v62 }
  0x3d   : > { %964 = vmatpush3.msra.mxu0 %v506_v61  ;;  %888 = vmatprep.subr.mxu1 %v485_v1 }
  0x3e   : > { %965 = vmatprep.subr.mxu0 %v505_v3  ;;  %889 = vmatpush3.msra.mxu1 %v469_v4 }
  0x3f   : > { %966 = vmatpush3.msra.mxu0 %v505_v3  ;;  %581 = vmatprep.mubr.f32.mxu1 %v448_v5 }
  0x40   : > { %967 = vmatprep.subr.mxu0 %v504_v7  ;;  %582 = vmatmul.mubr.f32.vlgmr.msra.gmra.mxu1 %v447_v6 }
  0x41   : > { %968 = vmatpush3.msra.mxu0 %v504_v7  ;;  %975 = vmatprep.mubr.f32.mxu0 %v449_v8 }
  0x42   : > { %969 = vmatprep.subr.mxu0 %v503_v9  ;;  %978 = vmatprep.subr.mxu1 %v468_v10 }
  0x43   : > { %970 = vmatpush3.msra.mxu0 %v503_v9  ;;  %979 = vmatpush3.msra.mxu1 %v468_v10 }
  0x44   : > { %971 = vmatprep.subr.mxu0 %v502_v11  ;;  %980 = vmatprep.subr.mxu1 %v467_v13 }
  0x45   : > { %972 = vmatpush3.msra.mxu0 %v502_v11  ;;  %981 = vmatpush3.msra.mxu1 %v467_v13 }
  0x46   : > { %973 = vmatprep.subr.mxu0 %v501_v15  ;;  %982 = vmatprep.subr.mxu1 %v466_v16 }
  0x47   : > { %974 = vmatpush3.msra.mxu0 %v501_v15  ;;  %983 = vmatpush3.msra.mxu1 %v466_v16 }
  0x48   : > { %976 = vmatmul.mubr.f32.vlgmr.msra.gmra.mxu0 %v452_v18  ;;  %984 = vmatprep.subr.mxu1 %v465_v19 }
  0x49   : > { %985 = vmatpush3.msra.mxu1 %v465_v19  ;;  %586 = vmatprep.mubr.f32.mxu1 %v451_v20 }
  0x4a   : > { %986 = vmatprep.subr.mxu1 %v464_v22  ;;  %587 = vmatmul.mubr.f32.gmra.mxu1 %v450_v21 }
  0x4b   : > { %987 = vmatpush3.msra.mxu1 %v464_v22 }
  0x4c   : > { %988 = vmatprep.subr.mxu1 %v463_v23 }
  0x4d   : > { %989 = vmatpush3.msra.mxu1 %v463_v23 }
  0x4e   : > { %990 = vmatprep.subr.mxu1 %v462_v24 }
  0x4f   : > { %991 = vmatpush3.msra.mxu1 %v462_v24 }
  0x50   : > { %992 = vmatprep.subr.mxu1 %v461_v25 }
  0x51   : > { %993 = vmatpush3.msra.mxu1 %v461_v25 }
  0x52   : > { %994 = vmatprep.subr.mxu1 %v460_v26 }
  0x53   : > { %995 = vmatpush3.msra.mxu1 %v460_v26 }
  0x54   : > { %996 = vmatprep.subr.mxu1 %v459_v27 }
  0x55   : > { %997 = vmatpush3.msra.mxu1 %v459_v27 }
  0x56   : > { %998 = vmatprep.subr.mxu1 %v458_v28 }
  0x57   : > { %999 = vmatpush3.msra.mxu1 %v458_v28 }
  0x58   : > { %1000 = vmatprep.subr.mxu1 %v457_v29 }
  0x59   : > { %1001 = vmatpush3.msra.mxu1 %v457_v29 }
  0x5a   : > { %1002 = vmatprep.subr.mxu1 %v456_v30 }
  0x5b   : > { %1003 = vmatpush3.msra.mxu1 %v456_v30 }
  0x5c   : > { %1004 = vmatprep.subr.mxu1 %v455_v31 }
  0x5d   : > { %1005 = vmatpush3.msra.mxu1 %v455_v31 }
  0x5e   : > { %1006 = vmatprep.subr.mxu1 %v454_v32 }
  0x5f   : > { %1007 = vmatpush3.msra.mxu1 %v454_v32 }
  0x60   : > { %1008 = vmatprep.subr.mxu1 %v453_v33 }
  0x61   : > { %1009 = vmatpush3.msra.mxu1 %v453_v33 }
  0xe8   : > { %v942_v34 = vpop.f32.mrf.mxu0 }
  0xea   : > { %v415_v35 = vpop.f32.mrf.mxu0 }
  0xeb   : > { %1010 = vmatprep.mubr.f32.mxu1 %v415_v35 }
  0xec   : > { %1011 = vmatmul.mubr.f32.vlgmr.msra.gmra.mxu1 %v942_v34 }
 0x100   : > { %v890_v36 = vpop.f32.mrf.mxu1 }
 0x102   : > { %v891_v37 = vpop.f32.mrf.mxu1 }
 0x103   : > { %v892_v42 = vadd.f32 %v891_v37, %v890_v36 }
 0x108   : > { %v977_v41 = vpop.f32.mrf.mxu0 }
 0x10a   : > { %v893_v38 = vpop.f32.mrf.mxu1  ;;  %v658_v44 = vpop.f32.mrf.mxu0 }
 0x10b   : > { %v659_v46 = vadd.f32 %v892_v42, %v658_v44 }
 0x10c   : > { %v894_v39 = vpop.f32.mrf.mxu1 }
 0x10d   : > { %v895_v40 = vadd.f32 %v894_v39, %v893_v38 }
 0x10f   : > { %v664_v43 = vadd.f32 %v977_v41, %v895_v40 }
 0x1ac   : > { %v1012_v45 = vpop.f32.mrf.mxu1 }
 0x1ad   : > { %v739_v47 = vadd.f32 %v1012_v45, %v664_v43 }
 0x1ae   : > { %v733_v49 = vpop.f32.mrf.mxu1 }
 0x1af   : > { %v734_v50 = vadd.f32 %v733_v49, %v659_v46  ;;  %v750_v51 = vadd.f32 %v843_v48, %v739_v47 }
 0x1b1   : > { %v749_v52 = vadd.f32 %v843_v48, %v734_v50  ;;  %v752_v54 = vmax.f32 %v750_v51, 0.0 }
 0x1b3   : > { %v751_v53 = vmax.f32 %v749_v52, 0.0  ;;  %754 = vst [vmem:[%s332_s18 + $0x8] sm:$0xff] %v752_v54 }
 0x1b5   : > { %753 = vst [vmem:[%s332_s18] sm:$0xff] %v751_v53 }
 0x1b6 PF: > { %p14_p9 = scmp.ge.s32.totalorder %s1120_s28, 4   ;;  %s1391_s24 = smov %s1057_s25 }
 0x1b7   : > { %s1392_s25 = smov %s1129_s8  ;;  %s1393_s26 = smov %s1120_s28 }
 0x1b8   :  { %16 = sbr.rel (!%p14_p9) target bundleno = 2 (0x2), region = 109 }

// kernel: _forward_padded.13
= control target key start
LH: loop header
LB: loop body
LE: loop exit
PB: predicated region body
PF: predicated region fallthrough
CT: control target
= control target key end

     0   :  { %s710_s15 = smov 0   ;;  %s712_s16 = smov 0   ;;  %s920_s0 = inlined_call_operand.vmem [shape: f32[32,512], index: 0, kind: input, shape index: {}]   ;;  %s921_s1 = inlined_call_operand.vmem [shape: f32[1,384], index: 1, kind: input, shape index: {}]   ;;  %s922_s2 = inlined_call_operand.vmem [shape: f32[384,128], index: 2, kind: input, shape index: {}]   ;;  %s923_s3 = inlined_call_operand.vmem [shape: f32[1,128], index: 3, kind: input, shape index: {}]   ;;  %s924_s4 = inlined_call_operand.vmem [shape: f32[32,128], index: 4, kind: output, shape index: {}]  }
   0x1   :  { %s714_s17 = smov 0  }
   0x2 LB: > { %s529_s18 = sadd.s32 4294967295, %s683_s17   ;;  %s727_s19 = sadd.s32 1, %s683_s17   ;;  %s683_s17 = sphi %s714_s17, %s927_s17   ;;  %s679_s16 = sphi %s712_s16, %s926_s16   ;;  %s675_s15 = sphi %s710_s15, %s925_s15  }
   0x3   : > { %s18_s20 = ssub.s32 %s683_s17, %s727_s19  ;;  %s21_s21 = sadd.s32 1, %s679_s16 }
   0x4   : > { %p19_p0 = scmp.eq.s32.totalorder %s18_s20, 0  ;;  %p28_p1 = scmp.ne.s32.totalorder %s679_s16, %s675_s15 }
   0x5   : > { %p29_p2 = scmp.eq.s32.totalorder %s683_s17, 0  ;;  %p532_p4 = scmp.ge.s32.totalorder %s683_s17, 2 }
   0x6   : > { %s736_s22 = scalar_select %p19_p0, %s679_s16, %s21_s21  }
   0x7   : > { %p30_p3 = por %p29_p2, %p28_p1  ;;  %152 = sbr.rel (%p532_p4) target bundleno = 20 (0x14), region = 28 }
   0xc   : > { %155 = sbr.rel (!%p30_p3) target bundleno = 20 (0x14), region = 32  ;;  %s157_s23 = sand.u32 (%p30_p3), 1, %s679_s16  }
   0xd   : > { %s543_s24 = sshll.u32 (%p30_p3), %s683_s17, 6  ;;  %s635_s25 = smul.u32 (%p30_p3), 48, %s157_s23 }
   0xe   : > { %s163_s28 = scalar_lea.vmem (%p30_p3), %s920_s0, %s543_s24 }
   0xf   : > { %v176_v0 = vld [vmem:[%s163_s28] sm:$0xff] (%p30_p3)  ;;  %v178_v1 = vld [vmem:[%s163_s28 + $0x8] sm:$0xff] (%p30_p3)  ;;  %v180_v2 = vld [vmem:[%s163_s28 + $0x10] sm:$0xff] (%p30_p3)  ;;  %s159_s29 = scalar_lea.vmem (%p30_p3), [#allocation2], %s635_s25 }
  0x10   : > { %v182_v3 = vld [vmem:[%s163_s28 + $0x20] sm:$0xff] (%p30_p3)  ;;  %v184_v4 = vld [vmem:[%s163_s28 + $0x28] sm:$0xff] (%p30_p3)  ;;  %v186_v5 = vld [vmem:[%s163_s28 + $0x30] sm:$0xff] (%p30_p3)  ;;  %177 = vst [vmem:[%s159_s29] sm:$0xff] (%p30_p3), %v176_v0 }
  0x11   : > { %179 = vst [vmem:[%s159_s29 + $0x8] sm:$0xff] %v178_v1  ;;  %181 = vst [vmem:[%s159_s29 + $0x10] sm:$0xff] %v180_v2 }
  0x12   : > { %183 = vst [vmem:[%s159_s29 + $0x18] sm:$0xff] %v182_v3  ;;  %185 = vst [vmem:[%s159_s29 + $0x20] sm:$0xff] %v184_v4 }
  0x13   : > { %187 = vst [vmem:[%s159_s29 + $0x28] sm:$0xff] %v186_v5 }
  0x14 PF: > { %p536_p5 = scmp.ge.s32.totalorder %s683_s17, 1  ;;  %p192_p6 = scmp.lt.s32.totalorder %s683_s17, 3 }
  0x16   : > { %p193_p7 = pnand %p536_p5, %p192_p6 }
  0x17   : > { %s199_s8 = sand.u32 (!%p193_p7), 1, %s675_s15   ;;  %s537_s30 = sshll.u32 (!%p193_p7), %s529_s18, 1 }
  0x18   : > { %196 = sbr.rel (%p193_p7) target bundleno = 268 (0x10c), region = 55  ;;  %p226_p8 = scmp.lt.s32.totalorder (!%p193_p7), %s537_s30, 3 }
  0x19   : > { %s636_s24 = smul.u32 (!%p193_p7), 48, %s199_s8 }
  0x1b   : > { %s861_s27 = scalar_lea.vmem (!%p193_p7), [#allocation2], %s636_s24 }
  0x1d   : > { %v291_v6 = vld [vmem:[%s922_s2 + $0xf8] sm:$0xff]  ;;  %v290_v8 = vld [vmem:[%s922_s2 + $0xf0] sm:$0xff]  ;;  %v289_v11 = vld [vmem:[%s922_s2 + $0xe8] sm:$0xff]  ;;  %v239_v24 = vlaneseq  ;;  %s929_s30 = smov (!%p226_p8, %s537_s30), 3 }
  0x1e   : > { %v275_v7 = vld [vmem:[%s922_s2 + $0x78] sm:$0xff]  ;;  %544 = vmatprep.subr.mxu0 %v291_v6  ;;  %v274_v9 = vld [vmem:[%s922_s2 + $0x70] sm:$0xff]  ;;  %v273_v13 = vld [vmem:[%s922_s2 + $0x68] sm:$0xff]  ;;  %s538_s6 = sshll.u32 %s929_s30, 3 }
  0x1f   : > { %v307_v10 = vld [vmem:[%s922_s2 + $0x178] sm:$0xff]  ;;  %545 = vmatpush3.msra.mxu0 %v275_v7  ;;  %v306_v12 = vld [vmem:[%s922_s2 + $0x170] sm:$0xff]  ;;  %v305_v14 = vld [vmem:[%s922_s2 + $0x168] sm:$0xff]  ;;  %v240_v31 = vshrl.u32 %v239_v24, 7  ;;  %s229_s17 = scalar_lea.vmem %s924_s4, %s538_s6 }
  0x20   : > { %600 = vmatprep.subr.mxu1 %v307_v10  ;;  %546 = vmatprep.subr.mxu0 %v290_v8  ;;  %v288_v15 = vld [vmem:[%s922_s2 + $0xe0] sm:$0xff]  ;;  %v287_v18 = vld [vmem:[%s922_s2 + $0xd8] sm:$0xff]  ;;  %v286_v21 = vld [vmem:[%s922_s2 + $0xd0] sm:$0xff] }
  0x21   : > { %601 = vmatpush3.msra.mxu1 %v307_v10  ;;  %547 = vmatpush3.msra.mxu0 %v274_v9  ;;  %v272_v16 = vld [vmem:[%s922_s2 + $0x60] sm:$0xff]  ;;  %v271_v19 = vld [vmem:[%s922_s2 + $0x58] sm:$0xff]  ;;  %v270_v22 = vld [vmem:[%s922_s2 + $0x50] sm:$0xff]  ;;  %v245_v38 = vsub.s32 1, %v240_v31  ;;  %v241_v47 = vsub.s32 0, %v240_v31  ;;  %v249_v52 = vsub.s32 2, %v240_v31 }
  0x22   : > { %602 = vmatprep.subr.mxu1 %v306_v12  ;;  %548 = vmatprep.subr.mxu0 %v289_v11  ;;  %v304_v17 = vld [vmem:[%s922_s2 + $0x160] sm:$0xff]  ;;  %v303_v20 = vld [vmem:[%s922_s2 + $0x158] sm:$0xff]  ;;  %v302_v23 = vld [vmem:[%s922_s2 + $0x150] sm:$0xff] }
  0x23   : > { %603 = vmatpush3.msra.mxu1 %v306_v12  ;;  %549 = vmatpush3.msra.mxu0 %v273_v13  ;;  %v285_v25 = vld [vmem:[%s922_s2 + $0xc8] sm:$0xff]  ;;  %v284_v28 = vld [vmem:[%s922_s2 + $0xc0] sm:$0xff]  ;;  %v283_v32 = vld [vmem:[%s922_s2 + $0xb8] sm:$0xff] }
  0x24   : > { %604 = vmatprep.subr.mxu1 %v305_v14  ;;  %550 = vmatprep.subr.mxu0 %v288_v15  ;;  %v269_v26 = vld [vmem:[%s922_s2 + $0x48] sm:$0xff]  ;;  %v268_v29 = vld [vmem:[%s922_s2 + $0x40] sm:$0xff]  ;;  %v267_v33 = vld [vmem:[%s922_s2 + $0x38] sm:$0xff] }
  0x25   : > { %605 = vmatpush3.msra.mxu1 %v305_v14  ;;  %551 = vmatpush3.msra.mxu0 %v272_v16  ;;  %v301_v27 = vld [vmem:[%s922_s2 + $0x148] sm:$0xff]  ;;  %v300_v30 = vld [vmem:[%s922_s2 + $0x140] sm:$0xff]  ;;  %v299_v34 = vld [vmem:[%s922_s2 + $0x138] sm:$0xff] }
  0x26   : > { %606 = vmatprep.subr.mxu1 %v304_v17  ;;  %552 = vmatprep.subr.mxu0 %v287_v18  ;;  %v282_v35 = vld [vmem:[%s922_s2 + $0xb0] sm:$0xff]  ;;  %v281_v39 = vld [vmem:[%s922_s2 + $0xa8] sm:$0xff]  ;;  %v237_v40 = vld [vmem:[%s921_s1] sm:$0x7] }
  0x27   : > { %607 = vmatpush3.msra.mxu1 %v304_v17  ;;  %553 = vmatpush3.msra.mxu0 %v271_v19  ;;  %v266_v36 = vld [vmem:[%s922_s2 + $0x30] sm:$0xff]  ;;  %v265_v41 = vld [vmem:[%s922_s2 + $0x28] sm:$0xff]  ;;  %v280_v43 = vld [vmem:[%s922_s2 + $0xa0] sm:$0xff]  ;;  %v246_v46 = vrot.slane %v237_v40, %v245_v38  ;;  %v242_v57 = vrot.slane %v237_v40, %v241_v47  ;;  %v250_v62 = vrot.slane %v237_v40, %v249_v52 }
  0x28   : > { %608 = vmatprep.subr.mxu1 %v303_v20  ;;  %554 = vmatprep.subr.mxu0 %v286_v21  ;;  %v298_v37 = vld [vmem:[%s922_s2 + $0x130] sm:$0xff]  ;;  %v297_v42 = vld [vmem:[%s922_s2 + $0x128] sm:$0xff]  ;;  %v264_v44 = vld [vmem:[%s922_s2 + $0x20] sm:$0xff] }
  0x29   : > { %609 = vmatpush3.msra.mxu1 %v303_v20  ;;  %555 = vmatpush3.msra.mxu0 %v270_v22  ;;  %v296_v45 = vld [vmem:[%s922_s2 + $0x120] sm:$0xff]  ;;  %v279_v48 = vld [vmem:[%s922_s2 + $0x98] sm:$0xff]  ;;  %v278_v53 = vld [vmem:[%s922_s2 + $0x90] sm:$0xff] }
  0x2a   : > { %610 = vmatprep.subr.mxu1 %v302_v23  ;;  %556 = vmatprep.subr.mxu0 %v285_v25  ;;  %v232_v49 = vld [vmem:[%s861_s27 + $0x8] sm:$0xff]  ;;  %v262_v54 = vld [vmem:[%s922_s2 + $0x10] sm:$0xff]  ;;  %v276_v63 = vld [vmem:[%s922_s2 + $0x80] sm:$0xff] }
  0x2b   : > { %611 = vmatpush3.msra.mxu1 %v302_v23  ;;  %557 = vmatpush3.msra.mxu0 %v269_v26  ;;  %v263_v50 = vld [vmem:[%s922_s2 + $0x18] sm:$0xff]  ;;  %v294_v55 = vld [vmem:[%s922_s2 + $0x110] sm:$0xff]  ;;  %v255_v56 = vmul.f32 %v246_v46, %v232_v49  ;;  %v277_v58 = vld [vmem:[%s922_s2 + $0x88] sm:$0xff] }
  0x2c   : > { %612 = vmatprep.subr.mxu1 %v301_v27  ;;  %558 = vmatprep.subr.mxu0 %v284_v28  ;;  %v295_v51 = vld [vmem:[%s922_s2 + $0x118] sm:$0xff]  ;;  %v231_v59 = vld [vmem:[%s861_s27] sm:$0xff]  ;;  %v261_v60 = vld [vmem:[%s922_s2 + $0x8] sm:$0xff] }
  0x2d   : > { %613 = vmatpush3.msra.mxu1 %v301_v27  ;;  %559 = vmatpush3.msra.mxu0 %v268_v29  ;;  %v235_v61 = vld [vmem:[%s861_s27 + $0x20] sm:$0xff]  ;;  %v293_v0 = vld [vmem:[%s922_s2 + $0x108] sm:$0xff]  ;;  %v233_v1 = vld [vmem:[%s861_s27 + $0x10] sm:$0xff]  ;;  %v254_v3 = vmul.f32 %v242_v57, %v231_v59 }
  0x2e   : > { %614 = vmatprep.subr.mxu1 %v300_v30  ;;  %560 = vmatprep.subr.mxu0 %v283_v32  ;;  %v260_v2 = vld [vmem:[%s922_s2] sm:$0xff]  ;;  %v236_v4 = vld [vmem:[%s861_s27 + $0x28] sm:$0xff]  ;;  %v258_v6 = vmul.f32 %v246_v46, %v235_v61  ;;  %v234_v7 = vld [vmem:[%s861_s27 + $0x18] sm:$0xff]  ;;  %v256_v8 = vmul.f32 %v250_v62, %v233_v1 }
  0x2f   : > { %615 = vmatpush3.msra.mxu1 %v300_v30  ;;  %561 = vmatpush3.msra.mxu0 %v267_v33  ;;  %v292_v5 = vld [vmem:[%s922_s2 + $0x100] sm:$0xff]  ;;  %v259_v9 = vmul.f32 %v250_v62, %v236_v4  ;;  %v257_v10 = vmul.f32 %v242_v57, %v234_v7 }
  0x30   : > { %616 = vmatprep.subr.mxu1 %v299_v34  ;;  %562 = vmatprep.subr.mxu0 %v282_v35  ;;  %v539_v13 = vld [vmem:[%s923_s3] ss:$0 sm:$0xff] }
  0x31   : > { %617 = vmatpush3.msra.mxu1 %v299_v34  ;;  %563 = vmatpush3.msra.mxu0 %v266_v36 }
  0x32   : > { %618 = vmatprep.subr.mxu1 %v298_v37  ;;  %564 = vmatprep.subr.mxu0 %v281_v39 }
  0x33   : > { %619 = vmatpush3.msra.mxu1 %v298_v37  ;;  %565 = vmatpush3.msra.mxu0 %v265_v41 }
  0x34   : > { %620 = vmatprep.subr.mxu1 %v297_v42  ;;  %566 = vmatprep.subr.mxu0 %v280_v43 }
  0x35   : > { %621 = vmatpush3.msra.mxu1 %v297_v42  ;;  %567 = vmatpush3.msra.mxu0 %v264_v44 }
  0x36   : > { %622 = vmatprep.subr.mxu1 %v296_v45  ;;  %568 = vmatprep.subr.mxu0 %v279_v48 }
  0x37   : > { %623 = vmatpush3.msra.mxu1 %v296_v45  ;;  %569 = vmatpush3.msra.mxu0 %v263_v50 }
  0x38   : > { %624 = vmatprep.subr.mxu1 %v295_v51  ;;  %570 = vmatprep.subr.mxu0 %v278_v53 }
  0x39   : > { %625 = vmatpush3.msra.mxu1 %v295_v51  ;;  %571 = vmatpush3.msra.mxu0 %v262_v54 }
  0x3a   : > { %626 = vmatprep.subr.mxu1 %v294_v55  ;;  %572 = vmatprep.subr.mxu0 %v277_v58 }
  0x3b   : > { %379 = vmatprep.mubr.f32.mxu0 %v255_v56  ;;  %573 = vmatpush3.msra.mxu0 %v261_v60 }
  0x3c   : > { %627 = vmatpush3.msra.mxu1 %v294_v55  ;;  %574 = vmatprep.subr.mxu0 %v276_v63 }
  0x3d   : > { %628 = vmatprep.subr.mxu1 %v293_v0  ;;  %575 = vmatpush3.msra.mxu0 %v260_v2 }
  0x3e   : > { %629 = vmatpush3.msra.mxu1 %v293_v0  ;;  %380 = vmatmul.mubr.f32.vlgmr.msra.gmra.mxu0 %v254_v3 }
  0x3f   : > { %630 = vmatprep.subr.mxu1 %v292_v5  ;;  %384 = vmatprep.mubr.f32.mxu0 %v258_v6 }
  0x40   : > { %631 = vmatpush3.msra.mxu1 %v292_v5  ;;  %632 = vmatprep.mubr.f32.mxu1 %v256_v8 }
  0x41   : > { %633 = vmatmul.mubr.f32.vlgmr.msra.gmra.mxu1 %v259_v9 }
  0x42   : > { %385 = vmatmul.mubr.f32.gmra.mxu0 %v257_v10 }
  0xfe   : > { %v576_v11 = vpop.f32.mrf.mxu0 }
 0x100   : > { %v577_v12 = vpop.f32.mrf.mxu0 }
 0x101   : > { %v578_v14 = vadd.f32 %v577_v12, %v576_v11  ;;  %v634_v15 = vpop.f32.mrf.mxu1 }
 0x102   : > { %v579_v16 = vpop.f32.mrf.mxu0 }
 0x103   : > { %v382_v17 = vadd.f32 %v578_v14, %v539_v13  ;;  %v456_v18 = vpop.f32.mrf.mxu1 }
 0x104   : > { %v580_v19 = vpop.f32.mrf.mxu0 }
 0x105   : > { %v581_v20 = vadd.f32 %v580_v19, %v579_v16  ;;  %v457_v21 = vadd.f32 %v456_v18, %v382_v17 }
 0x107   : > { %v387_v22 = vadd.f32 %v581_v20, %v539_v13  ;;  %465 = vst [vmem:[%s229_s17] sm:$0xff] %v457_v21 }
 0x109   : > { %v462_v23 = vadd.f32 %v634_v15, %v387_v22 }
 0x10b   : > { %466 = vst [vmem:[%s229_s17 + $0x8] sm:$0xff] %v462_v23 }
 0x10c PF: > { %p11_p9 = scmp.ge.s32.totalorder %s727_s19, 4   ;;  %s925_s15 = smov %s679_s16 }
 0x10d   : > { %s926_s16 = smov %s736_s22  ;;  %s927_s17 = smov %s727_s19 }
 0x10e   :  { %13 = sbr.rel (!%p11_p9) target bundleno = 2 (0x2), region = 94 }

// kernel: _forward_padded.15
= control target key start
LH: loop header
LB: loop body
LE: loop exit
PB: predicated region body
PF: predicated region fallthrough
CT: control target
= control target key end

     0   :  { %v935_v4 = vmov 0.0   ;;  %vm53_vm0 = vcmask 261120   ;;  %s1513_s0 = inlined_call_operand.vmem [shape: f32[8,32], index: 0, kind: input, shape index: {}]   ;;  %s1514_s1 = inlined_call_operand.vmem [shape: f32[32,512], index: 1, kind: input, shape index: {}]   ;;  %s1515_s2 = inlined_call_operand.vmem [shape: f32[512,128], index: 2, kind: input, shape index: {}]   ;;  %s1516_s3 = inlined_call_operand.vmem [shape: f32[1,128], index: 3, kind: input, shape index: {}]   ;;  %s1517_s4 = inlined_call_operand.vmem [shape: f32[128,128], index: 4, kind: input, shape index: {}]   ;;  %s1518_s5 = inlined_call_operand.vmem [shape: f32[1,128], index: 5, kind: input, shape index: {}]   ;;  %s1519_s6 = inlined_call_operand.vmem [shape: f32[128,256], index: 6, kind: input, shape index: {}]   ;;  %s1520_s7 = inlined_call_operand.vmem [shape: f32[1,256], index: 7, kind: input, shape index: {}]   ;;  %s1521_s8 = inlined_call_operand.vmem [shape: f32[256,128], index: 8, kind: input, shape index: {}]   ;;  %s1522_s9 = inlined_call_operand.vmem [shape: f32[1,128], index: 9, kind: input, shape index: {}]   ;;  %s1523_s10 = inlined_call_operand.hbm [shape: f32[8,128], index: 10, kind: output, shape index: {}]  }
   0x1   :  { %v50_v0 = vld [vmem:[%s1514_s1 + $0x68] sm:$0xff]  ;;  %v49_v1 = vld [vmem:[%s1514_s1 + $0x60] sm:$0xff]  ;;  %121 = vmatprep.mubr.f32.mxu1 %v935_v4  ;;  %v230_v10 = vld [vmem:[%s1515_s2 + $0xf8] sm:$0xff] }
   0x2   :  { %v46_v2 = vld [vmem:[%s1514_s1 + $0x48] sm:$0xff]  ;;  %81 = vmatprep.subr.mxu1 %v50_v0  ;;  %v45_v3 = vld [vmem:[%s1514_s1 + $0x40] sm:$0xff]  ;;  %v52_v11 = vld [vmem:[%s1514_s1 + $0x78] sm:$0xff]  ;;  %753 = vmatprep.subr.mxu0 %v230_v10 }
   0x3   :  { %82 = vmatpush1.msra.mxu1 %v49_v1  ;;  %v42_v5 = vld [vmem:[%s1514_s1 + $0x28] sm:$0xff]  ;;  %v41_v6 = vld [vmem:[%s1514_s1 + $0x20] sm:$0xff]  ;;  %v214_v12 = vld [vmem:[%s1515_s2 + $0x78] sm:$0xff] }
   0x4   :  { %83 = vmatprep.subr.mxu1 %v46_v2  ;;  %v38_v7 = vld [vmem:[%s1514_s1 + $0x8] sm:$0xff]  ;;  %v37_v8 = vld [vmem:[%s1514_s1] sm:$0xff]  ;;  %v229_v13 = vld [vmem:[%s1515_s2 + $0xf0] sm:$0xff]  ;;  %754 = vmatpush3.msra.mxu0 %v214_v12 }
   0x5   :  { %84 = vmatpush1.msra.mxu1 %v45_v3  ;;  %v36_v9 = vld [vmem:[%s1513_s0] sm:$0xff]  ;;  %v51_v14 = vld [vmem:[%s1514_s1 + $0x70] sm:$0xff]  ;;  %v48_v15 = vld [vmem:[%s1514_s1 + $0x58] sm:$0xff]  ;;  %755 = vmatprep.subr.mxu0 %v229_v13 }
   0x6   :  { %85 = vmatprep.subr.mxu1 %v42_v5  ;;  %v213_v16 = vld [vmem:[%s1515_s2 + $0x70] sm:$0xff]  ;;  %v228_v18 = vld [vmem:[%s1515_s2 + $0xe8] sm:$0xff]  ;;  %v44_v19 = vld [vmem:[%s1514_s1 + $0x38] sm:$0xff] }
   0x7   :  { %86 = vmatpush1.msra.mxu1 %v41_v6  ;;  %v47_v17 = vld [vmem:[%s1514_s1 + $0x50] sm:$0xff]  ;;  %v212_v20 = vld [vmem:[%s1515_s2 + $0x68] sm:$0xff]  ;;  %756 = vmatpush3.msra.mxu0 %v213_v16  ;;  %v227_v22 = vld [vmem:[%s1515_s2 + $0xe0] sm:$0xff] }
   0x8   :  { %87 = vmatprep.subr.mxu1 %v38_v7  ;;  %v43_v21 = vld [vmem:[%s1514_s1 + $0x30] sm:$0xff]  ;;  %v40_v23 = vld [vmem:[%s1514_s1 + $0x18] sm:$0xff]  ;;  %757 = vmatprep.subr.mxu0 %v228_v18  ;;  %v211_v24 = vld [vmem:[%s1515_s2 + $0x60] sm:$0xff] }
   0x9   :  { %88 = vmatpush1.msra.mxu1 %v37_v8  ;;  %v39_v25 = vld [vmem:[%s1514_s1 + $0x10] sm:$0xff]  ;;  %758 = vmatpush3.msra.mxu0 %v212_v20  ;;  %v226_v26 = vld [vmem:[%s1515_s2 + $0xd8] sm:$0xff]  ;;  %v224_v34 = vld [vmem:[%s1515_s2 + $0xc8] sm:$0xff] }
   0xa   :  { %748 = vmatmul.mubr.msk.f32.vlgmr.msra.gmra.mxu1 %vm53_vm0, %v36_v9  ;;  %152 = vmatprep.subr.mxu1 %v52_v11  ;;  %v262_v27 = vld [vmem:[%s1515_s2 + $0x1f8] sm:$0xff]  ;;  %v225_v30 = vld [vmem:[%s1515_s2 + $0xd0] sm:$0xff]  ;;  %v260_v35 = vld [vmem:[%s1515_s2 + $0x1e8] sm:$0xff] }
   0xb   :  { %153 = vmatpush1.msra.mxu1 %v51_v14  ;;  %192 = vmatprep.mubr.f32.mxu1 %v935_v4  ;;  %v210_v28 = vld [vmem:[%s1515_s2 + $0x58] sm:$0xff]  ;;  %v261_v31 = vld [vmem:[%s1515_s2 + $0x1f0] sm:$0xff]  ;;  %v208_v36 = vld [vmem:[%s1515_s2 + $0x48] sm:$0xff] }
   0xc   :  { %154 = vmatprep.subr.mxu1 %v48_v15  ;;  %759 = vmatprep.subr.mxu0 %v227_v22  ;;  %v246_v29 = vld [vmem:[%s1515_s2 + $0x178] sm:$0xff]  ;;  %v209_v32 = vld [vmem:[%s1515_s2 + $0x50] sm:$0xff]  ;;  %v244_v37 = vld [vmem:[%s1515_s2 + $0x168] sm:$0xff] }
   0xd   :  { %155 = vmatpush1.msra.mxu1 %v47_v17  ;;  %760 = vmatpush3.msra.mxu0 %v211_v24  ;;  %v245_v33 = vld [vmem:[%s1515_s2 + $0x170] sm:$0xff]  ;;  %v223_v38 = vld [vmem:[%s1515_s2 + $0xc0] sm:$0xff] }
   0xe   :  { %156 = vmatprep.subr.mxu1 %v44_v19  ;;  %761 = vmatprep.subr.mxu0 %v226_v26  ;;  %v259_v39 = vld [vmem:[%s1515_s2 + $0x1e0] sm:$0xff] }
   0xf   :  { %157 = vmatpush1.msra.mxu1 %v43_v21  ;;  %762 = vmatpush3.msra.mxu0 %v210_v28  ;;  %v207_v40 = vld [vmem:[%s1515_s2 + $0x40] sm:$0xff] }
  0x10   :  { %158 = vmatprep.subr.mxu1 %v40_v23  ;;  %763 = vmatprep.subr.mxu0 %v225_v30  ;;  %v243_v41 = vld [vmem:[%s1515_s2 + $0x160] sm:$0xff] }
  0x11   :  { %159 = vmatpush1.msra.mxu1 %v39_v25  ;;  %764 = vmatpush3.msra.mxu0 %v209_v32 }
  0x12   :  { %749 = vmatmul.mubr.msk.f32.vlgmr.msra.gmra.mxu1 %vm53_vm0, %v36_v9  ;;  %788 = vmatprep.subr.mxu1 %v262_v27 }
  0x13   :  { %789 = vmatpush3.msra.mxu1 %v246_v29  ;;  %765 = vmatprep.subr.mxu0 %v224_v34 }
  0x14   :  { %790 = vmatprep.subr.mxu1 %v261_v31 }
  0x15   :  { %791 = vmatpush3.msra.mxu1 %v245_v33 }
  0x16   :  { %792 = vmatprep.subr.mxu1 %v260_v35 }
  0x17   :  { %15 = vsyncpa [#allocation3], 0  ;;  %766 = vmatpush3.msra.mxu0 %v208_v36  ;;  %793 = vmatpush3.msra.mxu1 %v244_v37  ;;  %v222_v42 = vld [vmem:[%s1515_s2 + $0xb8] sm:$0xff]  ;;  %v221_v46 = vld [vmem:[%s1515_s2 + $0xb0] sm:$0xff]  ;;  %vm936_vm1 = vmmov 0   ;;  %s937_s17 = smov [#allocation2]  }
  0x18   :  { %v258_v43 = vld [vmem:[%s1515_s2 + $0x1d8] sm:$0xff]  ;;  %767 = vmatprep.subr.mxu0 %v223_v38  ;;  %794 = vmatprep.subr.mxu1 %v259_v39  ;;  %v257_v47 = vld [vmem:[%s1515_s2 + $0x1d0] sm:$0xff]  ;;  %v220_v50 = vld [vmem:[%s1515_s2 + $0xa8] sm:$0xff]  ;;  %s740_s18 = sshll.u32 %s937_s17, 4  ;;  %s741_s18 = int_to_ptr.vmem [resolvable:$true] %s740_s18 }
  0x19   :  { %v206_v44 = vld [vmem:[%s1515_s2 + $0x38] sm:$0xff]  ;;  %768 = vmatpush3.msra.mxu0 %v207_v40  ;;  %795 = vmatpush3.msra.mxu1 %v243_v41  ;;  %v205_v48 = vld [vmem:[%s1515_s2 + $0x30] sm:$0xff]  ;;  %v256_v51 = vld [vmem:[%s1515_s2 + $0x1c8] sm:$0xff]  ;;  %p918_p1 = scmp.lt.s32.totalorder %s741_s18, %s741_s18 }
  0x1a   :  { %v242_v45 = vld [vmem:[%s1515_s2 + $0x158] sm:$0xff]  ;;  %769 = vmatprep.subr.mxu0 %v222_v42  ;;  %796 = vmatprep.subr.mxu1 %v258_v43  ;;  %v241_v49 = vld [vmem:[%s1515_s2 + $0x150] sm:$0xff]  ;;  %v204_v52 = vld [vmem:[%s1515_s2 + $0x28] sm:$0xff] }
  0x1b   :  { %770 = vmatpush3.msra.mxu0 %v206_v44  ;;  %797 = vmatpush3.msra.mxu1 %v242_v45  ;;  %v240_v53 = vld [vmem:[%s1515_s2 + $0x148] sm:$0xff]  ;;  %v219_v54 = vld [vmem:[%s1515_s2 + $0xa0] sm:$0xff]  ;;  %v218_v58 = vld [vmem:[%s1515_s2 + $0x98] sm:$0xff] }
  0x1c   :  { %771 = vmatprep.subr.mxu0 %v221_v46  ;;  %798 = vmatprep.subr.mxu1 %v257_v47  ;;  %v255_v55 = vld [vmem:[%s1515_s2 + $0x1c0] sm:$0xff]  ;;  %v254_v59 = vld [vmem:[%s1515_s2 + $0x1b8] sm:$0xff]  ;;  %v217_v62 = vld [vmem:[%s1515_s2 + $0x90] sm:$0xff] }
  0x1d   :  { %772 = vmatpush3.msra.mxu0 %v205_v48  ;;  %799 = vmatpush3.msra.mxu1 %v241_v49  ;;  %v203_v56 = vld [vmem:[%s1515_s2 + $0x20] sm:$0xff]  ;;  %v202_v60 = vld [vmem:[%s1515_s2 + $0x18] sm:$0xff]  ;;  %v253_v63 = vld [vmem:[%s1515_s2 + $0x1b0] sm:$0xff] }
  0x1e   :  { %773 = vmatprep.subr.mxu0 %v220_v50  ;;  %800 = vmatprep.subr.mxu1 %v256_v51  ;;  %v239_v57 = vld [vmem:[%s1515_s2 + $0x140] sm:$0xff]  ;;  %v238_v61 = vld [vmem:[%s1515_s2 + $0x138] sm:$0xff]  ;;  %v201_v0 = vld [vmem:[%s1515_s2 + $0x10] sm:$0xff] }
  0x1f   :  { %774 = vmatpush3.msra.mxu0 %v204_v52  ;;  %801 = vmatpush3.msra.mxu1 %v240_v53  ;;  %v237_v1 = vld [vmem:[%s1515_s2 + $0x130] sm:$0xff]  ;;  %v216_v2 = vld [vmem:[%s1515_s2 + $0x88] sm:$0xff]  ;;  %v215_v7 = vld [vmem:[%s1515_s2 + $0x80] sm:$0xff] }
  0x20   :  { %775 = vmatprep.subr.mxu0 %v219_v54  ;;  %802 = vmatprep.subr.mxu1 %v255_v55  ;;  %v252_v3 = vld [vmem:[%s1515_s2 + $0x1a8] sm:$0xff]  ;;  %v251_v8 = vld [vmem:[%s1515_s2 + $0x1a0] sm:$0xff]  ;;  %v250_v11 = vld [vmem:[%s1515_s2 + $0x198] sm:$0xff] }
  0x21   :  { %776 = vmatpush3.msra.mxu0 %v203_v56  ;;  %803 = vmatpush3.msra.mxu1 %v239_v57  ;;  %v200_v5 = vld [vmem:[%s1515_s2 + $0x8] sm:$0xff]  ;;  %v199_v9 = vld [vmem:[%s1515_s2] sm:$0xff]  ;;  %v234_v12 = vld [vmem:[%s1515_s2 + $0x118] sm:$0xff] }
  0x22   :  { %777 = vmatprep.subr.mxu0 %v218_v58  ;;  %804 = vmatprep.subr.mxu1 %v254_v59  ;;  %v236_v6 = vld [vmem:[%s1515_s2 + $0x128] sm:$0xff]  ;;  %v235_v10 = vld [vmem:[%s1515_s2 + $0x120] sm:$0xff]  ;;  %v249_v13 = vld [vmem:[%s1515_s2 + $0x190] sm:$0xff] }
  0x23   :  { %778 = vmatpush3.msra.mxu0 %v202_v60  ;;  %805 = vmatpush3.msra.mxu1 %v238_v61  ;;  %v233_v14 = vld [vmem:[%s1515_s2 + $0x110] sm:$0xff]  ;;  %v248_v15 = vld [vmem:[%s1515_s2 + $0x188] sm:$0xff]  ;;  %v247_v17 = vld [vmem:[%s1515_s2 + $0x180] sm:$0xff] }
  0x24   :  { %779 = vmatprep.subr.mxu0 %v217_v62  ;;  %806 = vmatprep.subr.mxu1 %v253_v63  ;;  %v232_v16 = vld [vmem:[%s1515_s2 + $0x108] sm:$0xff]  ;;  %v231_v18 = vld [vmem:[%s1515_s2 + $0x100] sm:$0xff]  ;;  %v428_v21 = vld [vmem:[%s1517_s4 + $0x78] sm:$0xff] }
  0x25   :  { %780 = vmatpush3.msra.mxu0 %v201_v0  ;;  %807 = vmatpush3.msra.mxu1 %v237_v1  ;;  %v427_v22 = vld [vmem:[%s1517_s4 + $0x70] sm:$0xff]  ;;  %v426_v23 = vld [vmem:[%s1517_s4 + $0x68] sm:$0xff]  ;;  %v425_v25 = vld [vmem:[%s1517_s4 + $0x60] sm:$0xff] }
  0x26   :  { %781 = vmatprep.subr.mxu0 %v216_v2  ;;  %808 = vmatprep.subr.mxu1 %v252_v3  ;;  %v424_v27 = vld [vmem:[%s1517_s4 + $0x58] sm:$0xff]  ;;  %v423_v28 = vld [vmem:[%s1517_s4 + $0x50] sm:$0xff]  ;;  %v422_v29 = vld [vmem:[%s1517_s4 + $0x48] sm:$0xff] }
  0x27   :  { %782 = vmatpush3.msra.mxu0 %v200_v5  ;;  %809 = vmatpush3.msra.mxu1 %v236_v6  ;;  %v421_v30 = vld [vmem:[%s1517_s4 + $0x40] sm:$0xff]  ;;  %v420_v31 = vld [vmem:[%s1517_s4 + $0x38] sm:$0xff]  ;;  %v419_v32 = vld [vmem:[%s1517_s4 + $0x30] sm:$0xff] }
  0x28   :  { %783 = vmatprep.subr.mxu0 %v215_v7  ;;  %810 = vmatprep.subr.mxu1 %v251_v8  ;;  %v418_v33 = vld [vmem:[%s1517_s4 + $0x28] sm:$0xff]  ;;  %v417_v34 = vld [vmem:[%s1517_s4 + $0x20] sm:$0xff]  ;;  %v416_v35 = vld [vmem:[%s1517_s4 + $0x18] sm:$0xff] }
  0x29   :  { %784 = vmatpush3.msra.mxu0 %v199_v9  ;;  %811 = vmatpush3.msra.mxu1 %v235_v10  ;;  %v415_v36 = vld [vmem:[%s1517_s4 + $0x10] sm:$0xff]  ;;  %v414_v37 = vld [vmem:[%s1517_s4 + $0x8] sm:$0xff]  ;;  %v413_v38 = vld [vmem:[%s1517_s4] sm:$0xff] }
  0x2a   :  { %812 = vmatprep.subr.mxu1 %v250_v11  ;;  %875 = vmatprep.subr.mxu0 %v935_v4  ;;  %v538_v39 = vld [vmem:[%s1519_s6 + $0xf8] sm:$0xff]  ;;  %v537_v40 = vld [vmem:[%s1519_s6 + $0xf0] sm:$0xff]  ;;  %v536_v41 = vld [vmem:[%s1519_s6 + $0xe8] sm:$0xff] }
  0x2b   :  { %813 = vmatpush3.msra.mxu1 %v234_v12  ;;  %v535_v42 = vld [vmem:[%s1519_s6 + $0xe0] sm:$0xff]  ;;  %v533_v43 = vld [vmem:[%s1519_s6 + $0xd0] sm:$0xff]  ;;  %v532_v44 = vld [vmem:[%s1519_s6 + $0xc8] sm:$0xff] }
  0x2c   :  { %814 = vmatprep.subr.mxu1 %v249_v13  ;;  %v531_v45 = vld [vmem:[%s1519_s6 + $0xc0] sm:$0xff]  ;;  %v530_v46 = vld [vmem:[%s1519_s6 + $0xb8] sm:$0xff]  ;;  %v529_v47 = vld [vmem:[%s1519_s6 + $0xb0] sm:$0xff] }
  0x2d   :  { %815 = vmatpush3.msra.mxu1 %v233_v14  ;;  %v528_v48 = vld [vmem:[%s1519_s6 + $0xa8] sm:$0xff]  ;;  %v527_v49 = vld [vmem:[%s1519_s6 + $0xa0] sm:$0xff]  ;;  %v526_v50 = vld [vmem:[%s1519_s6 + $0x98] sm:$0xff] }
  0x2e   :  { %816 = vmatprep.subr.mxu1 %v248_v15  ;;  %v525_v51 = vld [vmem:[%s1519_s6 + $0x90] sm:$0xff]  ;;  %v524_v52 = vld [vmem:[%s1519_s6 + $0x88] sm:$0xff]  ;;  %v523_v53 = vld [vmem:[%s1519_s6 + $0x80] sm:$0xff] }
  0x2f   :  { %817 = vmatpush3.msra.mxu1 %v232_v16  ;;  %v522_v54 = vld [vmem:[%s1519_s6 + $0x78] sm:$0xff]  ;;  %v521_v55 = vld [vmem:[%s1519_s6 + $0x70] sm:$0xff]  ;;  %v520_v56 = vld [vmem:[%s1519_s6 + $0x68] sm:$0xff] }
  0x30   :  { %818 = vmatprep.subr.mxu1 %v247_v17  ;;  %v519_v57 = vld [vmem:[%s1519_s6 + $0x60] sm:$0xff]  ;;  %v518_v58 = vld [vmem:[%s1519_s6 + $0x58] sm:$0xff]  ;;  %v517_v59 = vld [vmem:[%s1519_s6 + $0x50] sm:$0xff] }
  0x31   :  { %819 = vmatpush3.msra.mxu1 %v231_v18  ;;  %v516_v60 = vld [vmem:[%s1519_s6 + $0x48] sm:$0xff]  ;;  %v515_v61 = vld [vmem:[%s1519_s6 + $0x40] sm:$0xff]  ;;  %v514_v62 = vld [vmem:[%s1519_s6 + $0x38] sm:$0xff] }
  0x32   :  { %551 = vmatprep.subr.mxu1 %v538_v39  ;;  %v513_v63 = vld [vmem:[%s1519_s6 + $0x30] sm:$0xff]  ;;  %v512_v0 = vld [vmem:[%s1519_s6 + $0x28] sm:$0xff]  ;;  %v750_v5 = vld [vmem:[%s1516_s3] ss:$0 sm:$0xff] }
  0x33   :  { %v511_v13 = vld [vmem:[%s1519_s6 + $0x20] sm:$0xff]  ;;  %v510_v14 = vld [vmem:[%s1519_s6 + $0x18] sm:$0xff]  ;;  %v509_v15 = vld [vmem:[%s1519_s6 + $0x10] sm:$0xff] }
  0x34   :  { %v508_v16 = vld [vmem:[%s1519_s6 + $0x8] sm:$0xff]  ;;  %v507_v17 = vld [vmem:[%s1519_s6] sm:$0xff]  ;;  %v655_v18 = vld [vmem:[%s1521_s8 + $0xf8] sm:$0xff] }
  0x35   :  { %v629_v39 = vld [vmem:[%s1521_s8 + $0x28] sm:$0xff] }
  0xca   :  { %v123_v19 = vpop.f32.mrf.mxu1 }
  0xcc   :  { %v125_v20 = vpop.f32.mrf.mxu1 }
  0xcd   :  { %334 = vmatprep.mubr.f32.mxu0 %v125_v20  ;;  %v654_v20 = vld [vmem:[%s1521_s8 + $0xf0] sm:$0xff] }
  0xce   :  { %335 = vmatmul.mubr.f32.vlgmr.msra.gmra.mxu0 %v123_v19  ;;  %v639_v19 = vld [vmem:[%s1521_s8 + $0x78] sm:$0xff] }
  0xcf   :  { %876 = vmatpush3.msra.mxu0 %v428_v21  ;;  %907 = vmatprep.mubr.msk.f32.mxu0 %vm936_vm1, %v935_v4  ;;  %v638_v21 = vld [vmem:[%s1521_s8 + $0x70] sm:$0xff] }
  0xd0   :  { %877 = vmatprep.subr.mxu0 %v935_v4 }
  0xd1   :  { %878 = vmatpush3.msra.mxu0 %v427_v22  ;;  %v653_v22 = vld [vmem:[%s1521_s8 + $0xe8] sm:$0xff] }
  0xd2   :  { %v194_v24 = vpop.f32.mrf.mxu1  ;;  %879 = vmatprep.subr.mxu0 %v935_v4 }
  0xd3   :  { %880 = vmatpush3.msra.mxu0 %v426_v23  ;;  %v637_v23 = vld [vmem:[%s1521_s8 + $0x68] sm:$0xff] }
  0xd4   :  { %v196_v26 = vpop.f32.mrf.mxu1  ;;  %881 = vmatprep.subr.mxu0 %v935_v4 }
  0xd5   :  { %404 = vmatprep.mubr.f32.mxu1 %v196_v26  ;;  %882 = vmatpush3.msra.mxu0 %v425_v25  ;;  %v636_v25 = vld [vmem:[%s1521_s8 + $0x60] sm:$0xff]  ;;  %v651_v26 = vld [vmem:[%s1521_s8 + $0xd8] sm:$0xff] }
  0xd6   :  { %405 = vmatmul.mubr.f32.vlgmr.msra.gmra.mxu1 %v194_v24  ;;  %883 = vmatprep.subr.mxu0 %v935_v4  ;;  %v652_v24 = vld [vmem:[%s1521_s8 + $0xe0] sm:$0xff] }
  0xd7   :  { %884 = vmatpush3.msra.mxu0 %v424_v27  ;;  %615 = vmatprep.mubr.f32.mxu1 %v935_v4  ;;  %v635_v27 = vld [vmem:[%s1521_s8 + $0x58] sm:$0xff] }
  0xd8   :  { %885 = vmatprep.subr.mxu0 %v935_v4  ;;  %552 = vmatpush1.msra.mxu1 %v537_v40  ;;  %v644_v40 = vld [vmem:[%s1521_s8 + $0xa0] sm:$0xff] }
  0xd9   :  { %886 = vmatpush3.msra.mxu0 %v423_v28  ;;  %553 = vmatprep.subr.mxu1 %v536_v41  ;;  %v650_v28 = vld [vmem:[%s1521_s8 + $0xd0] sm:$0xff]  ;;  %v628_v41 = vld [vmem:[%s1521_s8 + $0x20] sm:$0xff] }
  0xda   :  { %887 = vmatprep.subr.mxu0 %v935_v4  ;;  %554 = vmatpush1.msra.mxu1 %v535_v42  ;;  %v751_v42 = vld [vmem:[%s1518_s5] ss:$0 sm:$0xff] }
  0xdb   :  { %888 = vmatpush3.msra.mxu0 %v422_v29  ;;  %v634_v29 = vld [vmem:[%s1521_s8 + $0x50] sm:$0xff] }
  0xdc   :  { %889 = vmatprep.subr.mxu0 %v935_v4 }
  0xdd   :  { %890 = vmatpush3.msra.mxu0 %v421_v30  ;;  %v649_v30 = vld [vmem:[%s1521_s8 + $0xc8] sm:$0xff] }
  0xde   :  { %891 = vmatprep.subr.mxu0 %v935_v4 }
  0xdf   :  { %892 = vmatpush3.msra.mxu0 %v420_v31  ;;  %v633_v31 = vld [vmem:[%s1521_s8 + $0x48] sm:$0xff] }
  0xe0   :  { %893 = vmatprep.subr.mxu0 %v935_v4 }
  0xe1   :  { %894 = vmatpush3.msra.mxu0 %v419_v32  ;;  %v648_v32 = vld [vmem:[%s1521_s8 + $0xc0] sm:$0xff] }
  0xe2   :  { %895 = vmatprep.subr.mxu0 %v935_v4 }
  0xe3   :  { %896 = vmatpush3.msra.mxu0 %v418_v33  ;;  %v632_v33 = vld [vmem:[%s1521_s8 + $0x40] sm:$0xff] }
  0xe4   :  { %897 = vmatprep.subr.mxu0 %v935_v4 }
  0xe5   :  { %898 = vmatpush3.msra.mxu0 %v417_v34  ;;  %v647_v34 = vld [vmem:[%s1521_s8 + $0xb8] sm:$0xff] }
  0xe6   :  { %899 = vmatprep.subr.mxu0 %v935_v4 }
  0xe7   :  { %900 = vmatpush3.msra.mxu0 %v416_v35  ;;  %v631_v35 = vld [vmem:[%s1521_s8 + $0x38] sm:$0xff] }
  0xe8   :  { %901 = vmatprep.subr.mxu0 %v935_v4 }
  0xe9   :  { %902 = vmatpush3.msra.mxu0 %v415_v36  ;;  %v646_v36 = vld [vmem:[%s1521_s8 + $0xb0] sm:$0xff] }
  0xea   :  { %903 = vmatprep.subr.mxu0 %v935_v4 }
  0xeb   :  { %904 = vmatpush3.msra.mxu0 %v414_v37  ;;  %v630_v37 = vld [vmem:[%s1521_s8 + $0x30] sm:$0xff] }
  0xec   :  { %905 = vmatprep.subr.mxu0 %v935_v4  ;;  %v534_v4 = vld [vmem:[%s1519_s6 + $0xd8] sm:$0xff] }
  0xed   :  { %906 = vmatpush3.msra.mxu0 %v413_v38  ;;  %555 = vmatprep.subr.mxu1 %v534_v4  ;;  %v645_v38 = vld [vmem:[%s1521_s8 + $0xa8] sm:$0xff] }
  0xee   :  { %556 = vmatpush1.msra.mxu1 %v533_v43  ;;  %840 = vmatprep.subr.mxu0 %v655_v18 }
  0xef   :  { %557 = vmatprep.subr.mxu1 %v532_v44 }
  0xf0   :  { %558 = vmatpush1.msra.mxu1 %v531_v45 }
  0xf1   :  { %559 = vmatprep.subr.mxu1 %v530_v46  ;;  %v643_v46 = vld [vmem:[%s1521_s8 + $0x98] sm:$0xff] }
  0xf2   :  { %560 = vmatpush1.msra.mxu1 %v529_v47  ;;  %v627_v47 = vld [vmem:[%s1521_s8 + $0x18] sm:$0xff] }
  0xf3   :  { %561 = vmatprep.subr.mxu1 %v528_v48  ;;  %v642_v48 = vld [vmem:[%s1521_s8 + $0x90] sm:$0xff] }
  0xf4   :  { %562 = vmatpush1.msra.mxu1 %v527_v49  ;;  %v626_v49 = vld [vmem:[%s1521_s8 + $0x10] sm:$0xff] }
  0xf5   :  { %563 = vmatprep.subr.mxu1 %v526_v50  ;;  %v641_v50 = vld [vmem:[%s1521_s8 + $0x88] sm:$0xff] }
  0xf6   :  { %564 = vmatpush1.msra.mxu1 %v525_v51  ;;  %v625_v51 = vld [vmem:[%s1521_s8 + $0x8] sm:$0xff] }
  0xf7   :  { %565 = vmatprep.subr.mxu1 %v524_v52  ;;  %v640_v52 = vld [vmem:[%s1521_s8 + $0x80] sm:$0xff] }
  0xf8   :  { %566 = vmatpush1.msra.mxu1 %v523_v53  ;;  %v624_v53 = vld [vmem:[%s1521_s8] sm:$0xff] }
  0xf9   :  { %567 = vmatprep.subr.mxu1 %v522_v54  ;;  %v541_v54 = vlaneseq }
  0xfa   :  { %568 = vmatpush1.msra.mxu1 %v521_v55 }
  0xfb   :  { %569 = vmatprep.subr.mxu1 %v520_v56  ;;  %v542_v55 = vshrl.u32 %v541_v54, 7 }
  0xfc   :  { %570 = vmatpush1.msra.mxu1 %v519_v57  ;;  %v539_v57 = vld [vmem:[%s1520_s7] sm:$0x3]  ;;  %s913_s7 = scalar_lea.vmem %s741_s18, 128 }
  0xfd   :  { %571 = vmatprep.subr.mxu1 %v518_v58  ;;  %v543_v56 = vsub.s32 0, %v542_v55  ;;  %v547_v58 = vsub.s32 1, %v542_v55  ;;  %p914_p0 = scmp.ne.s32.totalorder %s741_s18, %s913_s7  ;;  %p919_p2 = scmp.lt.s32.totalorder %s913_s7, %s913_s7 }
  0xfe   :  { %572 = vmatpush1.msra.mxu1 %v517_v59 }
  0xff   :  { %573 = vmatprep.subr.mxu1 %v516_v60  ;;  %v544_v59 = vrot.slane %v539_v57, %v543_v56  ;;  %v548_v60 = vrot.slane %v539_v57, %v547_v58  ;;  %p920_p3 = por %p919_p2, %p918_p1 }
 0x100   :  { %574 = vmatpush1.msra.mxu1 %v515_v61 }
 0x101   :  { %575 = vmatprep.subr.mxu1 %v514_v62  ;;  %p921_p4 = pnand %p920_p3, %p914_p0 }
 0x102   :  { %576 = vmatpush1.msra.mxu1 %v513_v63 }
 0x103   :  { %577 = vmatprep.subr.mxu1 %v512_v0 }
 0x104   :  { %578 = vmatpush1.msra.mxu1 %v511_v13 }
 0x105   :  { %579 = vmatprep.subr.mxu1 %v510_v14 }
 0x106   :  { %580 = vmatpush1.msra.mxu1 %v509_v15 }
 0x107   :  { %581 = vmatprep.subr.mxu1 %v508_v16 }
 0x108   :  { %582 = vmatpush1.msra.mxu1 %v507_v17 }
 0x18e   :  { %v785_v1 = vpop.f32.mrf.mxu0 }
 0x190   :  { %v786_v2 = vpop.f32.mrf.mxu0 }
 0x191   :  { %v787_v3 = vadd.f32 %v786_v2, %v785_v1 }
 0x193   :  { %v337_v8 = vadd.f32 %v787_v3, %v750_v5 }
 0x196   :  { %v820_v6 = vpop.f32.mrf.mxu1 }
 0x198   :  { %v821_v7 = vpop.f32.mrf.mxu1 }
 0x199   :  { %v822_v9 = vadd.f32 %v821_v7, %v820_v6  ;;  %v752_v6 = vld [vmem:[%s1522_s9] ss:$0 sm:$0xff] }
 0x19b   :  { %v407_v10 = vadd.f32 %v822_v9, %v337_v8 }
 0x19d   :  { %v411_v11 = vmul.f32 0.1, %v407_v10  ;;  %vm410_vm2 = vcmp.gt.f32.partialorder %v407_v10, 0.0 }
 0x19f   :  { %v412_v12 = vsel %vm410_vm2, %v407_v10, %v411_v11 }
 0x1a0   :  { %908 = vmatmul.mubr.f32.vlgmr.msra.gmra.mxu0 %v412_v12 }
 0x1a1   :  { %841 = vmatpush3.msra.mxu0 %v639_v19 }
 0x1a2   :  { %842 = vmatprep.subr.mxu0 %v654_v20 }
 0x1a3   :  { %843 = vmatpush3.msra.mxu0 %v638_v21 }
 0x1a4   :  { %844 = vmatprep.subr.mxu0 %v653_v22 }
 0x1a5   :  { %845 = vmatpush3.msra.mxu0 %v637_v23 }
 0x1a6   :  { %846 = vmatprep.subr.mxu0 %v652_v24 }
 0x1a7   :  { %847 = vmatpush3.msra.mxu0 %v636_v25 }
 0x1a8   :  { %848 = vmatprep.subr.mxu0 %v651_v26 }
 0x1a9   :  { %849 = vmatpush3.msra.mxu0 %v635_v27 }
 0x1aa   :  { %850 = vmatprep.subr.mxu0 %v650_v28 }
 0x1ab   :  { %851 = vmatpush3.msra.mxu0 %v634_v29 }
 0x1ac   :  { %852 = vmatprep.subr.mxu0 %v649_v30 }
 0x1ad   :  { %853 = vmatpush3.msra.mxu0 %v633_v31 }
 0x1ae   :  { %854 = vmatprep.subr.mxu0 %v648_v32 }
 0x1af   :  { %855 = vmatpush3.msra.mxu0 %v632_v33 }
 0x1b0   :  { %856 = vmatprep.subr.mxu0 %v647_v34 }
 0x1b1   :  { %857 = vmatpush3.msra.mxu0 %v631_v35 }
 0x1b2   :  { %858 = vmatprep.subr.mxu0 %v646_v36 }
 0x1b3   :  { %859 = vmatpush3.msra.mxu0 %v630_v37 }
 0x1b4   :  { %860 = vmatprep.subr.mxu0 %v645_v38 }
 0x1b5   :  { %861 = vmatpush3.msra.mxu0 %v629_v39 }
 0x1b6   :  { %862 = vmatprep.subr.mxu0 %v644_v40 }
 0x1b7   :  { %863 = vmatpush3.msra.mxu0 %v628_v41 }
 0x1b8   :  { %864 = vmatprep.subr.mxu0 %v643_v46 }
 0x1b9   :  { %865 = vmatpush3.msra.mxu0 %v627_v47 }
 0x1ba   :  { %866 = vmatprep.subr.mxu0 %v642_v48 }
 0x1bb   :  { %867 = vmatpush3.msra.mxu0 %v626_v49 }
 0x1bc   :  { %868 = vmatprep.subr.mxu0 %v641_v50 }
 0x1bd   :  { %869 = vmatpush3.msra.mxu0 %v625_v51 }
 0x1be   :  { %870 = vmatprep.subr.mxu0 %v640_v52 }
 0x1bf   :  { %871 = vmatpush3.msra.mxu0 %v624_v53 }
 0x260   :  { %v502_v4 = vpop.f32.mrf.mxu0 }
 0x261   :  { %v503_v43 = vadd.f32 %v751_v42, %v502_v4 }
 0x262   :  { %v909_v44 = vpop.f32.mrf.mxu0 }
 0x263   :  { %v506_v45 = vmax.f32 %v503_v43, 0.0 }
 0x265   :  { %616 = vmatmul.mubr.f32.vlgmr.msra.gmra.mxu1 %v506_v45 }
 0x325   :  { %v617_v61 = vpop.f32.mrf.mxu1 }
 0x326   :  { %v618_v62 = vadd.f32 %v617_v61, %v544_v59 }
 0x327   :  { %v619_v63 = vpop.f32.mrf.mxu1 }
 0x328   :  { %v620_v0 = vadd.f32 %v619_v63, %v548_v60  ;;  %v622_v2 = vmax.f32 %v618_v62, 0.0 }
 0x32a   :  { %v623_v1 = vmax.f32 %v620_v0, 0.0 }
 0x32c   :  { %727 = vmatprep.mubr.f32.mxu0 %v623_v1 }
 0x32d   :  { %728 = vmatmul.mubr.f32.vlgmr.msra.gmra.mxu0 %v622_v2 }
 0x3ed   :  { %v872_v3 = vpop.f32.mrf.mxu0 }
 0x3ef   :  { %v873_v5 = vpop.f32.mrf.mxu0 }
 0x3f0   :  { %v874_v7 = vadd.f32 %v873_v5, %v872_v3 }
 0x3f2   :  { %v730_v8 = vadd.f32 %v874_v7, %v752_v6 }
 0x3f4   :  { %733 = vst [vmem:[#allocation2] sm:$0xff] %v730_v8 }
 0x3f5   :  { %924 = shalt.err (!%p921_p4)
}
 0x3f6   :  { %743 = dma.vmem_to_hbm [thread:$0]  %s741_s18, 128, %s1523_s10, [#allocation3]  }
 0x3f7   :  { %933 = dma.done.wait [#allocation3], 128  }
 0x3f8   :  { %934 = vsyncadd [#allocation3], 4294967168 }
 0x3f9   :  { %747 = vsyncpa [#allocation3], 1 }

</bundles_post_ra>
